<compile_context>
chip_gen: v5e
topology: v5e:2x2
jax: 0.10.0
libtpu: 0.0.40
codegen_flags: <defaults>
</compile_context>

<pallas_src>
import functools

import numpy as np
import jax
import jax.numpy as jnp
from jax.experimental import pallas as pl
from jax.experimental.pallas import tpu as pltpu

# ----------------------------- config (small, synthetic) ----------------------------
IMG_SIZE = (16, 16)
PATCH_SIZE = (4, 4)
IN_CHS = 4
OUT_CHS = 4
EMBED_DIM = 32
NUM_BLOCKS = 4            # AFNO2D channel blocks
DEPTH = 2                 # number of transformer blocks (afno2d.n_blocks)
MLP_RATIO = 4
HIDDEN_SIZE_FACTOR = 1
SPARSITY_THRESHOLD = 0.01
HARD_THRESHOLDING_FRACTION = 1.0   # all Fourier modes kept
LN_EPS = 1e-6
DOUBLE_SKIP = True        # only the double-skip path is fused below (config default)

H_PATCH = IMG_SIZE[0] // PATCH_SIZE[0]
W_PATCH = IMG_SIZE[1] // PATCH_SIZE[1]
WF = W_PATCH // 2 + 1
NUM_PATCHES = H_PATCH * W_PATCH
BLOCK_SIZE = EMBED_DIM // NUM_BLOCKS
HIDDEN_SPECTRAL = BLOCK_SIZE * HIDDEN_SIZE_FACTOR
MLP_HIDDEN = EMBED_DIM * MLP_RATIO
MAX_WHOLE_ROWS = 256      # above this many token rows, tile the calls over batch


# --------------------------- small real DFT matrices (trace-time) -------------------
@functools.lru_cache(maxsize=None)
def _dft_mats(hh, ww, nbatch):
    """Real matrices for rfft2 / irfft2 (ortho) over an (hh, ww) grid, block-diagonal
    over `nbatch` batch elements (applied as LEFT matmuls on (nbatch*hh*ww, C) rows).

      forward:  xf[u,v] = s * sum_{h,w} x[h,w] e^{-2i*pi(uh/H + vw/W)},  s = 1/sqrt(HW)
      inverse:  x[h,w]  = s * sum_{u,v} g_v * Re( y[u,v] e^{+2i*pi(uh/H + vw/W)} )
                g_v = 1 for DC / Nyquist columns, 2 otherwise (Hermitian weights) --
                this reproduces irfft's "ignore imag of DC/Nyquist" behaviour exactly.
    """
    wf = ww // 2 + 1
    ah, aw, av = np.arange(hh), np.arange(ww), np.arange(wf)
    scale = 1.0 / np.sqrt(hh * ww)
    fph = np.exp(-2j * np.pi * np.outer(ah, ah) / hh)              # [u, h]
    fpw = np.exp(-2j * np.pi * np.outer(av, aw) / ww)              # [v, w]
    F = (fph[:, None, :, None] * fpw[None, :, None, :]).reshape(hh * wf, hh * ww) * scale
    g = np.where((av == 0) | (2 * av == ww), 1.0, 2.0)
    iph = np.exp(2j * np.pi * np.outer(ah, ah) / hh)               # [h, u]
    ipw = np.exp(2j * np.pi * np.outer(aw, av) / ww) * g[None, :]  # [w, v]
    G = (iph[:, None, :, None] * ipw[None, :, None, :]).reshape(hh * ww, hh * wf) * scale
    eye = np.eye(nbatch)

    def bd(m):
        return np.kron(eye, m).astype(np.float32)

    # filt = Gr @ yr + Gi @ yi ;  xr = Fr @ x ; xi = Fi @ x
    return bd(np.real(F)), bd(np.imag(F)), bd(np.real(G)), bd(-np.imag(G))


# ----------------------------------- kernels ----------------------------------------
def _ln(x, g, b):
    mu = jnp.mean(x, axis=-1, keepdims=True)
    xc = x - mu
    var = jnp.mean(xc * xc, axis=-1, keepdims=True)
    return xc * jax.lax.rsqrt(var + LN_EPS) * g + b


def _patch_embed_kernel(xp_ref, pos_ref, w_ref, b_ref, g_ref, beta_ref,
                        tok_ref, xn_ref, *, reps):
    # fused: patch matmul + bias + positional embedding add + LN1 of block 0.
    # pos is (h*w, D); broadcast over the `reps` batch elements of this tile in-kernel
    # (no (B*h*w, D) HBM materialization).
    tok = (jnp.dot(xp_ref[...], w_ref[...], preferred_element_type=jnp.float32)
           + b_ref[...] + jnp.tile(pos_ref[...], (reps, 1)))
    tok_ref[...] = tok
    xn_ref[...] = _ln(tok, g_ref[...], beta_ref[...])


def _afno_block_core(x_ref, xn_ref, fr_ref, fi_ref, gr_ref, gi_ref,
                     w1r_ref, w1i_ref, b1_ref, w2r_ref, w2i_ref, b2r_ref, b2i_ref,
                     ln2g_ref, ln2b_ref, mw1_ref, mb1_ref, mw2_ref, mb2_ref, lam):
    x = x_ref[...]                      # (rows, C)   block input / residual
    xn = xn_ref[...]                    # (rows, C)   LN1(x), produced by previous call
    # ---- forward 2-D real DFT (ortho) as two left matmuls -------------------------
    xr = jnp.dot(fr_ref[...], xn, preferred_element_type=jnp.float32)   # (S, C)
    xi = jnp.dot(fi_ref[...], xn, preferred_element_type=jnp.float32)   # (S, C)
    # TODO(synk): hard_thresholding_fraction < 1.0 mode masking omitted
    # (fraction == 1.0 here keeps every Fourier mode, so it is a no-op).
    # ---- block-diagonal complex 2-layer MLP, folded into lane-dense real matmuls --
    #   [hr|hi] = relu( xr @ W1R + xi @ W1I + [b1r|b1i] )           (S, 2*Ht)
    #   yr = [hr|hi] @ W2R + b2r ;  yi = [hr|hi] @ W2I + b2i        (S, C) each
    h = (jnp.dot(xr, w1r_ref[...], preferred_element_type=jnp.float32)
         + jnp.dot(xi, w1i_ref[...], preferred_element_type=jnp.float32)
         + b1_ref[...])
    h = jnp.maximum(h, 0.0)
    yr = jnp.dot(h, w2r_ref[...], preferred_element_type=jnp.float32) + b2r_ref[...]
    yi = jnp.dot(h, w2i_ref[...], preferred_element_type=jnp.float32) + b2i_ref[...]
    yr = jnp.where(yr > lam, yr - lam, jnp.where(yr < -lam, yr + lam, 0.0))
    yi = jnp.where(yi > lam, yi - lam, jnp.where(yi < -lam, yi + lam, 0.0))
    # ---- inverse 2-D real DFT (Hermitian-weighted real part) ------------------------
    filt = (jnp.dot(gr_ref[...], yr, preferred_element_type=jnp.float32)
            + jnp.dot(gi_ref[...], yi, preferred_element_type=jnp.float32))   # (rows, C)
    # ---- AFNO filter bias (+xn), double-skip residual (+x) --------------------------
    # TODO(synk): only the double_skip=True path is wired in.
    y = filt + xn + x
    # ---- LN2 -> MLP(GELU) -> +residual ----------------------------------------------
    yn = _ln(y, ln2g_ref[...], ln2b_ref[...])
    hm = jnp.dot(yn, mw1_ref[...], preferred_element_type=jnp.float32) + mb1_ref[...]
    # exact GELU (erf-based), matching torch.nn.GELU default
    hm = 0.5 * hm * (1.0 + jax.lax.erf(hm * 0.7071067811865476))
    return (jnp.dot(hm, mw2_ref[...], preferred_element_type=jnp.float32)
            + mb2_ref[...] + y)


def _afno_block_kernel(x_ref, xn_ref, fr_ref, fi_ref, gr_ref, gi_ref,
                       w1r_ref, w1i_ref, b1_ref, w2r_ref, w2i_ref, b2r_ref, b2i_ref,
                       ln2g_ref, ln2b_ref, mw1_ref, mb1_ref, mw2_ref, mb2_ref,
                       ln1ng_ref, ln1nb_ref, out_ref, xnn_ref, *, lam):
    out = _afno_block_core(x_ref, xn_ref, fr_ref, fi_ref, gr_ref, gi_ref,
                           w1r_ref, w1i_ref, b1_ref, w2r_ref, w2i_ref, b2r_ref, b2i_ref,
                           ln2g_ref, ln2b_ref, mw1_ref, mb1_ref, mw2_ref, mb2_ref, lam)
    out_ref[...] = out
    # LN1 of the NEXT block, so the next pallas_call starts straight at the DFT.
    xnn_ref[...] = _ln(out, ln1ng_ref[...], ln1nb_ref[...])


def _afno_last_block_kernel(x_ref, xn_ref, fr_ref, fi_ref, gr_ref, gi_ref,
                            w1r_ref, w1i_ref, b1_ref, w2r_ref, w2i_ref, b2r_ref, b2i_ref,
                            ln2g_ref, ln2b_ref, mw1_ref, mb1_ref, mw2_ref, mb2_ref,
                            headw_ref, y_ref, *, lam):
    out = _afno_block_core(x_ref, xn_ref, fr_ref, fi_ref, gr_ref, gi_ref,
                           w1r_ref, w1i_ref, b1_ref, w2r_ref, w2i_ref, b2r_ref, b2i_ref,
                           ln2g_ref, ln2b_ref, mw1_ref, mb1_ref, mw2_ref, mb2_ref, lam)
    # fused head (Linear, no bias) -> 64-lane final store
    y_ref[...] = jnp.dot(out, headw_ref[...], preferred_element_type=jnp.float32)


# ---------------------------------- call helper ---------------------------------------
def _batch_tile(batch):
    """None -> single whole-array call; otherwise the per-step batch count (divides B)."""
    if batch * NUM_PATCHES <= MAX_WHOLE_ROWS:
        return None
    bt = max(1, MAX_WHOLE_ROWS // NUM_PATCHES)
    while batch % bt:
        bt -= 1
    return bt


def _call(kernel, row_args, bcast_args, out_cols, batch):
    """Invoke `kernel` on token-row slabs (rows ordered batch-major, h*w per image).

    row_args: (B*h*w, *) activations sharing the row axis.  bcast_args: weights /
    DFT matrices seen in full by every step.  At this toy size everything is one
    whole-array VMEM invocation; for large B the batch axis becomes a "parallel"
    grid (megacore-shardable on v7x, no-op on v5e/v6e) and every step is a full,
    valid batch tile (no whole-array fallback / padding needed).
    """
    rows = row_args[0].shape[0]
    multi = len(out_cols) > 1
    shapes = [jax.ShapeDtypeStruct((rows, c), jnp.float32) for c in out_cols]
    out_shape = tuple(shapes) if multi else shapes[0]

    bt = _batch_tile(batch)
    if bt is None:
        vm = pl.BlockSpec(memory_space=pltpu.MemorySpace.VMEM)
        n_in = len(row_args) + len(bcast_args)
        out_specs = tuple(vm for _ in out_cols) if multi else vm
        return pl.pallas_call(
            kernel, in_specs=[vm] * n_in, out_specs=out_specs, out_shape=out_shape,
        )(*row_args, *bcast_args)

    tile_rows = bt * NUM_PATCHES
    grid = (rows // tile_rows,)
    in_specs = [pl.BlockSpec((tile_rows, a.shape[1]), lambda i: (i, 0)) for a in row_args]
    in_specs += [pl.BlockSpec(a.shape, lambda i, nd=a.ndim: (0,) * nd) for a in bcast_args]
    o_specs = [pl.BlockSpec((tile_rows, c), lambda i: (i, 0)) for c in out_cols]
    out_specs = tuple(o_specs) if multi else o_specs[0]
    return pl.pallas_call(
        kernel, grid=grid, in_specs=in_specs, out_specs=out_specs, out_shape=out_shape,
        compiler_params=pltpu.CompilerParams(dimension_semantics=("parallel",)),
        # TODO(synk): at production sizes (EMBED_DIM~768) cast matmul operands to bf16
        # and set vmem_limit_bytes explicitly for v7x's 64 MiB VMEM.
    )(*row_args, *bcast_args)


# ------------------------------ full forward pass --------------------------------------
def afnonet_forward(x, params):
    # x: (B, in_chs, H_img, W_img)  [NCHW, like PyTorch]
    B = x.shape[0]
    p1, p2 = PATCH_SIZE
    h, w, D = H_PATCH, W_PATCH, EMBED_DIM
    R = B * h * w

    # patch embed: Conv2d(k=stride=patch) == patch-flatten + matmul (+bias +pos fused)
    xp = x.reshape(B, IN_CHS, h, p1, w, p2).transpose(0, 2, 4, 1, 3, 5)
    xp = xp.reshape(R, IN_CHS * p1 * p2).astype(jnp.float32)
    pos = params['pos_embed'].reshape(h * w, D)     # pos_drop: identity (eval)

    bt = _batch_tile(B)
    nb = B if bt is None else bt                     # batch elements per kernel step
    fr, fi, gr, gi = (jnp.asarray(m) for m in _dft_mats(h, w, nb))

    blk0 = params['blocks'][0]
    tok, xn = _call(
        functools.partial(_patch_embed_kernel, reps=nb),
        [xp], [pos, params['patch_w'], params['patch_b'], blk0['ln1_g'], blk0['ln1_b']],
        out_cols=[D, D], batch=B)

    y = None
    n_blk = len(params['blocks'])
    for i, blk in enumerate(params['blocks']):
        fp = blk['filter']
        common = [fr, fi, gr, gi,
                  fp['w1r'], fp['w1i'], fp['b1'], fp['w2r'], fp['w2i'], fp['b2r'], fp['b2i'],
                  blk['ln2_g'], blk['ln2_b'],
                  blk['mlp_w1'], blk['mlp_b1'], blk['mlp_w2'], blk['mlp_b2']]
        if i + 1 < n_blk:
            nxt = params['blocks'][i + 1]
            tok, xn = _call(
                functools.partial(_afno_block_kernel, lam=SPARSITY_THRESHOLD),
                [tok, xn], common + [nxt['ln1_g'], nxt['ln1_b']],
                out_cols=[D, D], batch=B)
        else:
            y = _call(
                functools.partial(_afno_last_block_kernel, lam=SPARSITY_THRESHOLD),
                [tok, xn], common + [params['head_w']],
                out_cols=[OUT_CHS * p1 * p2], batch=B)

    # rearrange 'b h w (p1 p2 c) -> b c (h p1) (w p2)'
    y = y.reshape(B, h, w, p1, p2, OUT_CHS).transpose(0, 5, 1, 3, 2, 4)
    return y.reshape(B, OUT_CHS, h * p1, w * p2)


# ------------------------------- parameter packing / init ------------------------------
def _block_diag(w):
    # (nb, a, b) -> (nb*a, nb*b) block-diagonal
    nb, a, b = w.shape
    eye = jnp.eye(nb, dtype=w.dtype)
    return (eye[:, None, :, None] * w[:, :, None, :]).reshape(nb * a, nb * b)


def pack_afno_filter(w1r, w1i, b1r, b1i, w2r, w2i, b2r, b2i):
    # Fold the per-block complex 2-layer MLP into lane-dense real matrices:
    #   [hr|hi] = relu( xr @ W1R + xi @ W1I + B1 )
    #   yr = [hr|hi] @ W2R + b2r ,  yi = [hr|hi] @ W2I + b2i
    bd_w1r, bd_w1i = _block_diag(w1r), _block_diag(w1i)     # (C, Ht)
    bd_w2r, bd_w2i = _block_diag(w2r), _block_diag(w2i)     # (Ht, C)
    W1R = jnp.concatenate([bd_w1r, bd_w1i], axis=1)          # (C, 2Ht)
    W1I = jnp.concatenate([-bd_w1i, bd_w1r], axis=1)         # (C, 2Ht)
    B1 = jnp.concatenate([b1r.reshape(1, -1), b1i.reshape(1, -1)], axis=1)  # (1, 2Ht)
    W2R = jnp.concatenate([bd_w2r, -bd_w2i], axis=0)          # (2Ht, C)
    W2I = jnp.concatenate([bd_w2i, bd_w2r], axis=0)           # (2Ht, C)
    return {'w1r': W1R, 'w1i': W1I, 'b1': B1, 'w2r': W2R, 'w2i': W2I,
            'b2r': b2r.reshape(1, -1), 'b2i': b2i.reshape(1, -1)}


def init_params(key):
    def nrm(k, shape, scale=0.02):
        return scale * jax.random.normal(k, shape, dtype=jnp.float32)

    keys = jax.random.split(key, 4 + DEPTH)
    params = {
        'patch_w': nrm(keys[0], (IN_CHS * PATCH_SIZE[0] * PATCH_SIZE[1], EMBED_DIM)),
        'patch_b': nrm(keys[1], (1, EMBED_DIM)),
        'pos_embed': nrm(keys[2], (1, NUM_PATCHES, EMBED_DIM)),
        'head_w': nrm(keys[3], (EMBED_DIM, OUT_CHS * PATCH_SIZE[0] * PATCH_SIZE[1])),
        'blocks': [],
    }
    for i in range(DEPTH):
        bk = jax.random.split(keys[4 + i], 12)
        filt = pack_afno_filter(
            nrm(bk[0], (NUM_BLOCKS, BLOCK_SIZE, HIDDEN_SPECTRAL)),
            nrm(bk[1], (NUM_BLOCKS, BLOCK_SIZE, HIDDEN_SPECTRAL)),
            nrm(bk[2], (NUM_BLOCKS, 1, HIDDEN_SPECTRAL)),
            nrm(bk[3], (NUM_BLOCKS, 1, HIDDEN_SPECTRAL)),
            nrm(bk[4], (NUM_BLOCKS, HIDDEN_SPECTRAL, BLOCK_SIZE)),
            nrm(bk[5], (NUM_BLOCKS, HIDDEN_SPECTRAL, BLOCK_SIZE)),
            nrm(bk[6], (NUM_BLOCKS, 1, BLOCK_SIZE)),
            nrm(bk[7], (NUM_BLOCKS, 1, BLOCK_SIZE)),
        )
        blk = {
            'ln1_g': jnp.ones((1, EMBED_DIM), jnp.float32),
            'ln1_b': jnp.zeros((1, EMBED_DIM), jnp.float32),
            'ln2_g': jnp.ones((1, EMBED_DIM), jnp.float32),
            'ln2_b': jnp.zeros((1, EMBED_DIM), jnp.float32),
            'filter': filt,
            'mlp_w1': nrm(bk[8], (EMBED_DIM, MLP_HIDDEN)),
            'mlp_b1': nrm(bk[9], (1, MLP_HIDDEN)),
            'mlp_w2': nrm(bk[10], (MLP_HIDDEN, EMBED_DIM)),
            'mlp_b2': nrm(bk[11], (1, EMBED_DIM)),
        }
        params['blocks'].append(blk)
    return params


# -------------------------------------- main ------------------------------------------
if __name__ == "__main__":
    key = jax.random.PRNGKey(0)
    kx, kp = jax.random.split(key)
    x = jax.random.normal(kx, (2, IN_CHS, IMG_SIZE[0], IMG_SIZE[1]), dtype=jnp.float32)
    params = init_params(kp)

    fwd = jax.jit(afnonet_forward)
    out = jax.block_until_ready(fwd(x, params))

    assert out.shape == (2, OUT_CHS, IMG_SIZE[0], IMG_SIZE[1])
    assert bool(jnp.all(jnp.isfinite(out)))
    print("KERNEL_OK")
</pallas_src>

<mosaic_0001>
module attributes {stable_mosaic.version = 11 : i64} {
  func.func @_afno_block_kernel(%arg0: memref<32x32xf32, #tpu.memory_space<vmem>>, %arg1: memref<32x32xf32, #tpu.memory_space<vmem>>, %arg2: memref<24x32xf32, #tpu.memory_space<vmem>>, %arg3: memref<24x32xf32, #tpu.memory_space<vmem>>, %arg4: memref<32x24xf32, #tpu.memory_space<vmem>>, %arg5: memref<32x24xf32, #tpu.memory_space<vmem>>, %arg6: memref<32x64xf32, #tpu.memory_space<vmem>>, %arg7: memref<32x64xf32, #tpu.memory_space<vmem>>, %arg8: memref<1x64xf32, #tpu.memory_space<vmem>>, %arg9: memref<64x32xf32, #tpu.memory_space<vmem>>, %arg10: memref<64x32xf32, #tpu.memory_space<vmem>>, %arg11: memref<1x32xf32, #tpu.memory_space<vmem>>, %arg12: memref<1x32xf32, #tpu.memory_space<vmem>>, %arg13: memref<1x32xf32, #tpu.memory_space<vmem>>, %arg14: memref<1x32xf32, #tpu.memory_space<vmem>>, %arg15: memref<32x128xf32, #tpu.memory_space<vmem>>, %arg16: memref<1x128xf32, #tpu.memory_space<vmem>>, %arg17: memref<128x32xf32, #tpu.memory_space<vmem>>, %arg18: memref<1x32xf32, #tpu.memory_space<vmem>>, %arg19: memref<1x32xf32, #tpu.memory_space<vmem>>, %arg20: memref<1x32xf32, #tpu.memory_space<vmem>>, %arg21: memref<32x32xf32, #tpu.memory_space<vmem>>, %arg22: memref<32x32xf32, #tpu.memory_space<vmem>>) attributes {dimension_semantics = [], scalar_prefetch = 0 : i64, scratch_operands = 0 : i64, tpu.core_type = #tpu.core_type<tc>} {
    %c0 = arith.constant 0 : index
    %c0_0 = arith.constant 0 : index
    %0 = vector.load %arg0[%c0, %c0_0] : memref<32x32xf32, #tpu.memory_space<vmem>>, vector<32x32xf32>
    %c0_1 = arith.constant 0 : index
    %c0_2 = arith.constant 0 : index
    %1 = vector.load %arg1[%c0_1, %c0_2] : memref<32x32xf32, #tpu.memory_space<vmem>>, vector<32x32xf32>
    %c0_3 = arith.constant 0 : index
    %c0_4 = arith.constant 0 : index
    %2 = vector.load %arg2[%c0_3, %c0_4] : memref<24x32xf32, #tpu.memory_space<vmem>>, vector<24x32xf32>
    %cst = arith.constant dense<0.000000e+00> : vector<24x32xf32>
    %3 = tpu.matmul %2, %1, %cst {dimension_numbers = #tpu.dot_dimension_numbers<[1], [0], [0], [1], [0, 0, 1, 1], [], []>} : vector<24x32xf32>, vector<32x32xf32>, vector<24x32xf32> -> vector<24x32xf32>
    %c0_5 = arith.constant 0 : index
    %c0_6 = arith.constant 0 : index
    %4 = vector.load %arg3[%c0_5, %c0_6] : memref<24x32xf32, #tpu.memory_space<vmem>>, vector<24x32xf32>
    %cst_7 = arith.constant dense<0.000000e+00> : vector<24x32xf32>
    %5 = tpu.matmul %4, %1, %cst_7 {dimension_numbers = #tpu.dot_dimension_numbers<[1], [0], [0], [1], [0, 0, 1, 1], [], []>} : vector<24x32xf32>, vector<32x32xf32>, vector<24x32xf32> -> vector<24x32xf32>
    %c0_8 = arith.constant 0 : index
    %c0_9 = arith.constant 0 : index
    %6 = vector.load %arg6[%c0_8, %c0_9] : memref<32x64xf32, #tpu.memory_space<vmem>>, vector<32x64xf32>
    %cst_10 = arith.constant dense<0.000000e+00> : vector<24x64xf32>
    %7 = tpu.matmul %3, %6, %cst_10 {dimension_numbers = #tpu.dot_dimension_numbers<[1], [0], [0], [1], [0, 0, 1, 1], [], []>} : vector<24x32xf32>, vector<32x64xf32>, vector<24x64xf32> -> vector<24x64xf32>
    %c0_11 = arith.constant 0 : index
    %c0_12 = arith.constant 0 : index
    %8 = vector.load %arg7[%c0_11, %c0_12] : memref<32x64xf32, #tpu.memory_space<vmem>>, vector<32x64xf32>
    %cst_13 = arith.constant dense<0.000000e+00> : vector<24x64xf32>
    %9 = tpu.matmul %5, %8, %cst_13 {dimension_numbers = #tpu.dot_dimension_numbers<[1], [0], [0], [1], [0, 0, 1, 1], [], []>} : vector<24x32xf32>, vector<32x64xf32>, vector<24x64xf32> -> vector<24x64xf32>
    %10 = arith.addf %7, %9 : vector<24x64xf32>
    %c0_14 = arith.constant 0 : index
    %c0_15 = arith.constant 0 : index
    %11 = vector.load %arg8[%c0_14, %c0_15] : memref<1x64xf32, #tpu.memory_space<vmem>>, vector<1x64xf32>
    %12 = vector.broadcast %11 : vector<1x64xf32> to vector<24x64xf32>
    %13 = arith.addf %10, %12 : vector<24x64xf32>
    %cst_16 = arith.constant 0.000000e+00 : f32
    %14 = vector.broadcast %cst_16 : f32 to vector<24x64xf32>
    %15 = arith.maximumf %13, %14 : vector<24x64xf32>
    %c0_17 = arith.constant 0 : index
    %c0_18 = arith.constant 0 : index
    %16 = vector.load %arg9[%c0_17, %c0_18] : memref<64x32xf32, #tpu.memory_space<vmem>>, vector<64x32xf32>
    %cst_19 = arith.constant dense<0.000000e+00> : vector<24x32xf32>
    %17 = tpu.matmul %15, %16, %cst_19 {dimension_numbers = #tpu.dot_dimension_numbers<[1], [0], [0], [1], [0, 0, 1, 1], [], []>} : vector<24x64xf32>, vector<64x32xf32>, vector<24x32xf32> -> vector<24x32xf32>
    %c0_20 = arith.constant 0 : index
    %c0_21 = arith.constant 0 : index
    %18 = vector.load %arg11[%c0_20, %c0_21] : memref<1x32xf32, #tpu.memory_space<vmem>>, vector<1x32xf32>
    %19 = vector.broadcast %18 : vector<1x32xf32> to vector<24x32xf32>
    %20 = arith.addf %17, %19 : vector<24x32xf32>
    %c0_22 = arith.constant 0 : index
    %c0_23 = arith.constant 0 : index
    %21 = vector.load %arg10[%c0_22, %c0_23] : memref<64x32xf32, #tpu.memory_space<vmem>>, vector<64x32xf32>
    %cst_24 = arith.constant dense<0.000000e+00> : vector<24x32xf32>
    %22 = tpu.matmul %15, %21, %cst_24 {dimension_numbers = #tpu.dot_dimension_numbers<[1], [0], [0], [1], [0, 0, 1, 1], [], []>} : vector<24x64xf32>, vector<64x32xf32>, vector<24x32xf32> -> vector<24x32xf32>
    %c0_25 = arith.constant 0 : index
    %c0_26 = arith.constant 0 : index
    %23 = vector.load %arg12[%c0_25, %c0_26] : memref<1x32xf32, #tpu.memory_space<vmem>>, vector<1x32xf32>
    %24 = vector.broadcast %23 : vector<1x32xf32> to vector<24x32xf32>
    %25 = arith.addf %22, %24 : vector<24x32xf32>
    %cst_27 = arith.constant 0.00999999977 : f32
    %26 = vector.broadcast %cst_27 : f32 to vector<24x32xf32>
    %27 = arith.cmpf ogt, %20, %26 : vector<24x32xf32>
    %cst_28 = arith.constant 0.00999999977 : f32
    %28 = vector.broadcast %cst_28 : f32 to vector<24x32xf32>
    %29 = arith.subf %20, %28 : vector<24x32xf32>
    %cst_29 = arith.constant -0.00999999977 : f32
    %30 = vector.broadcast %cst_29 : f32 to vector<24x32xf32>
    %31 = arith.cmpf olt, %20, %30 : vector<24x32xf32>
    %cst_30 = arith.constant 0.00999999977 : f32
    %32 = vector.broadcast %cst_30 : f32 to vector<24x32xf32>
    %33 = arith.addf %20, %32 : vector<24x32xf32>
    %cst_31 = arith.constant 0.000000e+00 : f32
    %34 = vector.broadcast %cst_31 : f32 to vector<24x32xf32>
    %35 = arith.select %31, %33, %34 : vector<24x32xi1>, vector<24x32xf32>
    %36 = arith.select %27, %29, %35 : vector<24x32xi1>, vector<24x32xf32>
    %cst_32 = arith.constant 0.00999999977 : f32
    %37 = vector.broadcast %cst_32 : f32 to vector<24x32xf32>
    %38 = arith.cmpf ogt, %25, %37 : vector<24x32xf32>
    %cst_33 = arith.constant 0.00999999977 : f32
    %39 = vector.broadcast %cst_33 : f32 to vector<24x32xf32>
    %40 = arith.subf %25, %39 : vector<24x32xf32>
    %cst_34 = arith.constant -0.00999999977 : f32
    %41 = vector.broadcast %cst_34 : f32 to vector<24x32xf32>
    %42 = arith.cmpf olt, %25, %41 : vector<24x32xf32>
    %cst_35 = arith.constant 0.00999999977 : f32
    %43 = vector.broadcast %cst_35 : f32 to vector<24x32xf32>
    %44 = arith.addf %25, %43 : vector<24x32xf32>
    %cst_36 = arith.constant 0.000000e+00 : f32
    %45 = vector.broadcast %cst_36 : f32 to vector<24x32xf32>
    %46 = arith.select %42, %44, %45 : vector<24x32xi1>, vector<24x32xf32>
    %47 = arith.select %38, %40, %46 : vector<24x32xi1>, vector<24x32xf32>
    %c0_37 = arith.constant 0 : index
    %c0_38 = arith.constant 0 : index
    %48 = vector.load %arg4[%c0_37, %c0_38] : memref<32x24xf32, #tpu.memory_space<vmem>>, vector<32x24xf32>
    %cst_39 = arith.constant dense<0.000000e+00> : vector<32x32xf32>
    %49 = tpu.matmul %48, %36, %cst_39 {dimension_numbers = #tpu.dot_dimension_numbers<[1], [0], [0], [1], [0, 0, 1, 1], [], []>} : vector<32x24xf32>, vector<24x32xf32>, vector<32x32xf32> -> vector<32x32xf32>
    %c0_40 = arith.constant 0 : index
    %c0_41 = arith.constant 0 : index
    %50 = vector.load %arg5[%c0_40, %c0_41] : memref<32x24xf32, #tpu.memory_space<vmem>>, vector<32x24xf32>
    %cst_42 = arith.constant dense<0.000000e+00> : vector<32x32xf32>
    %51 = tpu.matmul %50, %47, %cst_42 {dimension_numbers = #tpu.dot_dimension_numbers<[1], [0], [0], [1], [0, 0, 1, 1], [], []>} : vector<32x24xf32>, vector<24x32xf32>, vector<32x32xf32> -> vector<32x32xf32>
    %52 = arith.addf %49, %51 : vector<32x32xf32>
    %53 = arith.addf %52, %1 : vector<32x32xf32>
    %54 = arith.addf %53, %0 : vector<32x32xf32>
    %c0_43 = arith.constant 0 : index
    %c0_44 = arith.constant 0 : index
    %55 = vector.load %arg13[%c0_43, %c0_44] : memref<1x32xf32, #tpu.memory_space<vmem>>, vector<1x32xf32>
    %c0_45 = arith.constant 0 : index
    %c0_46 = arith.constant 0 : index
    %56 = vector.load %arg14[%c0_45, %c0_46] : memref<1x32xf32, #tpu.memory_space<vmem>>, vector<1x32xf32>
    %cst_47 = arith.constant dense<0.000000e+00> : vector<32xf32>
    %57 = vector.multi_reduction <add>, %54, %cst_47 [1] : vector<32x32xf32> to vector<32xf32>
    %58 = vector.shape_cast %57 : vector<32xf32> to vector<32x1xf32>
    %cst_48 = arith.constant 3.200000e+01 : f32
    %59 = vector.broadcast %cst_48 : f32 to vector<32x1xf32>
    %60 = arith.divf %58, %59 : vector<32x1xf32>
    %61 = vector.broadcast %60 : vector<32x1xf32> to vector<32x32xf32>
    %62 = arith.subf %54, %61 : vector<32x32xf32>
    %63 = arith.mulf %62, %62 : vector<32x32xf32>
    %cst_49 = arith.constant dense<0.000000e+00> : vector<32xf32>
    %64 = vector.multi_reduction <add>, %63, %cst_49 [1] : vector<32x32xf32> to vector<32xf32>
    %65 = vector.shape_cast %64 : vector<32xf32> to vector<32x1xf32>
    %cst_50 = arith.constant 3.200000e+01 : f32
    %66 = vector.broadcast %cst_50 : f32 to vector<32x1xf32>
    %67 = arith.divf %65, %66 : vector<32x1xf32>
    %cst_51 = arith.constant 9.99999997E-7 : f32
    %68 = vector.broadcast %cst_51 : f32 to vector<32x1xf32>
    %69 = arith.addf %67, %68 : vector<32x1xf32>
    %70 = math.rsqrt %69 : vector<32x1xf32>
    %71 = vector.broadcast %70 : vector<32x1xf32> to vector<32x32xf32>
    %72 = arith.mulf %62, %71 : vector<32x32xf32>
    %73 = vector.broadcast %55 : vector<1x32xf32> to vector<32x32xf32>
    %74 = arith.mulf %72, %73 : vector<32x32xf32>
    %75 = vector.broadcast %56 : vector<1x32xf32> to vector<32x32xf32>
    %76 = arith.addf %74, %75 : vector<32x32xf32>
    %c0_52 = arith.constant 0 : index
    %c0_53 = arith.constant 0 : index
    %77 = vector.load %arg15[%c0_52, %c0_53] : memref<32x128xf32, #tpu.memory_space<vmem>>, vector<32x128xf32>
    %cst_54 = arith.constant dense<0.000000e+00> : vector<32x128xf32>
    %78 = tpu.matmul %76, %77, %cst_54 {dimension_numbers = #tpu.dot_dimension_numbers<[1], [0], [0], [1], [0, 0, 1, 1], [], []>} : vector<32x32xf32>, vector<32x128xf32>, vector<32x128xf32> -> vector<32x128xf32>
    %c0_55 = arith.constant 0 : index
    %c0_56 = arith.constant 0 : index
    %79 = vector.load %arg16[%c0_55, %c0_56] : memref<1x128xf32, #tpu.memory_space<vmem>>, vector<1x128xf32>
    %80 = vector.broadcast %79 : vector<1x128xf32> to vector<32x128xf32>
    %81 = arith.addf %78, %80 : vector<32x128xf32>
    %cst_57 = arith.constant 5.000000e-01 : f32
    %82 = vector.broadcast %cst_57 : f32 to vector<32x128xf32>
    %83 = arith.mulf %82, %81 : vector<32x128xf32>
    %cst_58 = arith.constant 0.707106769 : f32
    %84 = vector.broadcast %cst_58 : f32 to vector<32x128xf32>
    %85 = arith.mulf %81, %84 : vector<32x128xf32>
    %86 = math.erf %85 : vector<32x128xf32>
    %cst_59 = arith.constant 1.000000e+00 : f32
    %87 = vector.broadcast %cst_59 : f32 to vector<32x128xf32>
    %88 = arith.addf %87, %86 : vector<32x128xf32>
    %89 = arith.mulf %83, %88 : vector<32x128xf32>
    %c0_60 = arith.constant 0 : index
    %c0_61 = arith.constant 0 : index
    %90 = vector.load %arg17[%c0_60, %c0_61] : memref<128x32xf32, #tpu.memory_space<vmem>>, vector<128x32xf32>
    %cst_62 = arith.constant dense<0.000000e+00> : vector<32x32xf32>
    %91 = tpu.matmul %89, %90, %cst_62 {dimension_numbers = #tpu.dot_dimension_numbers<[1], [0], [0], [1], [0, 0, 1, 1], [], []>} : vector<32x128xf32>, vector<128x32xf32>, vector<32x32xf32> -> vector<32x32xf32>
    %c0_63 = arith.constant 0 : index
    %c0_64 = arith.constant 0 : index
    %92 = vector.load %arg18[%c0_63, %c0_64] : memref<1x32xf32, #tpu.memory_space<vmem>>, vector<1x32xf32>
    %93 = vector.broadcast %92 : vector<1x32xf32> to vector<32x32xf32>
    %94 = arith.addf %91, %93 : vector<32x32xf32>
    %95 = arith.addf %94, %54 : vector<32x32xf32>
    %c0_65 = arith.constant 0 : index
    %c0_66 = arith.constant 0 : index
    %96 = vector.load %arg21[%c0_65, %c0_66] : memref<32x32xf32, #tpu.memory_space<vmem>>, vector<32x32xf32>
    tpu.vector_store %arg21[%c0_65, %c0_66], %95 {strides = array<i32>} : memref<32x32xf32, #tpu.memory_space<vmem>>, vector<32x32xf32>,
    %c0_67 = arith.constant 0 : index
    %c0_68 = arith.constant 0 : index
    %97 = vector.load %arg19[%c0_67, %c0_68] : memref<1x32xf32, #tpu.memory_space<vmem>>, vector<1x32xf32>
    %c0_69 = arith.constant 0 : index
    %c0_70 = arith.constant 0 : index
    %98 = vector.load %arg20[%c0_69, %c0_70] : memref<1x32xf32, #tpu.memory_space<vmem>>, vector<1x32xf32>
    %cst_71 = arith.constant dense<0.000000e+00> : vector<32xf32>
    %99 = vector.multi_reduction <add>, %95, %cst_71 [1] : vector<32x32xf32> to vector<32xf32>
    %100 = vector.shape_cast %99 : vector<32xf32> to vector<32x1xf32>
    %cst_72 = arith.constant 3.200000e+01 : f32
    %101 = vector.broadcast %cst_72 : f32 to vector<32x1xf32>
    %102 = arith.divf %100, %101 : vector<32x1xf32>
    %103 = vector.broadcast %102 : vector<32x1xf32> to vector<32x32xf32>
    %104 = arith.subf %95, %103 : vector<32x32xf32>
    %105 = arith.mulf %104, %104 : vector<32x32xf32>
    %cst_73 = arith.constant dense<0.000000e+00> : vector<32xf32>
    %106 = vector.multi_reduction <add>, %105, %cst_73 [1] : vector<32x32xf32> to vector<32xf32>
    %107 = vector.shape_cast %106 : vector<32xf32> to vector<32x1xf32>
    %cst_74 = arith.constant 3.200000e+01 : f32
    %108 = vector.broadcast %cst_74 : f32 to vector<32x1xf32>
    %109 = arith.divf %107, %108 : vector<32x1xf32>
    %cst_75 = arith.constant 9.99999997E-7 : f32
    %110 = vector.broadcast %cst_75 : f32 to vector<32x1xf32>
    %111 = arith.addf %109, %110 : vector<32x1xf32>
    %112 = math.rsqrt %111 : vector<32x1xf32>
    %113 = vector.broadcast %112 : vector<32x1xf32> to vector<32x32xf32>
    %114 = arith.mulf %104, %113 : vector<32x32xf32>
    %115 = vector.broadcast %97 : vector<1x32xf32> to vector<32x32xf32>
    %116 = arith.mulf %114, %115 : vector<32x32xf32>
    %117 = vector.broadcast %98 : vector<1x32xf32> to vector<32x32xf32>
    %118 = arith.addf %116, %117 : vector<32x32xf32>
    %c0_76 = arith.constant 0 : index
    %c0_77 = arith.constant 0 : index
    %119 = vector.load %arg22[%c0_76, %c0_77] : memref<32x32xf32, #tpu.memory_space<vmem>>, vector<32x32xf32>
    tpu.vector_store %arg22[%c0_76, %c0_77], %118 {strides = array<i32>} : memref<32x32xf32, #tpu.memory_space<vmem>>, vector<32x32xf32>,
    return
  }
}

module attributes {stable_mosaic.version = 11 : i64} {
  func.func @_patch_embed_kernel(%arg0: memref<32x64xf32, #tpu.memory_space<vmem>>, %arg1: memref<16x32xf32, #tpu.memory_space<vmem>>, %arg2: memref<64x32xf32, #tpu.memory_space<vmem>>, %arg3: memref<1x32xf32, #tpu.memory_space<vmem>>, %arg4: memref<1x32xf32, #tpu.memory_space<vmem>>, %arg5: memref<1x32xf32, #tpu.memory_space<vmem>>, %arg6: memref<32x32xf32, #tpu.memory_space<vmem>>, %arg7: memref<32x32xf32, #tpu.memory_space<vmem>>) attributes {dimension_semantics = [], scalar_prefetch = 0 : i64, scratch_operands = 0 : i64, tpu.core_type = #tpu.core_type<tc>} {
    %c0 = arith.constant 0 : index
    %c0_0 = arith.constant 0 : index
    %0 = vector.load %arg0[%c0, %c0_0] : memref<32x64xf32, #tpu.memory_space<vmem>>, vector<32x64xf32>
    %c0_1 = arith.constant 0 : index
    %c0_2 = arith.constant 0 : index
    %1 = vector.load %arg2[%c0_1, %c0_2] : memref<64x32xf32, #tpu.memory_space<vmem>>, vector<64x32xf32>
    %cst = arith.constant dense<0.000000e+00> : vector<32x32xf32>
    %2 = tpu.matmul %0, %1, %cst {dimension_numbers = #tpu.dot_dimension_numbers<[1], [0], [0], [1], [0, 0, 1, 1], [], []>} : vector<32x64xf32>, vector<64x32xf32>, vector<32x32xf32> -> vector<32x32xf32>
    %c0_3 = arith.constant 0 : index
    %c0_4 = arith.constant 0 : index
    %3 = vector.load %arg3[%c0_3, %c0_4] : memref<1x32xf32, #tpu.memory_space<vmem>>, vector<1x32xf32>
    %4 = vector.broadcast %3 : vector<1x32xf32> to vector<32x32xf32>
    %5 = arith.addf %2, %4 : vector<32x32xf32>
    %c0_5 = arith.constant 0 : index
    %c0_6 = arith.constant 0 : index
    %6 = vector.load %arg1[%c0_5, %c0_6] : memref<16x32xf32, #tpu.memory_space<vmem>>, vector<16x32xf32>
    %7 = tpu.concatenate %6, %6 in 0 : vector<16x32xf32>, vector<16x32xf32> -> vector<32x32xf32>
    %8 = arith.addf %5, %7 : vector<32x32xf32>
    %c0_7 = arith.constant 0 : index
    %c0_8 = arith.constant 0 : index
    %9 = vector.load %arg6[%c0_7, %c0_8] : memref<32x32xf32, #tpu.memory_space<vmem>>, vector<32x32xf32>
    tpu.vector_store %arg6[%c0_7, %c0_8], %8 {strides = array<i32>} : memref<32x32xf32, #tpu.memory_space<vmem>>, vector<32x32xf32>,
    %c0_9 = arith.constant 0 : index
    %c0_10 = arith.constant 0 : index
    %10 = vector.load %arg4[%c0_9, %c0_10] : memref<1x32xf32, #tpu.memory_space<vmem>>, vector<1x32xf32>
    %c0_11 = arith.constant 0 : index
    %c0_12 = arith.constant 0 : index
    %11 = vector.load %arg5[%c0_11, %c0_12] : memref<1x32xf32, #tpu.memory_space<vmem>>, vector<1x32xf32>
    %cst_13 = arith.constant dense<0.000000e+00> : vector<32xf32>
    %12 = vector.multi_reduction <add>, %8, %cst_13 [1] : vector<32x32xf32> to vector<32xf32>
    %13 = vector.shape_cast %12 : vector<32xf32> to vector<32x1xf32>
    %cst_14 = arith.constant 3.200000e+01 : f32
    %14 = vector.broadcast %cst_14 : f32 to vector<32x1xf32>
    %15 = arith.divf %13, %14 : vector<32x1xf32>
    %16 = vector.broadcast %15 : vector<32x1xf32> to vector<32x32xf32>
    %17 = arith.subf %8, %16 : vector<32x32xf32>
    %18 = arith.mulf %17, %17 : vector<32x32xf32>
    %cst_15 = arith.constant dense<0.000000e+00> : vector<32xf32>
    %19 = vector.multi_reduction <add>, %18, %cst_15 [1] : vector<32x32xf32> to vector<32xf32>
    %20 = vector.shape_cast %19 : vector<32xf32> to vector<32x1xf32>
    %cst_16 = arith.constant 3.200000e+01 : f32
    %21 = vector.broadcast %cst_16 : f32 to vector<32x1xf32>
    %22 = arith.divf %20, %21 : vector<32x1xf32>
    %cst_17 = arith.constant 9.99999997E-7 : f32
    %23 = vector.broadcast %cst_17 : f32 to vector<32x1xf32>
    %24 = arith.addf %22, %23 : vector<32x1xf32>
    %25 = math.rsqrt %24 : vector<32x1xf32>
    %26 = vector.broadcast %25 : vector<32x1xf32> to vector<32x32xf32>
    %27 = arith.mulf %17, %26 : vector<32x32xf32>
    %28 = vector.broadcast %10 : vector<1x32xf32> to vector<32x32xf32>
    %29 = arith.mulf %27, %28 : vector<32x32xf32>
    %30 = vector.broadcast %11 : vector<1x32xf32> to vector<32x32xf32>
    %31 = arith.addf %29, %30 : vector<32x32xf32>
    %c0_18 = arith.constant 0 : index
    %c0_19 = arith.constant 0 : index
    %32 = vector.load %arg7[%c0_18, %c0_19] : memref<32x32xf32, #tpu.memory_space<vmem>>, vector<32x32xf32>
    tpu.vector_store %arg7[%c0_18, %c0_19], %31 {strides = array<i32>} : memref<32x32xf32, #tpu.memory_space<vmem>>, vector<32x32xf32>,
    return
  }
}

module attributes {stable_mosaic.version = 11 : i64} {
  func.func @_afno_last_block_kernel(%arg0: memref<32x32xf32, #tpu.memory_space<vmem>>, %arg1: memref<32x32xf32, #tpu.memory_space<vmem>>, %arg2: memref<24x32xf32, #tpu.memory_space<vmem>>, %arg3: memref<24x32xf32, #tpu.memory_space<vmem>>, %arg4: memref<32x24xf32, #tpu.memory_space<vmem>>, %arg5: memref<32x24xf32, #tpu.memory_space<vmem>>, %arg6: memref<32x64xf32, #tpu.memory_space<vmem>>, %arg7: memref<32x64xf32, #tpu.memory_space<vmem>>, %arg8: memref<1x64xf32, #tpu.memory_space<vmem>>, %arg9: memref<64x32xf32, #tpu.memory_space<vmem>>, %arg10: memref<64x32xf32, #tpu.memory_space<vmem>>, %arg11: memref<1x32xf32, #tpu.memory_space<vmem>>, %arg12: memref<1x32xf32, #tpu.memory_space<vmem>>, %arg13: memref<1x32xf32, #tpu.memory_space<vmem>>, %arg14: memref<1x32xf32, #tpu.memory_space<vmem>>, %arg15: memref<32x128xf32, #tpu.memory_space<vmem>>, %arg16: memref<1x128xf32, #tpu.memory_space<vmem>>, %arg17: memref<128x32xf32, #tpu.memory_space<vmem>>, %arg18: memref<1x32xf32, #tpu.memory_space<vmem>>, %arg19: memref<32x64xf32, #tpu.memory_space<vmem>>, %arg20: memref<32x64xf32, #tpu.memory_space<vmem>>) attributes {dimension_semantics = [], scalar_prefetch = 0 : i64, scratch_operands = 0 : i64, tpu.core_type = #tpu.core_type<tc>} {
    %c0 = arith.constant 0 : index
    %c0_0 = arith.constant 0 : index
    %0 = vector.load %arg0[%c0, %c0_0] : memref<32x32xf32, #tpu.memory_space<vmem>>, vector<32x32xf32>
    %c0_1 = arith.constant 0 : index
    %c0_2 = arith.constant 0 : index
    %1 = vector.load %arg1[%c0_1, %c0_2] : memref<32x32xf32, #tpu.memory_space<vmem>>, vector<32x32xf32>
    %c0_3 = arith.constant 0 : index
    %c0_4 = arith.constant 0 : index
    %2 = vector.load %arg2[%c0_3, %c0_4] : memref<24x32xf32, #tpu.memory_space<vmem>>, vector<24x32xf32>
    %cst = arith.constant dense<0.000000e+00> : vector<24x32xf32>
    %3 = tpu.matmul %2, %1, %cst {dimension_numbers = #tpu.dot_dimension_numbers<[1], [0], [0], [1], [0, 0, 1, 1], [], []>} : vector<24x32xf32>, vector<32x32xf32>, vector<24x32xf32> -> vector<24x32xf32>
    %c0_5 = arith.constant 0 : index
    %c0_6 = arith.constant 0 : index
    %4 = vector.load %arg3[%c0_5, %c0_6] : memref<24x32xf32, #tpu.memory_space<vmem>>, vector<24x32xf32>
    %cst_7 = arith.constant dense<0.000000e+00> : vector<24x32xf32>
    %5 = tpu.matmul %4, %1, %cst_7 {dimension_numbers = #tpu.dot_dimension_numbers<[1], [0], [0], [1], [0, 0, 1, 1], [], []>} : vector<24x32xf32>, vector<32x32xf32>, vector<24x32xf32> -> vector<24x32xf32>
    %c0_8 = arith.constant 0 : index
    %c0_9 = arith.constant 0 : index
    %6 = vector.load %arg6[%c0_8, %c0_9] : memref<32x64xf32, #tpu.memory_space<vmem>>, vector<32x64xf32>
    %cst_10 = arith.constant dense<0.000000e+00> : vector<24x64xf32>
    %7 = tpu.matmul %3, %6, %cst_10 {dimension_numbers = #tpu.dot_dimension_numbers<[1], [0], [0], [1], [0, 0, 1, 1], [], []>} : vector<24x32xf32>, vector<32x64xf32>, vector<24x64xf32> -> vector<24x64xf32>
    %c0_11 = arith.constant 0 : index
    %c0_12 = arith.constant 0 : index
    %8 = vector.load %arg7[%c0_11, %c0_12] : memref<32x64xf32, #tpu.memory_space<vmem>>, vector<32x64xf32>
    %cst_13 = arith.constant dense<0.000000e+00> : vector<24x64xf32>
    %9 = tpu.matmul %5, %8, %cst_13 {dimension_numbers = #tpu.dot_dimension_numbers<[1], [0], [0], [1], [0, 0, 1, 1], [], []>} : vector<24x32xf32>, vector<32x64xf32>, vector<24x64xf32> -> vector<24x64xf32>
    %10 = arith.addf %7, %9 : vector<24x64xf32>
    %c0_14 = arith.constant 0 : index
    %c0_15 = arith.constant 0 : index
    %11 = vector.load %arg8[%c0_14, %c0_15] : memref<1x64xf32, #tpu.memory_space<vmem>>, vector<1x64xf32>
    %12 = vector.broadcast %11 : vector<1x64xf32> to vector<24x64xf32>
    %13 = arith.addf %10, %12 : vector<24x64xf32>
    %cst_16 = arith.constant 0.000000e+00 : f32
    %14 = vector.broadcast %cst_16 : f32 to vector<24x64xf32>
    %15 = arith.maximumf %13, %14 : vector<24x64xf32>
    %c0_17 = arith.constant 0 : index
    %c0_18 = arith.constant 0 : index
    %16 = vector.load %arg9[%c0_17, %c0_18] : memref<64x32xf32, #tpu.memory_space<vmem>>, vector<64x32xf32>
    %cst_19 = arith.constant dense<0.000000e+00> : vector<24x32xf32>
    %17 = tpu.matmul %15, %16, %cst_19 {dimension_numbers = #tpu.dot_dimension_numbers<[1], [0], [0], [1], [0, 0, 1, 1], [], []>} : vector<24x64xf32>, vector<64x32xf32>, vector<24x32xf32> -> vector<24x32xf32>
    %c0_20 = arith.constant 0 : index
    %c0_21 = arith.constant 0 : index
    %18 = vector.load %arg11[%c0_20, %c0_21] : memref<1x32xf32, #tpu.memory_space<vmem>>, vector<1x32xf32>
    %19 = vector.broadcast %18 : vector<1x32xf32> to vector<24x32xf32>
    %20 = arith.addf %17, %19 : vector<24x32xf32>
    %c0_22 = arith.constant 0 : index
    %c0_23 = arith.constant 0 : index
    %21 = vector.load %arg10[%c0_22, %c0_23] : memref<64x32xf32, #tpu.memory_space<vmem>>, vector<64x32xf32>
    %cst_24 = arith.constant dense<0.000000e+00> : vector<24x32xf32>
    %22 = tpu.matmul %15, %21, %cst_24 {dimension_numbers = #tpu.dot_dimension_numbers<[1], [0], [0], [1], [0, 0, 1, 1], [], []>} : vector<24x64xf32>, vector<64x32xf32>, vector<24x32xf32> -> vector<24x32xf32>
    %c0_25 = arith.constant 0 : index
    %c0_26 = arith.constant 0 : index
    %23 = vector.load %arg12[%c0_25, %c0_26] : memref<1x32xf32, #tpu.memory_space<vmem>>, vector<1x32xf32>
    %24 = vector.broadcast %23 : vector<1x32xf32> to vector<24x32xf32>
    %25 = arith.addf %22, %24 : vector<24x32xf32>
    %cst_27 = arith.constant 0.00999999977 : f32
    %26 = vector.broadcast %cst_27 : f32 to vector<24x32xf32>
    %27 = arith.cmpf ogt, %20, %26 : vector<24x32xf32>
    %cst_28 = arith.constant 0.00999999977 : f32
    %28 = vector.broadcast %cst_28 : f32 to vector<24x32xf32>
    %29 = arith.subf %20, %28 : vector<24x32xf32>
    %cst_29 = arith.constant -0.00999999977 : f32
    %30 = vector.broadcast %cst_29 : f32 to vector<24x32xf32>
    %31 = arith.cmpf olt, %20, %30 : vector<24x32xf32>
    %cst_30 = arith.constant 0.00999999977 : f32
    %32 = vector.broadcast %cst_30 : f32 to vector<24x32xf32>
    %33 = arith.addf %20, %32 : vector<24x32xf32>
    %cst_31 = arith.constant 0.000000e+00 : f32
    %34 = vector.broadcast %cst_31 : f32 to vector<24x32xf32>
    %35 = arith.select %31, %33, %34 : vector<24x32xi1>, vector<24x32xf32>
    %36 = arith.select %27, %29, %35 : vector<24x32xi1>, vector<24x32xf32>
    %cst_32 = arith.constant 0.00999999977 : f32
    %37 = vector.broadcast %cst_32 : f32 to vector<24x32xf32>
    %38 = arith.cmpf ogt, %25, %37 : vector<24x32xf32>
    %cst_33 = arith.constant 0.00999999977 : f32
    %39 = vector.broadcast %cst_33 : f32 to vector<24x32xf32>
    %40 = arith.subf %25, %39 : vector<24x32xf32>
    %cst_34 = arith.constant -0.00999999977 : f32
    %41 = vector.broadcast %cst_34 : f32 to vector<24x32xf32>
    %42 = arith.cmpf olt, %25, %41 : vector<24x32xf32>
    %cst_35 = arith.constant 0.00999999977 : f32
    %43 = vector.broadcast %cst_35 : f32 to vector<24x32xf32>
    %44 = arith.addf %25, %43 : vector<24x32xf32>
    %cst_36 = arith.constant 0.000000e+00 : f32
    %45 = vector.broadcast %cst_36 : f32 to vector<24x32xf32>
    %46 = arith.select %42, %44, %45 : vector<24x32xi1>, vector<24x32xf32>
    %47 = arith.select %38, %40, %46 : vector<24x32xi1>, vector<24x32xf32>
    %c0_37 = arith.constant 0 : index
    %c0_38 = arith.constant 0 : index
    %48 = vector.load %arg4[%c0_37, %c0_38] : memref<32x24xf32, #tpu.memory_space<vmem>>, vector<32x24xf32>
    %cst_39 = arith.constant dense<0.000000e+00> : vector<32x32xf32>
    %49 = tpu.matmul %48, %36, %cst_39 {dimension_numbers = #tpu.dot_dimension_numbers<[1], [0], [0], [1], [0, 0, 1, 1], [], []>} : vector<32x24xf32>, vector<24x32xf32>, vector<32x32xf32> -> vector<32x32xf32>
    %c0_40 = arith.constant 0 : index
    %c0_41 = arith.constant 0 : index
    %50 = vector.load %arg5[%c0_40, %c0_41] : memref<32x24xf32, #tpu.memory_space<vmem>>, vector<32x24xf32>
    %cst_42 = arith.constant dense<0.000000e+00> : vector<32x32xf32>
    %51 = tpu.matmul %50, %47, %cst_42 {dimension_numbers = #tpu.dot_dimension_numbers<[1], [0], [0], [1], [0, 0, 1, 1], [], []>} : vector<32x24xf32>, vector<24x32xf32>, vector<32x32xf32> -> vector<32x32xf32>
    %52 = arith.addf %49, %51 : vector<32x32xf32>
    %53 = arith.addf %52, %1 : vector<32x32xf32>
    %54 = arith.addf %53, %0 : vector<32x32xf32>
    %c0_43 = arith.constant 0 : index
    %c0_44 = arith.constant 0 : index
    %55 = vector.load %arg13[%c0_43, %c0_44] : memref<1x32xf32, #tpu.memory_space<vmem>>, vector<1x32xf32>
    %c0_45 = arith.constant 0 : index
    %c0_46 = arith.constant 0 : index
    %56 = vector.load %arg14[%c0_45, %c0_46] : memref<1x32xf32, #tpu.memory_space<vmem>>, vector<1x32xf32>
    %cst_47 = arith.constant dense<0.000000e+00> : vector<32xf32>
    %57 = vector.multi_reduction <add>, %54, %cst_47 [1] : vector<32x32xf32> to vector<32xf32>
    %58 = vector.shape_cast %57 : vector<32xf32> to vector<32x1xf32>
    %cst_48 = arith.constant 3.200000e+01 : f32
    %59 = vector.broadcast %cst_48 : f32 to vector<32x1xf32>
    %60 = arith.divf %58, %59 : vector<32x1xf32>
    %61 = vector.broadcast %60 : vector<32x1xf32> to vector<32x32xf32>
    %62 = arith.subf %54, %61 : vector<32x32xf32>
    %63 = arith.mulf %62, %62 : vector<32x32xf32>
    %cst_49 = arith.constant dense<0.000000e+00> : vector<32xf32>
    %64 = vector.multi_reduction <add>, %63, %cst_49 [1] : vector<32x32xf32> to vector<32xf32>
    %65 = vector.shape_cast %64 : vector<32xf32> to vector<32x1xf32>
    %cst_50 = arith.constant 3.200000e+01 : f32
    %66 = vector.broadcast %cst_50 : f32 to vector<32x1xf32>
    %67 = arith.divf %65, %66 : vector<32x1xf32>
    %cst_51 = arith.constant 9.99999997E-7 : f32
    %68 = vector.broadcast %cst_51 : f32 to vector<32x1xf32>
    %69 = arith.addf %67, %68 : vector<32x1xf32>
    %70 = math.rsqrt %69 : vector<32x1xf32>
    %71 = vector.broadcast %70 : vector<32x1xf32> to vector<32x32xf32>
    %72 = arith.mulf %62, %71 : vector<32x32xf32>
    %73 = vector.broadcast %55 : vector<1x32xf32> to vector<32x32xf32>
    %74 = arith.mulf %72, %73 : vector<32x32xf32>
    %75 = vector.broadcast %56 : vector<1x32xf32> to vector<32x32xf32>
    %76 = arith.addf %74, %75 : vector<32x32xf32>
    %c0_52 = arith.constant 0 : index
    %c0_53 = arith.constant 0 : index
    %77 = vector.load %arg15[%c0_52, %c0_53] : memref<32x128xf32, #tpu.memory_space<vmem>>, vector<32x128xf32>
    %cst_54 = arith.constant dense<0.000000e+00> : vector<32x128xf32>
    %78 = tpu.matmul %76, %77, %cst_54 {dimension_numbers = #tpu.dot_dimension_numbers<[1], [0], [0], [1], [0, 0, 1, 1], [], []>} : vector<32x32xf32>, vector<32x128xf32>, vector<32x128xf32> -> vector<32x128xf32>
    %c0_55 = arith.constant 0 : index
    %c0_56 = arith.constant 0 : index
    %79 = vector.load %arg16[%c0_55, %c0_56] : memref<1x128xf32, #tpu.memory_space<vmem>>, vector<1x128xf32>
    %80 = vector.broadcast %79 : vector<1x128xf32> to vector<32x128xf32>
    %81 = arith.addf %78, %80 : vector<32x128xf32>
    %cst_57 = arith.constant 5.000000e-01 : f32
    %82 = vector.broadcast %cst_57 : f32 to vector<32x128xf32>
    %83 = arith.mulf %82, %81 : vector<32x128xf32>
    %cst_58 = arith.constant 0.707106769 : f32
    %84 = vector.broadcast %cst_58 : f32 to vector<32x128xf32>
    %85 = arith.mulf %81, %84 : vector<32x128xf32>
    %86 = math.erf %85 : vector<32x128xf32>
    %cst_59 = arith.constant 1.000000e+00 : f32
    %87 = vector.broadcast %cst_59 : f32 to vector<32x128xf32>
    %88 = arith.addf %87, %86 : vector<32x128xf32>
    %89 = arith.mulf %83, %88 : vector<32x128xf32>
    %c0_60 = arith.constant 0 : index
    %c0_61 = arith.constant 0 : index
    %90 = vector.load %arg17[%c0_60, %c0_61] : memref<128x32xf32, #tpu.memory_space<vmem>>, vector<128x32xf32>
    %cst_62 = arith.constant dense<0.000000e+00> : vector<32x32xf32>
    %91 = tpu.matmul %89, %90, %cst_62 {dimension_numbers = #tpu.dot_dimension_numbers<[1], [0], [0], [1], [0, 0, 1, 1], [], []>} : vector<32x128xf32>, vector<128x32xf32>, vector<32x32xf32> -> vector<32x32xf32>
    %c0_63 = arith.constant 0 : index
    %c0_64 = arith.constant 0 : index
    %92 = vector.load %arg18[%c0_63, %c0_64] : memref<1x32xf32, #tpu.memory_space<vmem>>, vector<1x32xf32>
    %93 = vector.broadcast %92 : vector<1x32xf32> to vector<32x32xf32>
    %94 = arith.addf %91, %93 : vector<32x32xf32>
    %95 = arith.addf %94, %54 : vector<32x32xf32>
    %c0_65 = arith.constant 0 : index
    %c0_66 = arith.constant 0 : index
    %96 = vector.load %arg19[%c0_65, %c0_66] : memref<32x64xf32, #tpu.memory_space<vmem>>, vector<32x64xf32>
    %cst_67 = arith.constant dense<0.000000e+00> : vector<32x64xf32>
    %97 = tpu.matmul %95, %96, %cst_67 {dimension_numbers = #tpu.dot_dimension_numbers<[1], [0], [0], [1], [0, 0, 1, 1], [], []>} : vector<32x32xf32>, vector<32x64xf32>, vector<32x64xf32> -> vector<32x64xf32>
    %c0_68 = arith.constant 0 : index
    %c0_69 = arith.constant 0 : index
    %98 = vector.load %arg20[%c0_68, %c0_69] : memref<32x64xf32, #tpu.memory_space<vmem>>, vector<32x64xf32>
    tpu.vector_store %arg20[%c0_68, %c0_69], %97 {strides = array<i32>} : memref<32x64xf32, #tpu.memory_space<vmem>>, vector<32x64xf32>,
    return
  }
}

</mosaic_0001>

<bundles_post_ra>
// kernel: afnonet_forward.3
= control target key start
LH: loop header
LB: loop body
LE: loop exit
PB: predicated region body
PF: predicated region fallthrough
CT: control target
= control target key end

     0   :  { %vm41_vm0 = vcmask 523264   ;;  %vm89_vm1 = vcmask 261120   ;;  %v259_v31 = vmov 32.0   ;;  %s406_s2 = inlined_call_operand.vmem [shape: f32[64,32], index: 2, kind: input, shape index: {}]   ;;  %s407_s3 = inlined_call_operand.vmem [shape: f32[1,32], index: 3, kind: input, shape index: {}]   ;;  %s408_s0 = inlined_call_operand.vmem [shape: f32[32,64], index: 0, kind: input, shape index: {}]   ;;  %s409_s1 = inlined_call_operand.vmem [shape: f32[16,32], index: 1, kind: input, shape index: {}]   ;;  %s410_s6 = inlined_call_operand.vmem [shape: f32[32,32], index: 6, kind: output, shape index: {0}]   ;;  %s411_s4 = inlined_call_operand.vmem [shape: f32[1,32], index: 4, kind: input, shape index: {}]   ;;  %s412_s5 = inlined_call_operand.vmem [shape: f32[1,32], index: 5, kind: input, shape index: {}]   ;;  %s413_s7 = inlined_call_operand.vmem [shape: f32[32,32], index: 7, kind: output, shape index: {1}]  }
   0x1   :  { %v36_v0 = vld [vmem:[%s406_s2 + $0x38] sm:$0xff]  ;;  %v35_v1 = vld [vmem:[%s406_s2 + $0x30] sm:$0xff]  ;;  %v34_v2 = vld [vmem:[%s406_s2 + $0x28] sm:$0xff]  ;;  %249 = vrcp.f32 %v259_v31 }
   0x2   :  { %62 = vmatpush.msra.mxu0 %v36_v0  ;;  %222 = vmatpush.msra.mxu2 %v36_v0  ;;  %v33_v3 = vld [vmem:[%s406_s2 + $0x20] sm:$0xff]  ;;  %v32_v4 = vld [vmem:[%s406_s2 + $0x18] sm:$0xff]  ;;  %v31_v5 = vld [vmem:[%s406_s2 + $0x10] sm:$0xff] }
   0x3   :  { %221 = vmatpush.msra.mxu1 %v36_v0  ;;  %223 = vmatpush.msra.mxu3 %v36_v0  ;;  %v30_v6 = vld [vmem:[%s406_s2 + $0x8] sm:$0xff]  ;;  %v29_v7 = vld [vmem:[%s406_s2] sm:$0xff]  ;;  %v27_v9 = vld [vmem:[%s408_s0 + $0x10] sm:$0xff] }
   0x4   :  { %63 = vmatpush.msra.mxu0 %v35_v1  ;;  %225 = vmatpush.msra.mxu2 %v35_v1  ;;  %v25_v8 = vld [vmem:[%s408_s0] sm:$0xff]  ;;  %v26_v10 = vld [vmem:[%s408_s0 + $0x8] sm:$0xff]  ;;  %v28_v11 = vld [vmem:[%s408_s0 + $0x18] sm:$0xff] }
   0x5   :  { %224 = vmatpush.msra.mxu1 %v35_v1  ;;  %226 = vmatpush.msra.mxu3 %v35_v1  ;;  %v246_v12 = vld [vmem:[%s407_s3] ss:$0 sm:$0xff]  ;;  %v84_v17 = vld [vmem:[%s409_s1 + $0x8] sm:$0xff] }
   0x6   :  { %64 = vmatpush.msra.mxu0 %v34_v2  ;;  %228 = vmatpush.msra.mxu2 %v34_v2  ;;  %v83_v14 = vld [vmem:[%s409_s1] sm:$0xff] }
   0x7   :  { %227 = vmatpush.msra.mxu1 %v34_v2  ;;  %229 = vmatpush.msra.mxu3 %v34_v2  ;;  %v250_v32 = vpop.eup %249 }
   0x8   :  { %65 = vmatpush.msra.mxu0 %v33_v3  ;;  %231 = vmatpush.msra.mxu2 %v33_v3  ;;  %v109_v33 = vmul.f32 32.0, %v250_v32  ;;  %vm113_vm2 = vweird.f32 %v250_v32 }
   0x9   :  { %230 = vmatpush.msra.mxu1 %v33_v3  ;;  %232 = vmatpush.msra.mxu3 %v33_v3 }
   0xa   :  { %66 = vmatpush.msra.mxu0 %v32_v4  ;;  %234 = vmatpush.msra.mxu2 %v32_v4  ;;  %v110_v34 = vsub.f32 1.0, %v109_v33 }
   0xb   :  { %233 = vmatpush.msra.mxu1 %v32_v4  ;;  %235 = vmatpush.msra.mxu3 %v32_v4 }
   0xc   :  { %67 = vmatpush.msra.mxu0 %v31_v5  ;;  %237 = vmatpush.msra.mxu2 %v31_v5  ;;  %v111_v35 = vmul.f32 %v250_v32, %v110_v34 }
   0xd   :  { %236 = vmatpush.msra.mxu1 %v31_v5  ;;  %238 = vmatpush.msra.mxu3 %v31_v5 }
   0xe   :  { %68 = vmatpush.msra.mxu0 %v30_v6  ;;  %240 = vmatpush.msra.mxu2 %v30_v6  ;;  %v112_v36 = vadd.f32 %v250_v32, %v111_v35 }
   0xf   :  { %239 = vmatpush.msra.mxu1 %v30_v6  ;;  %241 = vmatpush.msra.mxu3 %v30_v6 }
  0x10   :  { %69 = vmatpush.msra.mxu0 %v29_v7  ;;  %243 = vmatpush.msra.mxu2 %v29_v7  ;;  %v114_v37 = vsel %vm113_vm2, %v250_v32, %v112_v36 }
  0x11   :  { %217 = vmatmul.msk.f32.vlgmr.msra.gmra.mxu0 %vm41_vm0, %v25_v8  ;;  %219 = vmatmul.msk.f32.vlgmr.msra.gmra.mxu2 %vm41_vm0, %v27_v9 }
  0x12   :  { %242 = vmatpush.msra.mxu1 %v29_v7  ;;  %244 = vmatpush.msra.mxu3 %v29_v7 }
  0x13   :  { %218 = vmatmul.msk.f32.vlgmr.msra.gmra.mxu1 %vm41_vm0, %v26_v10  ;;  %220 = vmatmul.msk.f32.vlgmr.msra.gmra.mxu3 %vm41_vm0, %v28_v11 }
  0x8e   :  { %v71_v13 = vpop.f32.mrf.mxu0 }
  0x8f   :  { %v72_v15 = vadd.f32 %v246_v12, %v71_v13 }
  0x90   :  { %v74_v16 = vpop.f32.mrf.mxu1 }
  0x91   :  { %v85_v18 = vadd.f32 %v83_v14, %v72_v15  ;;  %v75_v19 = vadd.f32 %v246_v12, %v74_v16 }
  0x93   :  { %90 = vst.msk [vmem:[%s410_s6] sm:$0xff] %vm89_vm1, %v85_v18  ;;  %v96_v20 = vsel %vm89_vm1, %v85_v18, 0.0  ;;  %v86_v21 = vadd.f32 %v84_v17, %v75_v19 }
  0x94   :  { %v77_v22 = vpop.f32.mrf.mxu2  ;;  %97 = vadd.xlane.f32.xlu0 %v96_v20 }
  0x95   :  { %v78_v23 = vadd.f32 %v246_v12, %v77_v22  ;;  %91 = vst.msk [vmem:[%s410_s6 + $0x8] sm:$0xff] %vm89_vm1, %v86_v21  ;;  %v99_v29 = vsel %vm89_vm1, %v86_v21, 0.0 }
  0x96   :  { %v80_v24 = vpop.f32.mrf.mxu3 }
  0x97   :  { %v87_v25 = vadd.f32 %v83_v14, %v78_v23  ;;  %v81_v26 = vadd.f32 %v246_v12, %v80_v24 }
  0x99   :  { %92 = vst.msk [vmem:[%s410_s6 + $0x10] sm:$0xff] %vm89_vm1, %v87_v25  ;;  %v102_v27 = vsel %vm89_vm1, %v87_v25, 0.0  ;;  %v88_v28 = vadd.f32 %v84_v17, %v81_v26  ;;  %v247_v17 = vld [vmem:[%s411_s4] ss:$0 sm:$0xff] }
  0x9a   :  { %103 = vadd.xlane.f32.xlu1 %v102_v27 }
  0x9b   :  { %93 = vst.msk [vmem:[%s410_s6 + $0x18] sm:$0xff] %vm89_vm1, %v88_v28  ;;  %v105_v30 = vsel %vm89_vm1, %v88_v28, 0.0 }
  0x9c   :  { %100 = vadd.xlane.f32.xlu0 %v99_v29 }
  0xa2   :  { %106 = vadd.xlane.f32.xlu1 %v105_v30 }
 0x107   :  { %v98_v38 = vpop.xlane.xlu0 %97 }
 0x108   :  { %v115_v39 = vmul.f32 %v114_v37, %v98_v38 }
 0x10a   :  { %v119_v40 = vsub.f32 %v85_v18, %v115_v39 }
 0x10c   :  { %v123_v41 = vmul.f32 %v119_v40, %v119_v40 }
 0x10d   :  { %v104_v42 = vpop.xlane.xlu1 %103 }
 0x10e   :  { %v117_v43 = vmul.f32 %v114_v37, %v104_v42  ;;  %v127_v44 = vsel %vm89_vm1, %v123_v41, 0.0 }
 0x10f   :  { %128 = vadd.xlane.f32.xlu2 %v127_v44  ;;  %v101_v45 = vpop.xlane.xlu0 %100 }
 0x110   :  { %v366_v46 = vsub.f32 %v87_v25, %v117_v43  ;;  %v116_v47 = vmul.f32 %v114_v37, %v101_v45 }
 0x112   :  { %v368_v48 = vsub.f32 %v86_v21, %v116_v47  ;;  %v125_v49 = vmul.f32 %v366_v46, %v366_v46  ;;  %v248_v21 = vld [vmem:[%s412_s5] ss:$0 sm:$0xff] }
 0x114   :  { %v133_v50 = vsel %vm89_vm1, %v125_v49, 0.0  ;;  %v124_v51 = vmul.f32 %v368_v48, %v368_v48 }
 0x115   :  { %v107_v52 = vpop.xlane.xlu1 %106  ;;  %134 = vadd.xlane.f32.xlu0 %v133_v50 }
 0x116   :  { %v118_v53 = vmul.f32 %v114_v37, %v107_v52  ;;  %v130_v54 = vsel %vm89_vm1, %v124_v51, 0.0 }
 0x117   :  { %131 = vadd.xlane.f32.xlu2 %v130_v54 }
 0x118   :  { %v376_v55 = vsub.f32 %v88_v28, %v118_v53 }
 0x11a   :  { %v126_v56 = vmul.f32 %v376_v55, %v376_v55 }
 0x11c   :  { %v136_v57 = vsel %vm89_vm1, %v126_v56, 0.0 }
 0x11d   :  { %137 = vadd.xlane.f32.xlu1 %v136_v57 }
 0x182   :  { %v129_v58 = vpop.xlane.xlu2 %128 }
 0x183   :  { %v139_v59 = vmul.f32 %v129_v58, %v114_v37 }
 0x185   :  { %v143_v60 = vadd.f32 1e-06, %v139_v59 }
 0x187   :  { %251 = vrsqrt.f32 %v143_v60  ;;  %vm153_vm4 = vweird.f32 %v143_v60 }
 0x188   :  { %v135_v61 = vpop.xlane.xlu0 %134 }
 0x189   :  { %v141_v62 = vmul.f32 %v135_v61, %v114_v37 }
 0x18a   :  { %v132_v63 = vpop.xlane.xlu2 %131 }
 0x18b   :  { %v145_v0 = vadd.f32 1e-06, %v141_v62  ;;  %v140_v1 = vmul.f32 %v132_v63, %v114_v37 }
 0x18d   :  { %v252_v2 = vpop.eup %251  ;;  %253 = vrsqrt.f32 %v145_v0  ;;  %v144_v3 = vadd.f32 1e-06, %v140_v1  ;;  %vm173_vm7 = vweird.f32 %v145_v0 }
 0x18e   :  { %v148_v4 = vmul.f32 %v252_v2, %v143_v60  ;;  %vm154_vm3 = vweird.f32 %v252_v2 }
 0x18f   :  { %255 = vrsqrt.f32 %v144_v3  ;;  %vm155_vm5 = vmor %vm153_vm4, %vm154_vm3  ;;  %vm163_vm10 = vweird.f32 %v144_v3 }
 0x190   :  { %v149_v5 = vmul.f32 %v252_v2, %v148_v4  ;;  %v138_v6 = vpop.xlane.xlu1 %137 }
 0x191   :  { %v142_v7 = vmul.f32 %v138_v6, %v114_v37 }
 0x192   :  { %v150_v8 = vmul.f32 0.5, %v149_v5 }
 0x193   :  { %v254_v9 = vpop.eup %253  ;;  %v146_v10 = vadd.f32 1e-06, %v142_v7 }
 0x194   :  { %v151_v11 = vsub.f32 1.5, %v150_v8  ;;  %v168_v12 = vmul.f32 %v254_v9, %v145_v0  ;;  %vm174_vm6 = vweird.f32 %v254_v9 }
 0x195   :  { %v256_v13 = vpop.eup %255  ;;  %257 = vrsqrt.f32 %v146_v10  ;;  %vm175_vm9 = vmor %vm173_vm7, %vm174_vm6  ;;  %vm183_vm13 = vweird.f32 %v146_v10 }
 0x196   :  { %v152_v14 = vmul.f32 %v252_v2, %v151_v11  ;;  %v169_v15 = vmul.f32 %v254_v9, %v168_v12  ;;  %v158_v16 = vmul.f32 %v256_v13, %v144_v3  ;;  %vm164_vm8 = vweird.f32 %v256_v13 }
 0x197   :  { %vm165_vm11 = vmor %vm163_vm10, %vm164_vm8 }
 0x198   :  { %v156_v18 = vsel %vm155_vm5, %v252_v2, %v152_v14  ;;  %v170_v19 = vmul.f32 0.5, %v169_v15  ;;  %v159_v20 = vmul.f32 %v256_v13, %v158_v16 }
 0x199   :  { %v187_v22 = vmul.f32 %v156_v18, %v119_v40 }
 0x19a   :  { %v171_v23 = vsub.f32 1.5, %v170_v19  ;;  %v160_v24 = vmul.f32 0.5, %v159_v20 }
 0x19b   :  { %v258_v25 = vpop.eup %257  ;;  %v194_v26 = vmul.f32 %v247_v17, %v187_v22 }
 0x19c   :  { %v172_v27 = vmul.f32 %v254_v9, %v171_v23  ;;  %v161_v28 = vsub.f32 1.5, %v160_v24  ;;  %v178_v29 = vmul.f32 %v258_v25, %v146_v10  ;;  %vm184_vm12 = vweird.f32 %v258_v25 }
 0x19d   :  { %v201_v30 = vadd.f32 %v248_v21, %v194_v26  ;;  %vm185_vm14 = vmor %vm183_vm13, %vm184_vm12 }
 0x19e   :  { %v176_v31 = vsel %vm175_vm9, %v254_v9, %v172_v27  ;;  %v162_v32 = vmul.f32 %v256_v13, %v161_v28  ;;  %v179_v33 = vmul.f32 %v258_v25, %v178_v29 }
 0x19f   :  { %205 = vst.msk [vmem:[%s413_s7] sm:$0xff] %vm89_vm1, %v201_v30  ;;  %v189_v34 = vmul.f32 %v176_v31, %v366_v46 }
 0x1a0   :  { %v166_v35 = vsel %vm165_vm11, %v256_v13, %v162_v32  ;;  %v180_v36 = vmul.f32 0.5, %v179_v33 }
 0x1a1   :  { %v196_v37 = vmul.f32 %v247_v17, %v189_v34  ;;  %v188_v38 = vmul.f32 %v166_v35, %v368_v48 }
 0x1a2   :  { %v181_v39 = vsub.f32 1.5, %v180_v36 }
 0x1a3   :  { %v203_v40 = vadd.f32 %v248_v21, %v196_v37  ;;  %v195_v41 = vmul.f32 %v247_v17, %v188_v38 }
 0x1a4   :  { %v182_v42 = vmul.f32 %v258_v25, %v181_v39 }
 0x1a5   :  { %207 = vst.msk [vmem:[%s413_s7 + $0x10] sm:$0xff] %vm89_vm1, %v203_v40  ;;  %v202_v43 = vadd.f32 %v248_v21, %v195_v41 }
 0x1a6   :  { %v186_v44 = vsel %vm185_vm14, %v258_v25, %v182_v42 }
 0x1a7   :  { %206 = vst.msk [vmem:[%s413_s7 + $0x8] sm:$0xff] %vm89_vm1, %v202_v43  ;;  %v190_v45 = vmul.f32 %v186_v44, %v376_v55 }
 0x1a9   :  { %v197_v46 = vmul.f32 %v247_v17, %v190_v45 }
 0x1ab   :  { %v204_v47 = vadd.f32 %v248_v21, %v197_v46 }
 0x1ad   :  { %208 = vst.msk [vmem:[%s413_s7 + $0x18] sm:$0xff] %vm89_vm1, %v204_v47 }

// kernel: afnonet_forward.5
= control target key start
LH: loop header
LB: loop body
LE: loop exit
PB: predicated region body
PF: predicated region fallthrough
CT: control target
= control target key end

     0   :  { %vm76_vm0 = vcmask 261120   ;;  %vm250_vm1 = vcmask 523264   ;;  %vm368_vm13 = vcmask 195584   ;;  %s1527_s1 = inlined_call_operand.vmem [shape: f32[32,32], index: 1, kind: input, shape index: {}]   ;;  %s1528_s2 = inlined_call_operand.vmem [shape: f32[24,32], index: 2, kind: input, shape index: {}]   ;;  %s1529_s3 = inlined_call_operand.vmem [shape: f32[24,32], index: 3, kind: input, shape index: {}]   ;;  %s1530_s6 = inlined_call_operand.vmem [shape: f32[32,64], index: 6, kind: input, shape index: {}]   ;;  %s1531_s7 = inlined_call_operand.vmem [shape: f32[32,64], index: 7, kind: input, shape index: {}]   ;;  %s1532_s9 = inlined_call_operand.vmem [shape: f32[64,32], index: 9, kind: input, shape index: {}]   ;;  %s1533_s10 = inlined_call_operand.vmem [shape: f32[64,32], index: 10, kind: input, shape index: {}]   ;;  %s1534_s8 = inlined_call_operand.vmem [shape: f32[1,64], index: 8, kind: input, shape index: {}]   ;;  %s1535_s11 = inlined_call_operand.vmem [shape: f32[1,32], index: 11, kind: input, shape index: {}]   ;;  %s1536_s12 = inlined_call_operand.vmem [shape: f32[1,32], index: 12, kind: input, shape index: {}]   ;;  %s1537_s5 = inlined_call_operand.vmem [shape: f32[32,24], index: 5, kind: input, shape index: {}]   ;;  %s1538_s4 = inlined_call_operand.vmem [shape: f32[32,24], index: 4, kind: input, shape index: {}]   ;;  %s1539_s0 = inlined_call_operand.vmem [shape: f32[32,32], index: 0, kind: input, shape index: {}]   ;;  %s1540_s13 = inlined_call_operand.vmem [shape: f32[1,32], index: 13, kind: input, shape index: {}]   ;;  %s1541_s14 = inlined_call_operand.vmem [shape: f32[1,32], index: 14, kind: input, shape index: {}]   ;;  %s1542_s16 = inlined_call_operand.vmem [shape: f32[1,128], index: 16, kind: input, shape index: {}]   ;;  %s1543_s15 = inlined_call_operand.vmem [shape: f32[32,128], index: 15, kind: input, shape index: {}]   ;;  %s1544_s18 = inlined_call_operand.vmem [shape: f32[1,32], index: 18, kind: input, shape index: {}]   ;;  %s1545_s17 = inlined_call_operand.vmem [shape: f32[128,32], index: 17, kind: input, shape index: {}]   ;;  %s1546_s19 = inlined_call_operand.vmem [shape: f32[32,64], index: 19, kind: input, shape index: {}]   ;;  %s1547_s20 = inlined_call_operand.vmem [shape: f32[32,64], index: 20, kind: output, shape index: {}]  }
   0x1   :  { %1553 = sst [smem:[#allocation2_spill]] %s1527_s1  ;;  %v245_v18 = vld [vmem:[%s1532_s9 + $0x38] sm:$0xff]  ;;  %v244_v20 = vld [vmem:[%s1532_s9 + $0x30] sm:$0xff]  ;;  %v243_v22 = vld [vmem:[%s1532_s9 + $0x28] sm:$0xff] }
   0x2   :  { %1554 = sst [smem:[#allocation3_spill]] %s1528_s2  ;;  %v293_v19 = vld [vmem:[%s1533_s10 + $0x38] sm:$0xff]  ;;  %v292_v21 = vld [vmem:[%s1533_s10 + $0x30] sm:$0xff]  ;;  %v291_v23 = vld [vmem:[%s1533_s10 + $0x28] sm:$0xff] }
   0x3   :  { %1555 = sst [smem:[#allocation4_spill]] %s1529_s3  ;;  %v242_v24 = vld [vmem:[%s1532_s9 + $0x20] sm:$0xff]  ;;  %v241_v32 = vld [vmem:[%s1532_s9 + $0x18] sm:$0xff]  ;;  %v240_v34 = vld [vmem:[%s1532_s9 + $0x10] sm:$0xff] }
   0x4   :  { %1556 = sst [smem:[#allocation5_spill]] %s1530_s6  ;;  %v290_v25 = vld [vmem:[%s1533_s10 + $0x20] sm:$0xff]  ;;  %v289_v33 = vld [vmem:[%s1533_s10 + $0x18] sm:$0xff]  ;;  %v288_v35 = vld [vmem:[%s1533_s10 + $0x10] sm:$0xff] }
   0x5   :  { %1557 = sst [smem:[#allocation6_spill]] %s1531_s7  ;;  %v239_v36 = vld [vmem:[%s1532_s9 + $0x8] sm:$0xff]  ;;  %v238_v38 = vld [vmem:[%s1532_s9] sm:$0xff] }
   0x6   :  { %s1558_s23 = sld [smem:[#allocation2_spill]]  ;;  %v287_v37 = vld [vmem:[%s1533_s10 + $0x8] sm:$0xff]  ;;  %v286_v39 = vld [vmem:[%s1533_s10] sm:$0xff] }
   0x7   :  { %s1559_s29 = sld [smem:[#allocation3_spill]]  ;;  %v950_v40 = vld [vmem:[%s1534_s8] ss:$0 sm:$0xff] }
   0x8   :  { %s1560_s21 = sld [smem:[#allocation4_spill]]  ;;  %v952_v58 = vld [vmem:[%s1536_s12] ss:$0 sm:$0xff] }
   0x9   :  { %s1561_s24 = sld [smem:[#allocation5_spill]]  ;;  %v951_v61 = vld [vmem:[%s1535_s11] ss:$0 sm:$0xff] }
   0xa   :  { %s1562_s25 = sld [smem:[#allocation6_spill]] }
   0xc   :  { %v1084_v0 = vld [vmem:[%s1558_s23 + $0x18] sm:$0xff]  ;;  %v1089_v1 = vld [vmem:[%s1558_s23 + $0x10] sm:$0xff]  ;;  %v1096_v2 = vld [vmem:[%s1558_s23 + $0x8] sm:$0xff] }
   0xd   :  { %98 = vmatpush.msra.mxu0 %v1084_v0  ;;  %136 = vmatpush.msra.mxu3 %v1084_v0  ;;  %v1103_v3 = vld [vmem:[%s1558_s23] sm:$0xff]  ;;  %v74_v9 = vld [vmem:[%s1559_s29 + $0x8] sm:$0xff]  ;;  %v75_v12 = vld [vmem:[%s1559_s29 + $0x10] sm:$0xff] }
   0xe   :  { %v73_v4 = vld [vmem:[%s1559_s29] sm:$0xff]  ;;  %v113_v10 = vld [vmem:[%s1560_s21 + $0x8] sm:$0xff]  ;;  %v114_v11 = vld [vmem:[%s1560_s21 + $0x10] sm:$0xff] }
   0xf   :  { %99 = vmatpush.msra.mxu0 %v1089_v1  ;;  %137 = vmatpush.msra.mxu3 %v1089_v1  ;;  %v112_v5 = vld [vmem:[%s1560_s21] sm:$0xff]  ;;  %v153_v6 = vld [vmem:[%s1561_s24 + $0x18] sm:$0xff]  ;;  %v152_v7 = vld [vmem:[%s1561_s24 + $0x10] sm:$0xff] }
  0x10   :  { %v151_v8 = vld [vmem:[%s1561_s24 + $0x8] sm:$0xff]  ;;  %v157_v13 = vld [vmem:[%s1562_s25 + $0x18] sm:$0xff]  ;;  %v150_v14 = vld [vmem:[%s1561_s24] sm:$0xff] }
  0x11   :  { %100 = vmatpush.msra.mxu0 %v1096_v2  ;;  %138 = vmatpush.msra.mxu3 %v1096_v2  ;;  %v156_v15 = vld [vmem:[%s1562_s25 + $0x10] sm:$0xff]  ;;  %v155_v16 = vld [vmem:[%s1562_s25 + $0x8] sm:$0xff]  ;;  %v154_v17 = vld [vmem:[%s1562_s25] sm:$0xff] }
  0x12   :  { %179 = vmatpush.msra.mxu1 %v157_v13  ;;  %945 = vmatpush.msra.mxu2 %v157_v13 }
  0x13   :  { %101 = vmatpush.msra.mxu0 %v1103_v3  ;;  %139 = vmatpush.msra.mxu3 %v1103_v3 }
  0x14   :  { %901 = vmatmul.msk.f32.vlgmr.msra.gmra.mxu0 %vm76_vm0, %v73_v4  ;;  %904 = vmatmul.msk.f32.vlgmr.msra.gmra.mxu3 %vm76_vm0, %v112_v5 }
  0x15   :  { %214 = vmatpush.msrb.mxu3 %v153_v6  ;;  %180 = vmatpush.msra.mxu1 %v156_v15 }
  0x16   :  { %946 = vmatpush.msra.mxu2 %v156_v15  ;;  %268 = vmatpush.msrb.mxu0 %v245_v18 }
  0x17   :  { %215 = vmatpush.msrb.mxu3 %v152_v7  ;;  %181 = vmatpush.msra.mxu1 %v155_v16 }
  0x18   :  { %947 = vmatpush.msra.mxu2 %v155_v16  ;;  %269 = vmatpush.msrb.mxu0 %v244_v20 }
  0x19   :  { %216 = vmatpush.msrb.mxu3 %v151_v8  ;;  %182 = vmatpush.msra.mxu1 %v154_v17 }
  0x1a   :  { %948 = vmatpush.msra.mxu2 %v154_v17  ;;  %270 = vmatpush.msrb.mxu0 %v243_v22 }
  0x1b   :  { %217 = vmatpush.msrb.mxu3 %v150_v14  ;;  %306 = vmatpush.msrb.mxu1 %v293_v19 }
  0x1c   :  { %902 = vmatmul.msk.f32.gmra.mxu0 %vm76_vm0, %v74_v9  ;;  %905 = vmatmul.msk.f32.gmra.mxu3 %vm76_vm0, %v113_v10 }
  0x1d   :  { %307 = vmatpush.msrb.mxu1 %v292_v21  ;;  %271 = vmatpush.msrb.mxu0 %v242_v24 }
  0x1f   :  { %308 = vmatpush.msrb.mxu1 %v291_v23  ;;  %272 = vmatpush.msrb.mxu0 %v241_v32  ;;  %v364_v32 = vld [vmem:[%s1537_s5] sm:$0xff] }
  0x21   :  { %309 = vmatpush.msrb.mxu1 %v290_v25  ;;  %273 = vmatpush.msrb.mxu0 %v240_v34  ;;  %v360_v34 = vld [vmem:[%s1538_s4] sm:$0xff] }
  0x23   :  { %310 = vmatpush.msrb.mxu1 %v289_v33  ;;  %274 = vmatpush.msrb.mxu0 %v239_v36  ;;  %v365_v36 = vld [vmem:[%s1537_s5 + $0x8] sm:$0xff] }
  0x24   :  { %906 = vmatmul.msk.f32.gmra.mxu3 %vm76_vm0, %v114_v11  ;;  %903 = vmatmul.msk.f32.gmra.mxu0 %vm76_vm0, %v75_v12 }
  0x25   :  { %311 = vmatpush.msrb.mxu1 %v288_v35  ;;  %275 = vmatpush.msrb.mxu0 %v238_v38  ;;  %v366_v38 = vld [vmem:[%s1537_s5 + $0x10] sm:$0xff] }
  0x27   :  { %312 = vmatpush.msrb.mxu1 %v287_v37  ;;  %v361_v37 = vld [vmem:[%s1538_s4 + $0x8] sm:$0xff] }
  0x29   :  { %313 = vmatpush.msrb.mxu1 %v286_v39  ;;  %v362_v39 = vld [vmem:[%s1538_s4 + $0x10] sm:$0xff] }
  0x91   :  { %v103_v26 = vpop.f32.mrf.mxu0 }
  0x92   :  { %910 = vmatmul.msk.f32.vlgmr.msrb.gmra.mxu3 %vm76_vm0, %v103_v26 }
  0x97   :  { %v141_v27 = vpop.f32.mrf.mxu3 }
  0x98   :  { %907 = vmatmul.msk.f32.vlgmr.msra.gmra.mxu1 %vm76_vm0, %v141_v27 }
  0x99   :  { %v106_v28 = vpop.f32.mrf.mxu0 }
  0x9a   :  { %911 = vmatmul.msk.f32.gmra.mxu3 %vm76_vm0, %v106_v28 }
  0x9f   :  { %v144_v29 = vpop.f32.mrf.mxu3 }
  0xa0   :  { %908 = vmatmul.msk.f32.gmra.mxu1 %vm76_vm0, %v144_v29 }
  0xa1   :  { %v109_v30 = vpop.f32.mrf.mxu0 }
  0xa2   :  { %912 = vmatmul.msk.f32.gmra.mxu3 %vm76_vm0, %v109_v30 }
  0xa7   :  { %v147_v31 = vpop.f32.mrf.mxu3 }
  0xa8   :  { %909 = vmatmul.msk.f32.vlgmr.msra.gmra.mxu2 %vm76_vm0, %v147_v31 }
 0x115   :  { %v184_v41 = vpop.f32.mrf.mxu1  ;;  %v219_v42 = vpop.f32.mrf.mxu3 }
 0x116   :  { %v220_v43 = vadd.f32 %v219_v42, %v184_v41  ;;  %v363_v41 = vld [vmem:[%s1538_s4 + $0x18] sm:$0xff] }
 0x118   :  { %v232_v44 = vadd.f32 %v950_v40, %v220_v43 }
 0x11a   :  { %v235_v45 = vmax.f32 %v232_v44, 0.0 }
 0x11c   :  { %913 = vmatmul.msk.f32.vlgmr.msrb.gmra.mxu0 %vm250_vm1, %v235_v45  ;;  %916 = vmatmul.msk.f32.vlgmr.msrb.gmra.mxu1 %vm250_vm1, %v235_v45  ;;  %v65_v45 = vld [vmem:[%s1539_s0] sm:$0xff] }
 0x11d   :  { %v187_v46 = vpop.f32.mrf.mxu1  ;;  %v222_v47 = vpop.f32.mrf.mxu3 }
 0x11e   :  { %v223_v48 = vadd.f32 %v222_v47, %v187_v46 }
 0x120   :  { %v233_v49 = vadd.f32 %v950_v40, %v223_v48 }
 0x122   :  { %v236_v50 = vmax.f32 %v233_v49, 0.0 }
 0x124   :  { %914 = vmatmul.msk.f32.gmra.mxu0 %vm250_vm1, %v236_v50  ;;  %917 = vmatmul.msk.f32.gmra.mxu1 %vm250_vm1, %v236_v50 }
 0x125   :  { %v225_v51 = vpop.f32.mrf.mxu3 }
 0x12b   :  { %v190_v52 = vpop.f32.mrf.mxu2 }
 0x12c   :  { %v226_v53 = vadd.f32 %v225_v51, %v190_v52  ;;  %v66_v52 = vld [vmem:[%s1539_s0 + $0x8] sm:$0xff] }
 0x12e   :  { %v234_v54 = vadd.f32 %v950_v40, %v226_v53  ;;  %v367_v40 = vld [vmem:[%s1537_s5 + $0x18] sm:$0xff] }
 0x130   :  { %v237_v55 = vmax.f32 %v234_v54, 0.0 }
 0x132   :  { %915 = vmatmul.msk.f32.gmra.mxu0 %vm250_vm1, %v237_v55  ;;  %918 = vmatmul.msk.f32.gmra.mxu1 %vm250_vm1, %v237_v55 }
 0x199   :  { %v277_v56 = vpop.f32.mrf.mxu0  ;;  %v315_v57 = vpop.f32.mrf.mxu1 }
 0x19a   :  { %v316_v62 = vadd.f32 %v952_v58, %v315_v57  ;;  %v278_v63 = vadd.f32 %v951_v61, %v277_v56 }
 0x19c   :  { %v922_v8 = vadd.f32 -0.01, %v316_v62  ;;  %vm348_vm2 = vcmp.lt.f32.partialorder %v316_v62, -0.01  ;;  %v351_v11 = vadd.f32 0.01, %v316_v62 }
 0x19d   :  { %vm330_vm3 = vcmp.lt.f32.partialorder %v278_v63, -0.01  ;;  %v333_v13 = vadd.f32 0.01, %v278_v63  ;;  %v919_v28 = vadd.f32 -0.01, %v278_v63 }
 0x19e   :  { %v354_v27 = vsel %vm348_vm2, %v351_v11, 0.0  ;;  %vm342_vm12 = vcmp.gt.f32.partialorder %v316_v62, 0.01  ;;  %vm324_vm14 = vcmp.gt.f32.partialorder %v278_v63, 0.01 }
 0x19f   :  { %v336_v30 = vsel %vm330_vm3, %v333_v13, 0.0  ;;  %v357_v33 = vsel %vm342_vm12, %v922_v8, %v354_v27 }
 0x1a0   :  { %v339_v35 = vsel %vm324_vm14, %v919_v28, %v336_v30 }
 0x1a1   :  { %v280_v59 = vpop.f32.mrf.mxu0  ;;  %v318_v60 = vpop.f32.mrf.mxu1 }
 0x1a2   :  { %v319_v4 = vadd.f32 %v952_v58, %v318_v60  ;;  %v281_v5 = vadd.f32 %v951_v61, %v280_v59 }
 0x1a4   :  { %vm349_vm4 = vcmp.lt.f32.partialorder %v319_v4, -0.01  ;;  %v352_v12 = vadd.f32 0.01, %v319_v4  ;;  %v334_v15 = vadd.f32 0.01, %v281_v5 }
 0x1a5   :  { %vm331_vm6 = vcmp.lt.f32.partialorder %v281_v5, -0.01  ;;  %v923_v19 = vadd.f32 -0.01, %v319_v4  ;;  %v920_v22 = vadd.f32 -0.01, %v281_v5 }
 0x1a6   :  { %v355_v21 = vsel %vm349_vm4, %v352_v12, 0.0  ;;  %v337_v25 = vsel %vm331_vm6, %v334_v15, 0.0  ;;  %vm343_vm10 = vcmp.gt.f32.partialorder %v319_v4, 0.01  ;;  %vm325_vm11 = vcmp.gt.f32.partialorder %v281_v5, 0.01 }
 0x1a7   :  { %v358_v29 = vsel %vm343_vm10, %v923_v19, %v355_v21  ;;  %v340_v31 = vsel %vm325_vm11, %v920_v22, %v337_v25  ;;  %v68_v4 = vld [vmem:[%s1539_s0 + $0x18] sm:$0xff] }
 0x1af   :  { %v283_v6 = vpop.f32.mrf.mxu0  ;;  %v321_v7 = vpop.f32.mrf.mxu1 }
 0x1b0   :  { %v284_v9 = vadd.f32 %v951_v61, %v283_v6  ;;  %v322_v10 = vadd.f32 %v952_v58, %v321_v7  ;;  %v67_v58 = vld [vmem:[%s1539_s0 + $0x10] sm:$0xff]  ;;  %v975_v7 = vmov 32.0  }
 0x1b1   :  { %957 = vrcp.f32 %v975_v7 }
 0x1b2   :  { %v924_v14 = vadd.f32 -0.01, %v322_v10  ;;  %vm350_vm5 = vcmp.lt.f32.partialorder %v322_v10, -0.01  ;;  %v353_v16 = vadd.f32 0.01, %v322_v10 }
 0x1b3   :  { %v921_v17 = vadd.f32 -0.01, %v284_v9  ;;  %vm332_vm7 = vcmp.lt.f32.partialorder %v284_v9, -0.01  ;;  %v335_v18 = vadd.f32 0.01, %v284_v9 }
 0x1b4   :  { %vm344_vm8 = vcmp.gt.f32.partialorder %v322_v10, 0.01  ;;  %v356_v20 = vsel %vm350_vm5, %v353_v16, 0.0  ;;  %vm326_vm9 = vcmp.gt.f32.partialorder %v284_v9, 0.01 }
 0x1b5   :  { %v359_v23 = vsel %vm344_vm8, %v924_v14, %v356_v20  ;;  %v338_v24 = vsel %vm332_vm7, %v335_v18, 0.0 }
 0x1b6   :  { %394 = vmatpush.msrb.mxu2 %v359_v23  ;;  %v341_v26 = vsel %vm326_vm9, %v921_v17, %v338_v24 }
 0x1b7   :  { %435 = vmatpush.msra.mxu3 %v341_v26  ;;  %v958_v8 = vpop.eup %957 }
 0x1b8   :  { %395 = vmatpush.msrb.mxu2 %v358_v29  ;;  %v474_v9 = vmul.f32 32.0, %v958_v8  ;;  %vm478_vm15 = vweird.f32 %v958_v8 }
 0x1b9   :  { %436 = vmatpush.msra.mxu3 %v340_v31 }
 0x1ba   :  { %396 = vmatpush.msrb.mxu2 %v357_v33  ;;  %v475_v10 = vsub.f32 1.0, %v474_v9  ;;  %v573_v33 = vld [vmem:[%s1543_s15 + $0x18] sm:$0xff] }
 0x1bb   :  { %437 = vmatpush.msra.mxu3 %v339_v35  ;;  %925 = vmatmul.msk.f32.vlgmr.msrb.gmra.mxu2 %vm368_vm13, %v364_v32  ;;  %v571_v35 = vld [vmem:[%s1543_s15 + $0x8] sm:$0xff] }
 0x1bc   :  { %929 = vmatmul.msk.f32.vlgmr.msra.gmra.mxu3 %vm368_vm13, %v360_v34  ;;  %v476_v11 = vmul.f32 %v958_v8, %v475_v10  ;;  %602 = vmatpush.msra.mxu0 %v573_v33  ;;  %v572_v34 = vld [vmem:[%s1543_s15 + $0x10] sm:$0xff] }
 0x1bd   :  { %v809_v33 = vld [vmem:[%s1545_s17 + $0x70] sm:$0xff] }
 0x1be   :  { %v477_v12 = vadd.f32 %v958_v8, %v476_v11  ;;  %603 = vmatpush.msra.mxu0 %v572_v34  ;;  %v808_v34 = vld [vmem:[%s1545_s17 + $0x68] sm:$0xff] }
 0x1c0   :  { %v1292_v13 = vsel %vm478_vm15, %v958_v8, %v477_v12  ;;  %604 = vmatpush.msra.mxu0 %v571_v35  ;;  %v807_v35 = vld [vmem:[%s1545_s17 + $0x60] sm:$0xff] }
 0x1c3   :  { %926 = vmatmul.msk.f32.gmra.mxu2 %vm368_vm13, %v365_v36  ;;  %v570_v36 = vld [vmem:[%s1543_s15] sm:$0xff] }
 0x1c4   :  { %930 = vmatmul.msk.f32.gmra.mxu3 %vm368_vm13, %v361_v37  ;;  %605 = vmatpush.msra.mxu0 %v570_v36 }
 0x1cb   :  { %927 = vmatmul.msk.f32.gmra.mxu2 %vm368_vm13, %v366_v38 }
 0x1cc   :  { %931 = vmatmul.msk.f32.gmra.mxu3 %vm368_vm13, %v362_v39 }
 0x1d3   :  { %928 = vmatmul.msk.f32.gmra.mxu2 %vm368_vm13, %v367_v40 }
 0x1d4   :  { %932 = vmatmul.msk.f32.gmra.mxu3 %vm368_vm13, %v363_v41 }
 0x23e   :  { %v398_v42 = vpop.f32.mrf.mxu2 }
 0x23f   :  { %v439_v43 = vpop.f32.mrf.mxu3 }
 0x240   :  { %v440_v44 = vadd.f32 %v439_v43, %v398_v42 }
 0x242   :  { %v451_v46 = vadd.f32 %v440_v44, %v1103_v3 }
 0x244   :  { %v1264_v47 = vadd.f32 %v451_v46, %v65_v45 }
 0x246   :  { %v401_v48 = vpop.f32.mrf.mxu2  ;;  %v461_v49 = vsel %vm76_vm0, %v1264_v47, 0.0 }
 0x247   :  { %v442_v50 = vpop.f32.mrf.mxu3  ;;  %462 = vadd.xlane.f32.xlu0 %v461_v49 }
 0x248   :  { %v443_v51 = vadd.f32 %v442_v50, %v401_v48 }
 0x24a   :  { %v452_v53 = vadd.f32 %v443_v51, %v1096_v2 }
 0x24c   :  { %v1272_v54 = vadd.f32 %v452_v53, %v66_v52 }
 0x24e   :  { %v404_v55 = vpop.f32.mrf.mxu2  ;;  %v464_v3 = vsel %vm76_vm0, %v1272_v54, 0.0 }
 0x24f   :  { %v445_v56 = vpop.f32.mrf.mxu3  ;;  %465 = vadd.xlane.f32.xlu0 %v464_v3  ;;  %v953_v3 = vld [vmem:[%s1540_s13] ss:$0 sm:$0xff] }
 0x250   :  { %v446_v57 = vadd.f32 %v445_v56, %v404_v55 }
 0x252   :  { %v453_v59 = vadd.f32 %v446_v57, %v1089_v1 }
 0x254   :  { %v1280_v60 = vadd.f32 %v453_v59, %v67_v58  ;;  %v954_v59 = vld [vmem:[%s1541_s14] ss:$0 sm:$0xff] }
 0x256   :  { %v407_v61 = vpop.f32.mrf.mxu2  ;;  %v467_v2 = vsel %vm76_vm0, %v1280_v60, 0.0 }
 0x257   :  { %v448_v62 = vpop.f32.mrf.mxu3  ;;  %468 = vadd.xlane.f32.xlu1 %v467_v2 }
 0x258   :  { %v449_v63 = vadd.f32 %v448_v62, %v407_v61 }
 0x25a   :  { %v454_v5 = vadd.f32 %v449_v63, %v1084_v0 }
 0x25c   :  { %v1288_v6 = vadd.f32 %v454_v5, %v68_v4 }
 0x25e   :  { %v470_v1 = vsel %vm76_vm0, %v1288_v6, 0.0 }
 0x25f   :  { %471 = vadd.xlane.f32.xlu1 %v470_v1 }
 0x2ba   :  { %v463_v14 = vpop.xlane.xlu0 %462 }
 0x2bb   :  { %v480_v15 = vmul.f32 %v1292_v13, %v463_v14 }
 0x2bd   :  { %v484_v0 = vsub.f32 %v1264_v47, %v480_v15 }
 0x2bf   :  { %v488_v16 = vmul.f32 %v484_v0, %v484_v0 }
 0x2c1   :  { %v492_v17 = vsel %vm76_vm0, %v488_v16, 0.0 }
 0x2c2   :  { %493 = vadd.xlane.f32.xlu2 %v492_v17  ;;  %v466_v18 = vpop.xlane.xlu0 %465 }
 0x2c3   :  { %v481_v19 = vmul.f32 %v1292_v13, %v466_v18 }
 0x2c5   :  { %v1299_v20 = vsub.f32 %v1272_v54, %v481_v19 }
 0x2c7   :  { %v489_v21 = vmul.f32 %v1299_v20, %v1299_v20 }
 0x2c9   :  { %v495_v22 = vsel %vm76_vm0, %v489_v21, 0.0 }
 0x2ca   :  { %v469_v23 = vpop.xlane.xlu1 %468  ;;  %496 = vadd.xlane.f32.xlu2 %v495_v22 }
 0x2cb   :  { %v482_v24 = vmul.f32 %v1292_v13, %v469_v23 }
 0x2cd   :  { %v1306_v25 = vsub.f32 %v1280_v60, %v482_v24 }
 0x2cf   :  { %v490_v26 = vmul.f32 %v1306_v25, %v1306_v25 }
 0x2d1   :  { %v498_v27 = vsel %vm76_vm0, %v490_v26, 0.0 }
 0x2d2   :  { %v472_v28 = vpop.xlane.xlu1 %471  ;;  %499 = vadd.xlane.f32.xlu0 %v498_v27 }
 0x2d3   :  { %v483_v29 = vmul.f32 %v1292_v13, %v472_v28 }
 0x2d5   :  { %v1313_v30 = vsub.f32 %v1288_v6, %v483_v29 }
 0x2d7   :  { %v491_v31 = vmul.f32 %v1313_v30, %v1313_v30 }
 0x2d9   :  { %v501_v32 = vsel %vm76_vm0, %v491_v31, 0.0 }
 0x2da   :  { %502 = vadd.xlane.f32.xlu1 %v501_v32 }
 0x335   :  { %v494_v37 = vpop.xlane.xlu2 %493 }
 0x336   :  { %v504_v38 = vmul.f32 %v494_v37, %v1292_v13  ;;  %v806_v37 = vld [vmem:[%s1545_s17 + $0x58] sm:$0xff] }
 0x338   :  { %v508_v39 = vadd.f32 1e-06, %v504_v38 }
 0x33a   :  { %959 = vrsqrt.f32 %v508_v39  ;;  %vm518_vm3 = vweird.f32 %v508_v39 }
 0x33d   :  { %v497_v40 = vpop.xlane.xlu2 %496 }
 0x33e   :  { %v505_v41 = vmul.f32 %v497_v40, %v1292_v13 }
 0x340   :  { %v960_v42 = vpop.eup %959  ;;  %v509_v43 = vadd.f32 1e-06, %v505_v41  ;;  %v804_v41 = vld [vmem:[%s1545_s17 + $0x48] sm:$0xff] }
 0x341   :  { %v513_v44 = vmul.f32 %v960_v42, %v508_v39  ;;  %vm519_vm2 = vweird.f32 %v960_v42  ;;  %v805_v39 = vld [vmem:[%s1545_s17 + $0x50] sm:$0xff] }
 0x342   :  { %961 = vrsqrt.f32 %v509_v43  ;;  %vm520_vm4 = vmor %vm518_vm3, %vm519_vm2  ;;  %vm528_vm6 = vweird.f32 %v509_v43 }
 0x343   :  { %v514_v45 = vmul.f32 %v960_v42, %v513_v44 }
 0x345   :  { %v515_v46 = vmul.f32 0.5, %v514_v45  ;;  %v500_v48 = vpop.xlane.xlu0 %499 }
 0x346   :  { %v506_v49 = vmul.f32 %v500_v48, %v1292_v13 }
 0x347   :  { %v516_v50 = vsub.f32 1.5, %v515_v46  ;;  %v802_v46 = vld [vmem:[%s1545_s17 + $0x38] sm:$0xff] }
 0x348   :  { %v962_v51 = vpop.eup %961  ;;  %v510_v52 = vadd.f32 1e-06, %v506_v49 }
 0x349   :  { %v517_v53 = vmul.f32 %v960_v42, %v516_v50  ;;  %v523_v55 = vmul.f32 %v962_v51, %v509_v43  ;;  %vm529_vm5 = vweird.f32 %v962_v51  ;;  %v803_v43 = vld [vmem:[%s1545_s17 + $0x40] sm:$0xff] }
 0x34a   :  { %963 = vrsqrt.f32 %v510_v52  ;;  %vm530_vm7 = vmor %vm528_vm6, %vm529_vm5  ;;  %vm538_vm9 = vweird.f32 %v510_v52 }
 0x34b   :  { %v521_v56 = vsel %vm520_vm4, %v960_v42, %v517_v53  ;;  %v524_v57 = vmul.f32 %v962_v51, %v523_v55 }
 0x34c   :  { %v552_v58 = vmul.f32 %v521_v56, %v484_v0 }
 0x34d   :  { %v525_v61 = vmul.f32 0.5, %v524_v57  ;;  %v503_v2 = vpop.xlane.xlu1 %502 }
 0x34e   :  { %v559_v62 = vmul.f32 %v953_v3, %v552_v58  ;;  %v507_v63 = vmul.f32 %v503_v2, %v1292_v13 }
 0x34f   :  { %v526_v4 = vsub.f32 1.5, %v525_v61 }
 0x350   :  { %v964_v5 = vpop.eup %963  ;;  %v511_v1 = vadd.f32 1e-06, %v507_v63  ;;  %v566_v7 = vadd.f32 %v954_v59, %v559_v62 }
 0x351   :  { %v527_v8 = vmul.f32 %v962_v51, %v526_v4  ;;  %v533_v9 = vmul.f32 %v964_v5, %v510_v52  ;;  %vm539_vm8 = vweird.f32 %v964_v5  ;;  %v798_v4 = vld [vmem:[%s1545_s17 + $0x18] sm:$0xff] }
 0x352   :  { %965 = vrsqrt.f32 %v511_v1  ;;  %933 = vmatmul.msk.f32.vlgmr.msra.gmra.mxu0 %vm76_vm0, %v566_v7  ;;  %vm540_vm10 = vmor %vm538_vm9, %vm539_vm8  ;;  %vm548_vm12 = vweird.f32 %v511_v1 }
 0x353   :  { %v531_v10 = vsel %vm530_vm7, %v962_v51, %v527_v8  ;;  %v534_v11 = vmul.f32 %v964_v5, %v533_v9  ;;  %v801_v51 = vld [vmem:[%s1545_s17 + $0x30] sm:$0xff] }
 0x354   :  { %v553_v12 = vmul.f32 %v531_v10, %v1299_v20  ;;  %v797_v8 = vld [vmem:[%s1545_s17 + $0x10] sm:$0xff] }
 0x355   :  { %v535_v14 = vmul.f32 0.5, %v534_v11 }
 0x356   :  { %v560_v15 = vmul.f32 %v953_v3, %v553_v12 }
 0x357   :  { %v536_v0 = vsub.f32 1.5, %v535_v14 }
 0x358   :  { %v966_v13 = vpop.eup %965  ;;  %v567_v16 = vadd.f32 %v954_v59, %v560_v15  ;;  %v796_v15 = vld [vmem:[%s1545_s17 + $0x8] sm:$0xff] }
 0x359   :  { %v537_v17 = vmul.f32 %v964_v5, %v536_v0  ;;  %v543_v18 = vmul.f32 %v966_v13, %v511_v1  ;;  %vm549_vm11 = vweird.f32 %v966_v13 }
 0x35a   :  { %934 = vmatmul.msk.f32.gmra.mxu0 %vm76_vm0, %v567_v16  ;;  %vm550_vm13 = vmor %vm548_vm12, %vm549_vm11 }
 0x35b   :  { %v541_v19 = vsel %vm540_vm10, %v964_v5, %v537_v17  ;;  %v544_v21 = vmul.f32 %v966_v13, %v543_v18  ;;  %v795_v18 = vld [vmem:[%s1545_s17] sm:$0xff] }
 0x35c   :  { %v554_v22 = vmul.f32 %v541_v19, %v1306_v25  ;;  %v810_v25 = vld [vmem:[%s1545_s17 + $0x78] sm:$0xff] }
 0x35d   :  { %v545_v23 = vmul.f32 0.5, %v544_v21  ;;  %815 = vmatpush.msra.mxu1 %v810_v25 }
 0x35e   :  { %v561_v24 = vmul.f32 %v953_v3, %v554_v22 }
 0x35f   :  { %v546_v26 = vsub.f32 1.5, %v545_v23  ;;  %816 = vmatpush.msra.mxu1 %v809_v33 }
 0x360   :  { %v568_v20 = vadd.f32 %v954_v59, %v561_v24 }
 0x361   :  { %v547_v27 = vmul.f32 %v966_v13, %v546_v26  ;;  %817 = vmatpush.msra.mxu1 %v808_v34 }
 0x362   :  { %935 = vmatmul.msk.f32.gmra.mxu0 %vm76_vm0, %v568_v20 }
 0x363   :  { %v551_v28 = vsel %vm550_vm13, %v966_v13, %v547_v27  ;;  %818 = vmatpush.msra.mxu1 %v807_v35 }
 0x364   :  { %v555_v29 = vmul.f32 %v551_v28, %v1313_v30  ;;  %v1359_v30 = vld [vmem:[%s1542_s16] ss:$0 sm:$0xff] }
 0x365   :  { %819 = vmatpush.msra.mxu1 %v806_v37 }
 0x366   :  { %v562_v31 = vmul.f32 %v953_v3, %v555_v29  ;;  %v800_v3 = vld [vmem:[%s1545_s17 + $0x28] sm:$0xff] }
 0x367   :  { %820 = vmatpush.msra.mxu1 %v805_v39 }
 0x368   :  { %v569_v32 = vadd.f32 %v954_v59, %v562_v31  ;;  %v799_v59 = vld [vmem:[%s1545_s17 + $0x20] sm:$0xff] }
 0x369   :  { %821 = vmatpush.msra.mxu1 %v804_v41 }
 0x36a   :  { %936 = vmatmul.msk.f32.gmra.mxu0 %vm76_vm0, %v569_v32 }
 0x36b   :  { %822 = vmatpush.msra.mxu1 %v803_v43 }
 0x36d   :  { %823 = vmatpush.msra.mxu1 %v802_v46 }
 0x36f   :  { %824 = vmatpush.msra.mxu1 %v801_v51 }
 0x371   :  { %825 = vmatpush.msra.mxu1 %v800_v3 }
 0x373   :  { %826 = vmatpush.msra.mxu1 %v799_v59 }
 0x375   :  { %827 = vmatpush.msra.mxu1 %v798_v4 }
 0x377   :  { %828 = vmatpush.msra.mxu1 %v797_v8 }
 0x379   :  { %829 = vmatpush.msra.mxu1 %v796_v15 }
 0x37b   :  { %830 = vmatpush.msra.mxu1 %v795_v18 }
 0x3cf   :  { %v607_v36 = vpop.f32.mrf.mxu0 }
 0x3d0   :  { %v1368_v38 = vadd.f32 %v1359_v30, %v607_v36 }
 0x3d2   :  { %v1374_v40 = vmul.f32 0.70710677, %v1368_v38 }
 0x3d4   :  { %v627_v42 = vmul.f32 %v1374_v40, %v1374_v40 }
 0x3d6   :  { %v1384_v44 = vmin.f32 %v627_v42, 16.0 }
 0x3d7   :  { %v610_v45 = vpop.f32.mrf.mxu0 }
 0x3d8   :  { %v629_v48 = vmul.f32 2.1237322e-06, %v1384_v44  ;;  %v640_v49 = vmul.f32 3.8918573e-05, %v1384_v44  ;;  %v1392_v50 = vadd.f32 %v1359_v30, %v610_v45 }
 0x3da   :  { %v630_v52 = vadd.f32 0.00028619796, %v629_v48  ;;  %v641_v53 = vadd.f32 0.001143296, %v640_v49  ;;  %v1398_v55 = vmul.f32 0.70710677, %v1392_v50 }
 0x3dc   :  { %v631_v56 = vmul.f32 %v630_v52, %v1384_v44  ;;  %v642_v57 = vmul.f32 %v641_v53, %v1384_v44  ;;  %v667_v58 = vmul.f32 %v1398_v55, %v1398_v55 }
 0x3de   :  { %v632_v61 = vadd.f32 0.0036580483, %v631_v56  ;;  %v643_v2 = vadd.f32 0.014752088, %v642_v57  ;;  %v1410_v62 = vmin.f32 %v667_v58, 16.0 }
 0x3df   :  { %v613_v63 = vpop.f32.mrf.mxu0 }
 0x3e0   :  { %v644_v5 = vmul.f32 %v643_v2, %v1384_v44  ;;  %v1417_v1 = vadd.f32 %v1359_v30, %v613_v63  ;;  %v669_v7 = vmul.f32 2.1237322e-06, %v1410_v62  ;;  %v680_v9 = vmul.f32 3.8918573e-05, %v1410_v62 }
 0x3e1   :  { %v633_v10 = vmul.f32 %v632_v61, %v1384_v44 }
 0x3e2   :  { %v645_v11 = vadd.f32 0.112945676, %v644_v5  ;;  %v670_v12 = vadd.f32 0.00028619796, %v669_v7  ;;  %v1426_v14 = vmul.f32 0.70710677, %v1417_v1 }
 0x3e3   :  { %v681_v13 = vadd.f32 0.001143296, %v680_v9  ;;  %v634_v19 = vadd.f32 0.05243302, %v633_v10 }
 0x3e4   :  { %v646_v0 = vmul.f32 %v645_v11, %v1384_v44  ;;  %v671_v16 = vmul.f32 %v670_v12, %v1410_v62  ;;  %v707_v17 = vmul.f32 %v1426_v14, %v1426_v14 }
 0x3e5   :  { %v682_v22 = vmul.f32 %v681_v13, %v1410_v62  ;;  %v635_v32 = vmul.f32 %v634_v19, %v1384_v44 }
 0x3e6   :  { %v647_v21 = vadd.f32 0.4994258, %v646_v0  ;;  %v672_v23 = vadd.f32 0.0036580483, %v671_v16  ;;  %v1439_v24 = vmin.f32 %v707_v17, 16.0 }
 0x3e7   :  { %v616_v26 = vpop.f32.mrf.mxu0  ;;  %v683_v28 = vadd.f32 0.014752088, %v682_v22  ;;  %v636_v43 = vadd.f32 0.18741608, %v635_v32 }
 0x3e8   :  { %v648_v20 = vmul.f32 %v647_v21, %v1384_v44  ;;  %v1443_v27 = vadd.f32 %v1359_v30, %v616_v26  ;;  %v709_v29 = vmul.f32 2.1237322e-06, %v1439_v24  ;;  %v720_v31 = vmul.f32 3.8918573e-05, %v1439_v24 }
 0x3e9   :  { %v673_v34 = vmul.f32 %v672_v23, %v1410_v62  ;;  %v684_v36 = vmul.f32 %v683_v28, %v1410_v62  ;;  %v637_v58 = vmul.f32 %v636_v43, %v1384_v44 }
 0x3ea   :  { %v649_v25 = vadd.f32 1.0, %v648_v20  ;;  %v1449_v33 = vmul.f32 0.70710677, %v1443_v27  ;;  %v710_v35 = vadd.f32 0.00028619796, %v709_v29 }
 0x3eb   :  { %v721_v37 = vadd.f32 0.001143296, %v720_v31  ;;  %v685_v41 = vadd.f32 0.112945676, %v684_v36  ;;  %v674_v45 = vadd.f32 0.05243302, %v673_v34 }
 0x3ec   :  { %967 = vrcp.f32 %v649_v25  ;;  %v711_v30 = vmul.f32 %v710_v35, %v1439_v24  ;;  %v747_v39 = vmul.f32 %v1449_v33, %v1449_v33  ;;  %v661_v8 = vand.u32 2147483648, %v649_v25 }
 0x3ed   :  { %v722_v42 = vmul.f32 %v721_v37, %v1439_v24  ;;  %v686_v48 = vmul.f32 %v685_v41, %v1410_v62  ;;  %v675_v61 = vmul.f32 %v674_v45, %v1410_v62  ;;  %v638_v44 = vadd.f32 1.1283791, %v637_v58 }
 0x3ee   :  { %v1457_v46 = vmin.f32 %v747_v39, 16.0  ;;  %v712_v51 = vadd.f32 0.0036580483, %v711_v30  ;;  %v659_v13 = vand.u32 2147483647, %v649_v25  ;;  %vm655_vm15 = vweird.f32 %v649_v25 }
 0x3ef   :  { %v723_v49 = vadd.f32 0.014752088, %v722_v42  ;;  %v687_v56 = vadd.f32 0.4994258, %v686_v48  ;;  %v676_v16 = vadd.f32 0.18741608, %v675_v61  ;;  %v639_v26 = vmul.f32 %v638_v44, %v1374_v40 }
 0x3f0   :  { %v749_v52 = vmul.f32 2.1237322e-06, %v1457_v46  ;;  %v760_v53 = vmul.f32 3.8918573e-05, %v1457_v46  ;;  %v713_v9 = vmul.f32 %v712_v51, %v1439_v24  ;;  %v662_v21 = vor.u32 1.1754944e-38, %v661_v8 }
 0x3f1   :  { %v724_v57 = vmul.f32 %v723_v49, %v1439_v24  ;;  %v688_v63 = vmul.f32 %v687_v56, %v1410_v62  ;;  %vm660_vm3 = vcmp.eq.f32.partialorder %v659_v13, 8.507059e+37  ;;  %v677_v31 = vmul.f32 %v676_v16, %v1410_v62 }
 0x3f2   :  { %v968_v3 = vpop.eup %967  ;;  %v750_v2 = vadd.f32 0.00028619796, %v749_v52  ;;  %v761_v5 = vadd.f32 0.001143296, %v760_v53  ;;  %v714_v18 = vadd.f32 0.05243302, %v713_v9 }
 0x3f3   :  { %v651_v59 = vmul.f32 %v968_v3, %v649_v25  ;;  %v725_v4 = vadd.f32 0.112945676, %v724_v57  ;;  %v689_v11 = vadd.f32 1.0, %v688_v63  ;;  %vm656_vm14 = vweird.f32 %v968_v3  ;;  %v851_v53 = vld [vmem:[%s1546_s19 + $0x18] sm:$0xff] }
 0x3f4   :  { %v751_v10 = vmul.f32 %v750_v2, %v1457_v46  ;;  %v762_v15 = vmul.f32 %v761_v5, %v1457_v46  ;;  %vm657_vm2 = vmor %vm655_vm15, %vm656_vm14  ;;  %v715_v25 = vmul.f32 %v714_v18, %v1439_v24  ;;  %v619_v40 = vmul.f32 0.5, %v1368_v38  ;;  %876 = vmatpush.msra.mxu2 %v851_v53 }
 0x3f5   :  { %v652_v7 = vsub.f32 1.0, %v651_v59  ;;  %v726_v12 = vmul.f32 %v725_v4, %v1439_v24  ;;  %969 = vrcp.f32 %v689_v11  ;;  %v678_v42 = vadd.f32 1.1283791, %v677_v31 }
 0x3f6   :  { %v752_v22 = vadd.f32 0.0036580483, %v751_v10  ;;  %v763_v23 = vadd.f32 0.014752088, %v762_v15  ;;  %v716_v45 = vadd.f32 0.18741608, %v715_v25  ;;  %vm695_vm5 = vweird.f32 %v689_v11 }
 0x3f7   :  { %v653_v0 = vmul.f32 %v968_v3, %v652_v7  ;;  %v727_v19 = vadd.f32 0.4994258, %v726_v12  ;;  %v699_v51 = vand.u32 2147483647, %v689_v11  ;;  %v701_v52 = vand.u32 2147483648, %v689_v11 }
 0x3f8   :  { %v764_v32 = vmul.f32 %v763_v23, %v1457_v46  ;;  %v753_v37 = vmul.f32 %v752_v22, %v1457_v46  ;;  %v679_v61 = vmul.f32 %v678_v42, %v1398_v55  ;;  %v717_v2 = vmul.f32 %v716_v45, %v1439_v24 }
 0x3f9   :  { %v654_v17 = vadd.f32 %v968_v3, %v653_v0  ;;  %v728_v28 = vmul.f32 %v727_v19, %v1439_v24  ;;  %v702_v63 = vor.u32 1.1754944e-38, %v701_v52  ;;  %vm700_vm7 = vcmp.eq.f32.partialorder %v699_v51, 8.507059e+37 }
 0x3fa   :  { %v765_v30 = vadd.f32 0.112945676, %v764_v32  ;;  %v754_v49 = vadd.f32 0.05243302, %v753_v37  ;;  %v620_v16 = vmul.f32 0.5, %v1392_v50 }
 0x3fb   :  { %v658_v20 = vsel %vm657_vm2, %v968_v3, %v654_v17  ;;  %v729_v35 = vadd.f32 1.0, %v728_v28  ;;  %v970_v36 = vpop.eup %969 }
 0x3fc   :  { %v663_v29 = vsel %vm660_vm3, %v662_v21, %v658_v20  ;;  %v691_v41 = vmul.f32 %v970_v36, %v689_v11  ;;  %v766_v62 = vmul.f32 %v765_v30, %v1457_v46  ;;  %vm696_vm4 = vweird.f32 %v970_v36 }
 0x3fd   :  { %v664_v34 = vmul.f32 %v663_v29, %v639_v26  ;;  %971 = vrcp.f32 %v729_v35  ;;  %vm697_vm6 = vmor %vm695_vm5, %vm696_vm4  ;;  %v755_v5 = vmul.f32 %v754_v49, %v1457_v46  ;;  %v741_v15 = vand.u32 2147483648, %v729_v35  ;;  %v849_v49 = vld [vmem:[%s1546_s19 + $0x8] sm:$0xff] }
 0x3fe   :  { %v692_v48 = vsub.f32 1.0, %v691_v41  ;;  %v767_v57 = vadd.f32 0.4994258, %v766_v62  ;;  %v718_v11 = vadd.f32 1.1283791, %v717_v2  ;;  %vm735_vm9 = vweird.f32 %v729_v35  ;;  %v850_v62 = vld [vmem:[%s1546_s19 + $0x10] sm:$0xff] }
 0x3ff   :  { %v937_v39 = vclamps-f32 %v664_v34, 1.0  ;;  %v739_v0 = vand.u32 2147483647, %v729_v35  ;;  %v756_v55 = vadd.f32 0.18741608, %v755_v5  ;;  %v742_v18 = vor.u32 1.1754944e-38, %v741_v15  ;;  %877 = vmatpush.msra.mxu2 %v850_v62 }
 0x400   :  { %v693_v56 = vmul.f32 %v970_v36, %v692_v48  ;;  %v768_v59 = vmul.f32 %v767_v57, %v1457_v46  ;;  %v719_v19 = vmul.f32 %v718_v11, %v1426_v14  ;;  %v621_v34 = vmul.f32 0.5, %v1417_v1 }
 0x401   :  { %v787_v43 = vadd.f32 1.0, %v937_v39  ;;  %vm740_vm11 = vcmp.eq.f32.partialorder %v739_v0, 8.507059e+37  ;;  %v757_v23 = vmul.f32 %v756_v55, %v1457_v46  ;;  %v622_v1 = vmul.f32 0.5, %v1443_v27  ;;  %878 = vmatpush.msra.mxu2 %v849_v49  ;;  %v956_v27 = vld [vmem:[%s1544_s18] ss:$0 sm:$0xff] }
 0x402   :  { %v694_v38 = vadd.f32 %v970_v36, %v693_v56  ;;  %v769_v8 = vadd.f32 1.0, %v768_v59 }
 0x403   :  { %v791_v3 = vmul.f32 %v787_v43, %v619_v40  ;;  %v972_v58 = vpop.eup %971  ;;  %v758_v50 = vadd.f32 1.1283791, %v757_v23 }
 0x404   :  { %v731_v4 = vmul.f32 %v972_v58, %v729_v35  ;;  %v698_v7 = vsel %vm697_vm6, %v970_v36, %v694_v38  ;;  %973 = vrcp.f32 %v769_v8  ;;  %vm736_vm8 = vweird.f32 %v972_v58 }
 0x405   :  { %831 = vmatmul.f32.vlgmr.msra.gmra.mxu1 %v791_v3  ;;  %v703_v9 = vsel %vm700_vm7, %v702_v63, %v698_v7  ;;  %vm737_vm10 = vmor %vm735_vm9, %vm736_vm8  ;;  %v781_v25 = vand.u32 2147483648, %v769_v8  ;;  %v779_v14 = vand.u32 2147483647, %v769_v8  ;;  %vm775_vm13 = vweird.f32 %v769_v8 }
 0x406   :  { %v732_v10 = vsub.f32 1.0, %v731_v4  ;;  %v704_v12 = vmul.f32 %v703_v9, %v679_v61  ;;  %v759_v39 = vmul.f32 %v758_v50, %v1449_v33  ;;  %v848_v33 = vld [vmem:[%s1546_s19] sm:$0xff] }
 0x407   :  { %v782_v46 = vor.u32 1.1754944e-38, %v781_v25  ;;  %vm780_vm15 = vcmp.eq.f32.partialorder %v779_v14, 8.507059e+37  ;;  %879 = vmatpush.msra.mxu2 %v848_v33 }
 0x408   :  { %v733_v44 = vmul.f32 %v972_v58, %v732_v10  ;;  %v938_v13 = vclamps-f32 %v704_v12, 1.0 }
 0x40a   :  { %v734_v24 = vadd.f32 %v972_v58, %v733_v44  ;;  %v788_v17 = vadd.f32 1.0, %v938_v13  ;;  %v974_v22 = vpop.eup %973 }
 0x40b   :  { %v771_v29 = vmul.f32 %v974_v22, %v769_v8  ;;  %vm776_vm12 = vweird.f32 %v974_v22 }
 0x40c   :  { %v738_v21 = vsel %vm737_vm10, %v972_v58, %v734_v24  ;;  %v792_v26 = vmul.f32 %v788_v17, %v620_v16  ;;  %vm777_vm14 = vmor %vm775_vm13, %vm776_vm12 }
 0x40d   :  { %v743_v20 = vsel %vm740_vm11, %v742_v18, %v738_v21  ;;  %v772_v32 = vsub.f32 1.0, %v771_v29 }
 0x40e   :  { %v744_v28 = vmul.f32 %v743_v20, %v719_v19  ;;  %834 = vmatmul.f32.gmra.mxu1 %v792_v26 }
 0x40f   :  { %v773_v36 = vmul.f32 %v974_v22, %v772_v32 }
 0x410   :  { %v939_v31 = vclamps-f32 %v744_v28, 1.0 }
 0x411   :  { %v774_v30 = vadd.f32 %v974_v22, %v773_v36 }
 0x412   :  { %v789_v35 = vadd.f32 1.0, %v939_v31 }
 0x413   :  { %v778_v41 = vsel %vm777_vm14, %v974_v22, %v774_v30 }
 0x414   :  { %v793_v37 = vmul.f32 %v789_v35, %v621_v34  ;;  %v783_v40 = vsel %vm780_vm15, %v782_v46, %v778_v41 }
 0x415   :  { %v784_v42 = vmul.f32 %v783_v40, %v759_v39 }
 0x416   :  { %837 = vmatmul.f32.gmra.mxu1 %v793_v37 }
 0x417   :  { %v940_v43 = vclamps-f32 %v784_v42, 1.0 }
 0x419   :  { %v790_v45 = vadd.f32 1.0, %v940_v43 }
 0x41b   :  { %v794_v48 = vmul.f32 %v790_v45, %v622_v1 }
 0x41e   :  { %840 = vmatmul.f32.gmra.mxu1 %v794_v48 }
 0x482   :  { %v832_v51 = vpop.f32.mrf.mxu1 }
 0x483   :  { %v833_v52 = vadd.f32 %v956_v27, %v832_v51 }
 0x485   :  { %v844_v53 = vadd.f32 %v833_v52, %v1264_v47 }
 0x487   :  { %941 = vmatmul.msk.f32.vlgmr.msra.gmra.mxu2 %vm76_vm0, %v844_v53 }
 0x48b   :  { %v835_v3 = vpop.f32.mrf.mxu1 }
 0x48c   :  { %v836_v56 = vadd.f32 %v956_v27, %v835_v3 }
 0x48e   :  { %v845_v57 = vadd.f32 %v836_v56, %v1272_v54 }
 0x490   :  { %942 = vmatmul.msk.f32.gmra.mxu2 %vm76_vm0, %v845_v57 }
 0x493   :  { %v838_v58 = vpop.f32.mrf.mxu1 }
 0x494   :  { %v839_v38 = vadd.f32 %v956_v27, %v838_v58 }
 0x496   :  { %v846_v59 = vadd.f32 %v839_v38, %v1280_v60 }
 0x498   :  { %943 = vmatmul.msk.f32.gmra.mxu2 %vm76_vm0, %v846_v59 }
 0x49b   :  { %v841_v61 = vpop.f32.mrf.mxu1 }
 0x49c   :  { %v842_v2 = vadd.f32 %v956_v27, %v841_v61 }
 0x49e   :  { %v847_v63 = vadd.f32 %v842_v2, %v1288_v6 }
 0x4a0   :  { %944 = vmatmul.msk.f32.gmra.mxu2 %vm76_vm0, %v847_v63 }
 0x50a   :  { %v881_v47 = vpop.f32.mrf.mxu2 }
 0x50b   :  { %893 = vst.msk [vmem:[%s1547_s20] sm:$0xff] %vm250_vm1, %v881_v47 }
 0x513   :  { %v884_v54 = vpop.f32.mrf.mxu2 }
 0x514   :  { %894 = vst.msk [vmem:[%s1547_s20 + $0x8] sm:$0xff] %vm250_vm1, %v884_v54 }
 0x51b   :  { %v887_v60 = vpop.f32.mrf.mxu2 }
 0x51c   :  { %895 = vst.msk [vmem:[%s1547_s20 + $0x10] sm:$0xff] %vm250_vm1, %v887_v60 }
 0x523   :  { %v890_v6 = vpop.f32.mrf.mxu2 }
 0x524   :  { %896 = vst.msk [vmem:[%s1547_s20 + $0x18] sm:$0xff] %vm250_vm1, %v890_v6 }

// kernel: afnonet_forward.4
= control target key start
LH: loop header
LB: loop body
LE: loop exit
PB: predicated region body
PF: predicated region fallthrough
CT: control target
= control target key end

     0   :  { %vm81_vm0 = vcmask 261120   ;;  %vm255_vm1 = vcmask 523264   ;;  %vm373_vm13 = vcmask 195584   ;;  %s1667_s1 = inlined_call_operand.vmem [shape: f32[32,32], index: 1, kind: input, shape index: {}]   ;;  %s1668_s7 = inlined_call_operand.vmem [shape: f32[32,64], index: 7, kind: input, shape index: {}]   ;;  %s1669_s2 = inlined_call_operand.vmem [shape: f32[24,32], index: 2, kind: input, shape index: {}]   ;;  %s1670_s3 = inlined_call_operand.vmem [shape: f32[24,32], index: 3, kind: input, shape index: {}]   ;;  %s1671_s6 = inlined_call_operand.vmem [shape: f32[32,64], index: 6, kind: input, shape index: {}]   ;;  %s1672_s9 = inlined_call_operand.vmem [shape: f32[64,32], index: 9, kind: input, shape index: {}]   ;;  %s1673_s10 = inlined_call_operand.vmem [shape: f32[64,32], index: 10, kind: input, shape index: {}]   ;;  %s1674_s8 = inlined_call_operand.vmem [shape: f32[1,64], index: 8, kind: input, shape index: {}]   ;;  %s1675_s11 = inlined_call_operand.vmem [shape: f32[1,32], index: 11, kind: input, shape index: {}]   ;;  %s1676_s12 = inlined_call_operand.vmem [shape: f32[1,32], index: 12, kind: input, shape index: {}]   ;;  %s1677_s5 = inlined_call_operand.vmem [shape: f32[32,24], index: 5, kind: input, shape index: {}]   ;;  %s1678_s4 = inlined_call_operand.vmem [shape: f32[32,24], index: 4, kind: input, shape index: {}]   ;;  %s1679_s0 = inlined_call_operand.vmem [shape: f32[32,32], index: 0, kind: input, shape index: {}]   ;;  %s1680_s13 = inlined_call_operand.vmem [shape: f32[1,32], index: 13, kind: input, shape index: {}]   ;;  %s1681_s14 = inlined_call_operand.vmem [shape: f32[1,32], index: 14, kind: input, shape index: {}]   ;;  %s1682_s16 = inlined_call_operand.vmem [shape: f32[1,128], index: 16, kind: input, shape index: {}]   ;;  %s1683_s15 = inlined_call_operand.vmem [shape: f32[32,128], index: 15, kind: input, shape index: {}]   ;;  %s1684_s18 = inlined_call_operand.vmem [shape: f32[1,32], index: 18, kind: input, shape index: {}]   ;;  %s1685_s17 = inlined_call_operand.vmem [shape: f32[128,32], index: 17, kind: input, shape index: {}]   ;;  %s1686_s21 = inlined_call_operand.vmem [shape: f32[32,32], index: 21, kind: output, shape index: {0}]   ;;  %s1687_s19 = inlined_call_operand.vmem [shape: f32[1,32], index: 19, kind: input, shape index: {}]   ;;  %s1688_s20 = inlined_call_operand.vmem [shape: f32[1,32], index: 20, kind: input, shape index: {}]   ;;  %s1689_s22 = inlined_call_operand.vmem [shape: f32[32,32], index: 22, kind: output, shape index: {1}]  }
   0x1   :  { %1697 = sst [smem:[#allocation2_spill]] %s1667_s1  ;;  %v1034_v40 = vld [vmem:[%s1674_s8] ss:$0 sm:$0xff] }
   0x2   :  { %1698 = sst [smem:[#allocation3_spill]] %s1668_s7  ;;  %v1036_v58 = vld [vmem:[%s1676_s12] ss:$0 sm:$0xff] }
   0x3   :  { %1699 = sst [smem:[#allocation4_spill]] %s1669_s2  ;;  %v1035_v61 = vld [vmem:[%s1675_s11] ss:$0 sm:$0xff] }
   0x4   :  { %1700 = sst [smem:[#allocation5_spill]] %s1670_s3 }
   0x5   :  { %1701 = sst [smem:[#allocation6_spill]] %s1671_s6 }
   0x6   :  { %1702 = sst [smem:[#allocation7_spill]] %s1672_s9 }
   0x7   :  { %1703 = sst [smem:[#allocation8_spill]] %s1673_s10 }
   0x8   :  { %s1704_s29 = sld [smem:[#allocation2_spill]] }
   0x9   :  { %s1705_s24 = sld [smem:[#allocation3_spill]] }
   0xa   :  { %s1706_s28 = sld [smem:[#allocation4_spill]] }
   0xb   :  { %s1708_s26 = sld [smem:[#allocation6_spill]] }
   0xc   :  { %s1709_s6 = sld [smem:[#allocation7_spill]] }
   0xd   :  { %s1710_s7 = sld [smem:[#allocation8_spill]] }
   0xe   :  { %v1188_v0 = vld [vmem:[%s1704_s29 + $0x18] sm:$0xff]  ;;  %v1193_v1 = vld [vmem:[%s1704_s29 + $0x10] sm:$0xff]  ;;  %v1200_v2 = vld [vmem:[%s1704_s29 + $0x8] sm:$0xff] }
   0xf   :  { %103 = vmatpush.msra.mxu0 %v1188_v0  ;;  %141 = vmatpush.msra.mxu1 %v1188_v0  ;;  %v162_v3 = vld [vmem:[%s1705_s24 + $0x18] sm:$0xff]  ;;  %v1211_v4 = vld [vmem:[%s1704_s29] sm:$0xff]  ;;  %v161_v5 = vld [vmem:[%s1705_s24 + $0x10] sm:$0xff]  ;;  %s1707_s29 = sld [smem:[#allocation5_spill]] }
  0x10   :  { %1013 = vmatpush.msra.mxu3 %v1188_v0  ;;  %184 = vmatpush.msra.mxu2 %v162_v3  ;;  %v78_v6 = vld [vmem:[%s1706_s28] sm:$0xff]  ;;  %v160_v8 = vld [vmem:[%s1705_s24 + $0x8] sm:$0xff]  ;;  %v80_v9 = vld [vmem:[%s1706_s28 + $0x10] sm:$0xff] }
  0x11   :  { %104 = vmatpush.msra.mxu0 %v1193_v1  ;;  %142 = vmatpush.msra.mxu1 %v1193_v1  ;;  %v158_v10 = vld [vmem:[%s1708_s26 + $0x18] sm:$0xff]  ;;  %v157_v11 = vld [vmem:[%s1708_s26 + $0x10] sm:$0xff]  ;;  %v156_v12 = vld [vmem:[%s1708_s26 + $0x8] sm:$0xff] }
  0x12   :  { %1014 = vmatpush.msra.mxu3 %v1193_v1  ;;  %185 = vmatpush.msra.mxu2 %v161_v5  ;;  %v79_v13 = vld [vmem:[%s1706_s28 + $0x8] sm:$0xff]  ;;  %v159_v16 = vld [vmem:[%s1705_s24] sm:$0xff]  ;;  %v250_v18 = vld [vmem:[%s1709_s6 + $0x38] sm:$0xff] }
  0x13   :  { %105 = vmatpush.msra.mxu0 %v1200_v2  ;;  %143 = vmatpush.msra.mxu1 %v1200_v2  ;;  %v155_v17 = vld [vmem:[%s1708_s26] sm:$0xff]  ;;  %v298_v19 = vld [vmem:[%s1710_s7 + $0x38] sm:$0xff]  ;;  %v249_v20 = vld [vmem:[%s1709_s6 + $0x30] sm:$0xff] }
  0x14   :  { %1015 = vmatpush.msra.mxu3 %v1200_v2  ;;  %186 = vmatpush.msra.mxu2 %v160_v8  ;;  %v297_v21 = vld [vmem:[%s1710_s7 + $0x30] sm:$0xff]  ;;  %v248_v22 = vld [vmem:[%s1709_s6 + $0x28] sm:$0xff]  ;;  %v247_v24 = vld [vmem:[%s1709_s6 + $0x20] sm:$0xff] }
  0x15   :  { %v117_v7 = vld [vmem:[%s1707_s29] sm:$0xff]  ;;  %106 = vmatpush.msra.mxu0 %v1211_v4  ;;  %144 = vmatpush.msra.mxu1 %v1211_v4  ;;  %v118_v14 = vld [vmem:[%s1707_s29 + $0x8] sm:$0xff]  ;;  %v119_v15 = vld [vmem:[%s1707_s29 + $0x10] sm:$0xff] }
  0x16   :  { %973 = vmatmul.msk.f32.vlgmr.msra.gmra.mxu0 %vm81_vm0, %v78_v6  ;;  %976 = vmatmul.msk.f32.vlgmr.msra.gmra.mxu1 %vm81_vm0, %v117_v7  ;;  %v296_v23 = vld [vmem:[%s1710_s7 + $0x28] sm:$0xff]  ;;  %v295_v25 = vld [vmem:[%s1710_s7 + $0x20] sm:$0xff]  ;;  %v246_v32 = vld [vmem:[%s1709_s6 + $0x18] sm:$0xff] }
  0x17   :  { %1016 = vmatpush.msra.mxu3 %v1211_v4  ;;  %187 = vmatpush.msra.mxu2 %v159_v16  ;;  %v294_v33 = vld [vmem:[%s1710_s7 + $0x18] sm:$0xff]  ;;  %v245_v34 = vld [vmem:[%s1709_s6 + $0x10] sm:$0xff]  ;;  %v244_v36 = vld [vmem:[%s1709_s6 + $0x8] sm:$0xff] }
  0x18   :  { %975 = vmatmul.msk.f32.vlgmr.msra.gmra.mxu3 %vm81_vm0, %v80_v9  ;;  %273 = vmatpush.msrb.mxu0 %v250_v18  ;;  %v293_v35 = vld [vmem:[%s1710_s7 + $0x10] sm:$0xff]  ;;  %v292_v37 = vld [vmem:[%s1710_s7 + $0x8] sm:$0xff]  ;;  %v243_v38 = vld [vmem:[%s1709_s6] sm:$0xff] }
  0x19   :  { %219 = vmatpush.msrb.mxu3 %v158_v10  ;;  %311 = vmatpush.msrb.mxu1 %v298_v19  ;;  %v291_v39 = vld [vmem:[%s1710_s7] sm:$0xff] }
  0x1a   :  { %274 = vmatpush.msrb.mxu0 %v249_v20 }
  0x1b   :  { %220 = vmatpush.msrb.mxu3 %v157_v11  ;;  %312 = vmatpush.msrb.mxu1 %v297_v21 }
  0x1c   :  { %275 = vmatpush.msrb.mxu0 %v248_v22 }
  0x1d   :  { %221 = vmatpush.msrb.mxu3 %v156_v12  ;;  %313 = vmatpush.msrb.mxu1 %v296_v23 }
  0x1e   :  { %974 = vmatmul.msk.f32.gmra.mxu0 %vm81_vm0, %v79_v13  ;;  %977 = vmatmul.msk.f32.gmra.mxu1 %vm81_vm0, %v118_v14 }
  0x1f   :  { %222 = vmatpush.msrb.mxu3 %v155_v17  ;;  %276 = vmatpush.msrb.mxu0 %v247_v24 }
  0x20   :  { %314 = vmatpush.msrb.mxu1 %v295_v25 }
  0x21   :  { %277 = vmatpush.msrb.mxu0 %v246_v32  ;;  %v369_v32 = vld [vmem:[%s1677_s5] sm:$0xff] }
  0x22   :  { %315 = vmatpush.msrb.mxu1 %v294_v33 }
  0x23   :  { %278 = vmatpush.msrb.mxu0 %v245_v34  ;;  %v365_v34 = vld [vmem:[%s1678_s4] sm:$0xff] }
  0x24   :  { %316 = vmatpush.msrb.mxu1 %v293_v35 }
  0x25   :  { %279 = vmatpush.msrb.mxu0 %v244_v36  ;;  %v370_v36 = vld [vmem:[%s1677_s5 + $0x8] sm:$0xff] }
  0x26   :  { %978 = vmatmul.msk.f32.gmra.mxu1 %vm81_vm0, %v119_v15 }
  0x27   :  { %317 = vmatpush.msrb.mxu1 %v292_v37  ;;  %280 = vmatpush.msrb.mxu0 %v243_v38  ;;  %v366_v37 = vld [vmem:[%s1678_s4 + $0x8] sm:$0xff]  ;;  %v371_v38 = vld [vmem:[%s1677_s5 + $0x10] sm:$0xff] }
  0x29   :  { %318 = vmatpush.msrb.mxu1 %v291_v39  ;;  %v367_v39 = vld [vmem:[%s1678_s4 + $0x10] sm:$0xff] }
  0x93   :  { %v108_v26 = vpop.f32.mrf.mxu0  ;;  %v146_v27 = vpop.f32.mrf.mxu1 }
  0x94   :  { %979 = vmatmul.msk.f32.vlgmr.msra.gmra.mxu2 %vm81_vm0, %v146_v27  ;;  %982 = vmatmul.msk.f32.vlgmr.msrb.gmra.mxu3 %vm81_vm0, %v108_v26 }
  0x9b   :  { %v111_v28 = vpop.f32.mrf.mxu0  ;;  %v149_v29 = vpop.f32.mrf.mxu1 }
  0x9c   :  { %980 = vmatmul.msk.f32.gmra.mxu2 %vm81_vm0, %v149_v29  ;;  %983 = vmatmul.msk.f32.gmra.mxu3 %vm81_vm0, %v111_v28  ;;  %v114_v30 = vpop.f32.mrf.mxu3 }
  0xa3   :  { %v152_v31 = vpop.f32.mrf.mxu1 }
  0xa4   :  { %981 = vmatmul.msk.f32.gmra.mxu2 %vm81_vm0, %v152_v31  ;;  %984 = vmatmul.msk.f32.gmra.mxu3 %vm81_vm0, %v114_v30 }
 0x117   :  { %v189_v41 = vpop.f32.mrf.mxu2  ;;  %v224_v42 = vpop.f32.mrf.mxu3 }
 0x118   :  { %v225_v43 = vadd.f32 %v224_v42, %v189_v41  ;;  %v368_v41 = vld [vmem:[%s1678_s4 + $0x18] sm:$0xff] }
 0x11a   :  { %v237_v44 = vadd.f32 %v1034_v40, %v225_v43 }
 0x11c   :  { %v240_v45 = vmax.f32 %v237_v44, 0.0 }
 0x11e   :  { %985 = vmatmul.msk.f32.vlgmr.msrb.gmra.mxu0 %vm255_vm1, %v240_v45  ;;  %988 = vmatmul.msk.f32.vlgmr.msrb.gmra.mxu1 %vm255_vm1, %v240_v45  ;;  %v70_v45 = vld [vmem:[%s1679_s0] sm:$0xff] }
 0x11f   :  { %v192_v46 = vpop.f32.mrf.mxu2  ;;  %v227_v47 = vpop.f32.mrf.mxu3 }
 0x120   :  { %v228_v48 = vadd.f32 %v227_v47, %v192_v46 }
 0x122   :  { %v238_v49 = vadd.f32 %v1034_v40, %v228_v48 }
 0x124   :  { %v241_v50 = vmax.f32 %v238_v49, 0.0 }
 0x126   :  { %986 = vmatmul.msk.f32.gmra.mxu0 %vm255_vm1, %v241_v50  ;;  %989 = vmatmul.msk.f32.gmra.mxu1 %vm255_vm1, %v241_v50 }
 0x127   :  { %v195_v51 = vpop.f32.mrf.mxu2  ;;  %v230_v52 = vpop.f32.mrf.mxu3 }
 0x128   :  { %v231_v53 = vadd.f32 %v230_v52, %v195_v51  ;;  %v71_v52 = vld [vmem:[%s1679_s0 + $0x8] sm:$0xff] }
 0x12a   :  { %v239_v54 = vadd.f32 %v1034_v40, %v231_v53  ;;  %v372_v40 = vld [vmem:[%s1677_s5 + $0x18] sm:$0xff] }
 0x12c   :  { %v242_v55 = vmax.f32 %v239_v54, 0.0 }
 0x12e   :  { %987 = vmatmul.msk.f32.gmra.mxu0 %vm255_vm1, %v242_v55  ;;  %990 = vmatmul.msk.f32.gmra.mxu1 %vm255_vm1, %v242_v55 }
 0x19b   :  { %v282_v56 = vpop.f32.mrf.mxu0  ;;  %v320_v57 = vpop.f32.mrf.mxu1 }
 0x19c   :  { %v321_v62 = vadd.f32 %v1036_v58, %v320_v57  ;;  %v283_v63 = vadd.f32 %v1035_v61, %v282_v56 }
 0x19e   :  { %v994_v8 = vadd.f32 -0.01, %v321_v62  ;;  %vm353_vm2 = vcmp.lt.f32.partialorder %v321_v62, -0.01  ;;  %v356_v11 = vadd.f32 0.01, %v321_v62 }
 0x19f   :  { %vm335_vm3 = vcmp.lt.f32.partialorder %v283_v63, -0.01  ;;  %v338_v13 = vadd.f32 0.01, %v283_v63  ;;  %v991_v28 = vadd.f32 -0.01, %v283_v63 }
 0x1a0   :  { %v359_v27 = vsel %vm353_vm2, %v356_v11, 0.0  ;;  %vm347_vm12 = vcmp.gt.f32.partialorder %v321_v62, 0.01  ;;  %vm329_vm14 = vcmp.gt.f32.partialorder %v283_v63, 0.01 }
 0x1a1   :  { %v341_v30 = vsel %vm335_vm3, %v338_v13, 0.0  ;;  %v362_v33 = vsel %vm347_vm12, %v994_v8, %v359_v27 }
 0x1a2   :  { %v344_v35 = vsel %vm329_vm14, %v991_v28, %v341_v30 }
 0x1a3   :  { %v285_v59 = vpop.f32.mrf.mxu0  ;;  %v323_v60 = vpop.f32.mrf.mxu1 }
 0x1a4   :  { %v324_v3 = vadd.f32 %v1036_v58, %v323_v60  ;;  %v286_v5 = vadd.f32 %v1035_v61, %v285_v59 }
 0x1a6   :  { %vm354_vm4 = vcmp.lt.f32.partialorder %v324_v3, -0.01  ;;  %v357_v12 = vadd.f32 0.01, %v324_v3  ;;  %v339_v15 = vadd.f32 0.01, %v286_v5 }
 0x1a7   :  { %vm336_vm6 = vcmp.lt.f32.partialorder %v286_v5, -0.01  ;;  %v995_v19 = vadd.f32 -0.01, %v324_v3  ;;  %v992_v22 = vadd.f32 -0.01, %v286_v5 }
 0x1a8   :  { %v360_v21 = vsel %vm354_vm4, %v357_v12, 0.0  ;;  %v342_v25 = vsel %vm336_vm6, %v339_v15, 0.0  ;;  %vm348_vm10 = vcmp.gt.f32.partialorder %v324_v3, 0.01  ;;  %vm330_vm11 = vcmp.gt.f32.partialorder %v286_v5, 0.01 }
 0x1a9   :  { %v363_v29 = vsel %vm348_vm10, %v995_v19, %v360_v21  ;;  %v345_v31 = vsel %vm330_vm11, %v992_v22, %v342_v25  ;;  %v73_v3 = vld [vmem:[%s1679_s0 + $0x18] sm:$0xff] }
 0x1ab   :  { %v288_v6 = vpop.f32.mrf.mxu0  ;;  %v326_v7 = vpop.f32.mrf.mxu1 }
 0x1ac   :  { %v289_v9 = vadd.f32 %v1035_v61, %v288_v6  ;;  %v327_v10 = vadd.f32 %v1036_v58, %v326_v7  ;;  %v72_v58 = vld [vmem:[%s1679_s0 + $0x10] sm:$0xff]  ;;  %v1069_v7 = vmov 32.0  }
 0x1ad   :  { %1043 = vrcp.f32 %v1069_v7 }
 0x1ae   :  { %v996_v14 = vadd.f32 -0.01, %v327_v10  ;;  %vm355_vm5 = vcmp.lt.f32.partialorder %v327_v10, -0.01  ;;  %v358_v16 = vadd.f32 0.01, %v327_v10 }
 0x1af   :  { %v993_v17 = vadd.f32 -0.01, %v289_v9  ;;  %vm337_vm7 = vcmp.lt.f32.partialorder %v289_v9, -0.01  ;;  %v340_v18 = vadd.f32 0.01, %v289_v9 }
 0x1b0   :  { %vm349_vm8 = vcmp.gt.f32.partialorder %v327_v10, 0.01  ;;  %v361_v20 = vsel %vm355_vm5, %v358_v16, 0.0  ;;  %vm331_vm9 = vcmp.gt.f32.partialorder %v289_v9, 0.01 }
 0x1b1   :  { %v364_v23 = vsel %vm349_vm8, %v996_v14, %v361_v20  ;;  %v343_v24 = vsel %vm337_vm7, %v340_v18, 0.0 }
 0x1b2   :  { %399 = vmatpush.msrb.mxu2 %v364_v23  ;;  %v346_v26 = vsel %vm331_vm9, %v993_v17, %v343_v24 }
 0x1b3   :  { %440 = vmatpush.msra.mxu3 %v346_v26  ;;  %v1044_v8 = vpop.eup %1043 }
 0x1b4   :  { %400 = vmatpush.msrb.mxu2 %v363_v29  ;;  %v479_v9 = vmul.f32 32.0, %v1044_v8  ;;  %vm483_vm15 = vweird.f32 %v1044_v8 }
 0x1b5   :  { %441 = vmatpush.msra.mxu3 %v345_v31 }
 0x1b6   :  { %401 = vmatpush.msrb.mxu2 %v362_v33  ;;  %v480_v10 = vsub.f32 1.0, %v479_v9  ;;  %v578_v33 = vld [vmem:[%s1683_s15 + $0x18] sm:$0xff] }
 0x1b7   :  { %442 = vmatpush.msra.mxu3 %v344_v35  ;;  %997 = vmatmul.msk.f32.vlgmr.msrb.gmra.mxu2 %vm373_vm13, %v369_v32  ;;  %v576_v35 = vld [vmem:[%s1683_s15 + $0x8] sm:$0xff] }
 0x1b8   :  { %1001 = vmatmul.msk.f32.vlgmr.msra.gmra.mxu3 %vm373_vm13, %v365_v34  ;;  %v481_v11 = vmul.f32 %v1044_v8, %v480_v10  ;;  %607 = vmatpush.msra.mxu0 %v578_v33  ;;  %v577_v34 = vld [vmem:[%s1683_s15 + $0x10] sm:$0xff] }
 0x1ba   :  { %v482_v12 = vadd.f32 %v1044_v8, %v481_v11  ;;  %608 = vmatpush.msra.mxu0 %v577_v34  ;;  %v814_v34 = vld [vmem:[%s1685_s17 + $0x70] sm:$0xff] }
 0x1bc   :  { %v1400_v13 = vsel %vm483_vm15, %v1044_v8, %v482_v12  ;;  %609 = vmatpush.msra.mxu0 %v576_v35  ;;  %v813_v35 = vld [vmem:[%s1685_s17 + $0x68] sm:$0xff] }
 0x1bf   :  { %998 = vmatmul.msk.f32.gmra.mxu2 %vm373_vm13, %v370_v36  ;;  %v575_v36 = vld [vmem:[%s1683_s15] sm:$0xff] }
 0x1c0   :  { %1002 = vmatmul.msk.f32.gmra.mxu3 %vm373_vm13, %v366_v37  ;;  %610 = vmatpush.msra.mxu0 %v575_v36  ;;  %v812_v36 = vld [vmem:[%s1685_s17 + $0x60] sm:$0xff] }
 0x1c7   :  { %999 = vmatmul.msk.f32.gmra.mxu2 %vm373_vm13, %v371_v38 }
 0x1c8   :  { %1003 = vmatmul.msk.f32.gmra.mxu3 %vm373_vm13, %v367_v39 }
 0x1cf   :  { %1000 = vmatmul.msk.f32.gmra.mxu2 %vm373_vm13, %v372_v40 }
 0x1d0   :  { %1004 = vmatmul.msk.f32.gmra.mxu3 %vm373_vm13, %v368_v41 }
 0x23a   :  { %v403_v42 = vpop.f32.mrf.mxu2 }
 0x23b   :  { %v444_v43 = vpop.f32.mrf.mxu3 }
 0x23c   :  { %v445_v44 = vadd.f32 %v444_v43, %v403_v42 }
 0x23e   :  { %v456_v46 = vadd.f32 %v445_v44, %v1211_v4 }
 0x240   :  { %v1372_v47 = vadd.f32 %v456_v46, %v70_v45 }
 0x242   :  { %v406_v48 = vpop.f32.mrf.mxu2  ;;  %v466_v49 = vsel %vm81_vm0, %v1372_v47, 0.0 }
 0x243   :  { %v447_v50 = vpop.f32.mrf.mxu3  ;;  %467 = vadd.xlane.f32.xlu0 %v466_v49 }
 0x244   :  { %v448_v51 = vadd.f32 %v447_v50, %v406_v48 }
 0x246   :  { %v457_v53 = vadd.f32 %v448_v51, %v1200_v2 }
 0x248   :  { %v1380_v54 = vadd.f32 %v457_v53, %v71_v52 }
 0x24a   :  { %v409_v55 = vpop.f32.mrf.mxu2  ;;  %v469_v4 = vsel %vm81_vm0, %v1380_v54, 0.0 }
 0x24b   :  { %v450_v56 = vpop.f32.mrf.mxu3  ;;  %470 = vadd.xlane.f32.xlu0 %v469_v4  ;;  %v1037_v4 = vld [vmem:[%s1680_s13] ss:$0 sm:$0xff] }
 0x24c   :  { %v451_v57 = vadd.f32 %v450_v56, %v409_v55 }
 0x24e   :  { %v458_v59 = vadd.f32 %v451_v57, %v1193_v1 }
 0x250   :  { %v1388_v60 = vadd.f32 %v458_v59, %v72_v58  ;;  %v1038_v59 = vld [vmem:[%s1681_s14] ss:$0 sm:$0xff] }
 0x252   :  { %v412_v61 = vpop.f32.mrf.mxu2  ;;  %v472_v2 = vsel %vm81_vm0, %v1388_v60, 0.0 }
 0x253   :  { %v453_v62 = vpop.f32.mrf.mxu3  ;;  %473 = vadd.xlane.f32.xlu1 %v472_v2 }
 0x254   :  { %v454_v63 = vadd.f32 %v453_v62, %v412_v61 }
 0x256   :  { %v459_v5 = vadd.f32 %v454_v63, %v1188_v0 }
 0x258   :  { %v1396_v6 = vadd.f32 %v459_v5, %v73_v3 }
 0x25a   :  { %v475_v1 = vsel %vm81_vm0, %v1396_v6, 0.0 }
 0x25b   :  { %476 = vadd.xlane.f32.xlu1 %v475_v1 }
 0x2b6   :  { %v468_v14 = vpop.xlane.xlu0 %467 }
 0x2b7   :  { %v485_v15 = vmul.f32 %v1400_v13, %v468_v14 }
 0x2b9   :  { %v489_v0 = vsub.f32 %v1372_v47, %v485_v15 }
 0x2bb   :  { %v493_v16 = vmul.f32 %v489_v0, %v489_v0 }
 0x2bd   :  { %v497_v17 = vsel %vm81_vm0, %v493_v16, 0.0 }
 0x2be   :  { %498 = vadd.xlane.f32.xlu2 %v497_v17  ;;  %v471_v18 = vpop.xlane.xlu0 %470 }
 0x2bf   :  { %v486_v19 = vmul.f32 %v1400_v13, %v471_v18 }
 0x2c1   :  { %v1407_v20 = vsub.f32 %v1380_v54, %v486_v19 }
 0x2c3   :  { %v494_v21 = vmul.f32 %v1407_v20, %v1407_v20 }
 0x2c5   :  { %v500_v22 = vsel %vm81_vm0, %v494_v21, 0.0 }
 0x2c6   :  { %v474_v23 = vpop.xlane.xlu1 %473  ;;  %501 = vadd.xlane.f32.xlu2 %v500_v22 }
 0x2c7   :  { %v487_v24 = vmul.f32 %v1400_v13, %v474_v23 }
 0x2c9   :  { %v1414_v25 = vsub.f32 %v1388_v60, %v487_v24 }
 0x2cb   :  { %v495_v26 = vmul.f32 %v1414_v25, %v1414_v25 }
 0x2cd   :  { %v503_v27 = vsel %vm81_vm0, %v495_v26, 0.0 }
 0x2ce   :  { %v477_v28 = vpop.xlane.xlu1 %476  ;;  %504 = vadd.xlane.f32.xlu0 %v503_v27 }
 0x2cf   :  { %v488_v29 = vmul.f32 %v1400_v13, %v477_v28 }
 0x2d1   :  { %v1421_v30 = vsub.f32 %v1396_v6, %v488_v29 }
 0x2d3   :  { %v496_v31 = vmul.f32 %v1421_v30, %v1421_v30 }
 0x2d5   :  { %v506_v32 = vsel %vm81_vm0, %v496_v31, 0.0 }
 0x2d6   :  { %507 = vadd.xlane.f32.xlu1 %v506_v32 }
 0x331   :  { %v499_v37 = vpop.xlane.xlu2 %498 }
 0x332   :  { %v509_v38 = vmul.f32 %v499_v37, %v1400_v13 }
 0x334   :  { %v513_v39 = vadd.f32 1e-06, %v509_v38 }
 0x336   :  { %1045 = vrsqrt.f32 %v513_v39  ;;  %vm523_vm2 = vweird.f32 %v513_v39 }
 0x339   :  { %v502_v40 = vpop.xlane.xlu2 %501 }
 0x33a   :  { %v510_v41 = vmul.f32 %v502_v40, %v1400_v13 }
 0x33c   :  { %v1046_v42 = vpop.eup %1045  ;;  %v514_v43 = vadd.f32 1e-06, %v510_v41  ;;  %v810_v41 = vld [vmem:[%s1685_s17 + $0x50] sm:$0xff] }
 0x33d   :  { %v518_v44 = vmul.f32 %v1046_v42, %v513_v39  ;;  %vm524_vm1 = vweird.f32 %v1046_v42  ;;  %v811_v39 = vld [vmem:[%s1685_s17 + $0x58] sm:$0xff] }
 0x33e   :  { %1047 = vrsqrt.f32 %v514_v43  ;;  %vm525_vm3 = vmor %vm523_vm2, %vm524_vm1  ;;  %vm533_vm5 = vweird.f32 %v514_v43 }
 0x33f   :  { %v519_v45 = vmul.f32 %v1046_v42, %v518_v44 }
 0x341   :  { %v520_v46 = vmul.f32 0.5, %v519_v45  ;;  %v505_v48 = vpop.xlane.xlu0 %504  ;;  %v808_v45 = vld [vmem:[%s1685_s17 + $0x40] sm:$0xff] }
 0x342   :  { %v511_v49 = vmul.f32 %v505_v48, %v1400_v13 }
 0x343   :  { %v521_v50 = vsub.f32 1.5, %v520_v46 }
 0x344   :  { %v1048_v51 = vpop.eup %1047  ;;  %v515_v52 = vadd.f32 1e-06, %v511_v49 }
 0x345   :  { %v522_v53 = vmul.f32 %v1046_v42, %v521_v50  ;;  %v528_v55 = vmul.f32 %v1048_v51, %v514_v43  ;;  %vm534_vm4 = vweird.f32 %v1048_v51  ;;  %v809_v43 = vld [vmem:[%s1685_s17 + $0x48] sm:$0xff] }
 0x346   :  { %1049 = vrsqrt.f32 %v515_v52  ;;  %vm535_vm6 = vmor %vm533_vm5, %vm534_vm4  ;;  %vm543_vm8 = vweird.f32 %v515_v52 }
 0x347   :  { %v526_v56 = vsel %vm525_vm3, %v1046_v42, %v522_v53  ;;  %v529_v57 = vmul.f32 %v1048_v51, %v528_v55  ;;  %v806_v55 = vld [vmem:[%s1685_s17 + $0x30] sm:$0xff] }
 0x348   :  { %v557_v58 = vmul.f32 %v526_v56, %v489_v0 }
 0x349   :  { %v530_v61 = vmul.f32 0.5, %v529_v57  ;;  %v508_v2 = vpop.xlane.xlu1 %507 }
 0x34a   :  { %v564_v62 = vmul.f32 %v1037_v4, %v557_v58  ;;  %v512_v63 = vmul.f32 %v508_v2, %v1400_v13  ;;  %v805_v58 = vld [vmem:[%s1685_s17 + $0x28] sm:$0xff]  ;;  %v804_v2 = vld [vmem:[%s1685_s17 + $0x20] sm:$0xff] }
 0x34b   :  { %v531_v3 = vsub.f32 1.5, %v530_v61 }
 0x34c   :  { %v1050_v5 = vpop.eup %1049  ;;  %v516_v1 = vadd.f32 1e-06, %v512_v63  ;;  %v571_v7 = vadd.f32 %v1038_v59, %v564_v62 }
 0x34d   :  { %v532_v8 = vmul.f32 %v1048_v51, %v531_v3  ;;  %v538_v9 = vmul.f32 %v1050_v5, %v515_v52  ;;  %vm544_vm7 = vweird.f32 %v1050_v5 }
 0x34e   :  { %1051 = vrsqrt.f32 %v516_v1  ;;  %1005 = vmatmul.msk.f32.vlgmr.msra.gmra.mxu0 %vm81_vm0, %v571_v7  ;;  %vm545_vm9 = vmor %vm543_vm8, %vm544_vm7  ;;  %vm553_vm11 = vweird.f32 %v516_v1  ;;  %v803_v7 = vld [vmem:[%s1685_s17 + $0x18] sm:$0xff] }
 0x34f   :  { %v536_v10 = vsel %vm535_vm6, %v1048_v51, %v532_v8  ;;  %v539_v11 = vmul.f32 %v1050_v5, %v538_v9  ;;  %v807_v51 = vld [vmem:[%s1685_s17 + $0x38] sm:$0xff] }
 0x350   :  { %v558_v12 = vmul.f32 %v536_v10, %v1407_v20 }
 0x351   :  { %v540_v14 = vmul.f32 0.5, %v539_v11  ;;  %v802_v11 = vld [vmem:[%s1685_s17 + $0x10] sm:$0xff] }
 0x352   :  { %v565_v15 = vmul.f32 %v1037_v4, %v558_v12 }
 0x353   :  { %v541_v0 = vsub.f32 1.5, %v540_v14 }
 0x354   :  { %v1052_v16 = vpop.eup %1051  ;;  %v572_v17 = vadd.f32 %v1038_v59, %v565_v15 }
 0x355   :  { %v542_v18 = vmul.f32 %v1050_v5, %v541_v0  ;;  %v548_v19 = vmul.f32 %v1052_v16, %v516_v1  ;;  %vm554_vm10 = vweird.f32 %v1052_v16 }
 0x356   :  { %1006 = vmatmul.msk.f32.gmra.mxu0 %vm81_vm0, %v572_v17  ;;  %vm555_vm12 = vmor %vm553_vm11, %vm554_vm10  ;;  %v801_v17 = vld [vmem:[%s1685_s17 + $0x8] sm:$0xff] }
 0x357   :  { %v546_v21 = vsel %vm545_vm9, %v1050_v5, %v542_v18  ;;  %v549_v22 = vmul.f32 %v1052_v16, %v548_v19 }
 0x358   :  { %v559_v23 = vmul.f32 %v546_v21, %v1414_v25  ;;  %v815_v25 = vld [vmem:[%s1685_s17 + $0x78] sm:$0xff] }
 0x359   :  { %v550_v24 = vmul.f32 0.5, %v549_v22  ;;  %820 = vmatpush.msra.mxu1 %v815_v25  ;;  %1017 = vmatpush.msra.mxu2 %v815_v25 }
 0x35a   :  { %v566_v26 = vmul.f32 %v1037_v4, %v559_v23  ;;  %v800_v23 = vld [vmem:[%s1685_s17] sm:$0xff] }
 0x35b   :  { %v551_v27 = vsub.f32 1.5, %v550_v24  ;;  %821 = vmatpush.msra.mxu1 %v814_v34  ;;  %1018 = vmatpush.msra.mxu2 %v814_v34 }
 0x35c   :  { %v573_v20 = vadd.f32 %v1038_v59, %v566_v26 }
 0x35d   :  { %v552_v28 = vmul.f32 %v1052_v16, %v551_v27  ;;  %822 = vmatpush.msra.mxu1 %v813_v35  ;;  %1019 = vmatpush.msra.mxu2 %v813_v35 }
 0x35e   :  { %1007 = vmatmul.msk.f32.gmra.mxu0 %vm81_vm0, %v573_v20 }
 0x35f   :  { %v556_v29 = vsel %vm555_vm12, %v1052_v16, %v552_v28  ;;  %823 = vmatpush.msra.mxu1 %v812_v36  ;;  %1020 = vmatpush.msra.mxu2 %v812_v36 }
 0x360   :  { %v560_v31 = vmul.f32 %v556_v29, %v1421_v30  ;;  %v1464_v30 = vld [vmem:[%s1682_s16] ss:$0 sm:$0xff] }
 0x361   :  { %824 = vmatpush.msra.mxu1 %v811_v39  ;;  %1021 = vmatpush.msra.mxu2 %v811_v39 }
 0x362   :  { %v567_v32 = vmul.f32 %v1037_v4, %v560_v31 }
 0x363   :  { %825 = vmatpush.msra.mxu1 %v810_v41  ;;  %1022 = vmatpush.msra.mxu2 %v810_v41 }
 0x364   :  { %v574_v33 = vadd.f32 %v1038_v59, %v567_v32 }
 0x365   :  { %826 = vmatpush.msra.mxu1 %v809_v43  ;;  %1023 = vmatpush.msra.mxu2 %v809_v43 }
 0x366   :  { %1008 = vmatmul.msk.f32.gmra.mxu0 %vm81_vm0, %v574_v33 }
 0x367   :  { %827 = vmatpush.msra.mxu1 %v808_v45  ;;  %1024 = vmatpush.msra.mxu2 %v808_v45 }
 0x369   :  { %828 = vmatpush.msra.mxu1 %v807_v51  ;;  %1025 = vmatpush.msra.mxu2 %v807_v51 }
 0x36b   :  { %829 = vmatpush.msra.mxu1 %v806_v55  ;;  %1026 = vmatpush.msra.mxu2 %v806_v55 }
 0x36d   :  { %830 = vmatpush.msra.mxu1 %v805_v58  ;;  %1027 = vmatpush.msra.mxu2 %v805_v58 }
 0x36f   :  { %831 = vmatpush.msra.mxu1 %v804_v2  ;;  %1028 = vmatpush.msra.mxu2 %v804_v2 }
 0x371   :  { %832 = vmatpush.msra.mxu1 %v803_v7  ;;  %1029 = vmatpush.msra.mxu2 %v803_v7 }
 0x373   :  { %833 = vmatpush.msra.mxu1 %v802_v11  ;;  %1030 = vmatpush.msra.mxu2 %v802_v11 }
 0x375   :  { %834 = vmatpush.msra.mxu1 %v801_v17  ;;  %1031 = vmatpush.msra.mxu2 %v801_v17 }
 0x377   :  { %835 = vmatpush.msra.mxu1 %v800_v23  ;;  %1032 = vmatpush.msra.mxu2 %v800_v23 }
 0x3cb   :  { %v612_v37 = vpop.f32.mrf.mxu0 }
 0x3cc   :  { %v1473_v38 = vadd.f32 %v1464_v30, %v612_v37 }
 0x3ce   :  { %v1479_v40 = vmul.f32 0.70710677, %v1473_v38 }
 0x3d0   :  { %v632_v42 = vmul.f32 %v1479_v40, %v1479_v40 }
 0x3d2   :  { %v1489_v44 = vmin.f32 %v632_v42, 16.0 }
 0x3d3   :  { %v615_v46 = vpop.f32.mrf.mxu0 }
 0x3d4   :  { %v634_v48 = vmul.f32 2.1237322e-06, %v1489_v44  ;;  %v645_v49 = vmul.f32 3.8918573e-05, %v1489_v44  ;;  %v1497_v50 = vadd.f32 %v1464_v30, %v615_v46 }
 0x3d6   :  { %v635_v52 = vadd.f32 0.00028619796, %v634_v48  ;;  %v646_v53 = vadd.f32 0.001143296, %v645_v49  ;;  %v1506_v4 = vmul.f32 0.70710677, %v1497_v50 }
 0x3d8   :  { %v636_v56 = vmul.f32 %v635_v52, %v1489_v44  ;;  %v647_v57 = vmul.f32 %v646_v53, %v1489_v44  ;;  %v672_v59 = vmul.f32 %v1506_v4, %v1506_v4 }
 0x3da   :  { %v648_v61 = vadd.f32 0.014752088, %v647_v57  ;;  %v637_v62 = vadd.f32 0.0036580483, %v636_v56  ;;  %v1518_v63 = vmin.f32 %v672_v59, 16.0 }
 0x3db   :  { %v618_v3 = vpop.f32.mrf.mxu0 }
 0x3dc   :  { %v649_v5 = vmul.f32 %v648_v61, %v1489_v44  ;;  %v1522_v1 = vadd.f32 %v1464_v30, %v618_v3  ;;  %v674_v8 = vmul.f32 2.1237322e-06, %v1518_v63  ;;  %v685_v9 = vmul.f32 3.8918573e-05, %v1518_v63 }
 0x3dd   :  { %v638_v12 = vmul.f32 %v637_v62, %v1489_v44 }
 0x3de   :  { %v650_v10 = vadd.f32 0.112945676, %v649_v5  ;;  %v675_v14 = vadd.f32 0.00028619796, %v674_v8  ;;  %v1534_v15 = vmul.f32 0.70710677, %v1522_v1 }
 0x3df   :  { %v686_v0 = vadd.f32 0.001143296, %v685_v9  ;;  %v639_v24 = vadd.f32 0.05243302, %v638_v12 }
 0x3e0   :  { %v651_v16 = vmul.f32 %v650_v10, %v1489_v44  ;;  %v676_v18 = vmul.f32 %v675_v14, %v1518_v63  ;;  %v712_v19 = vmul.f32 %v1534_v15, %v1534_v15 }
 0x3e1   :  { %v687_v21 = vmul.f32 %v686_v0, %v1518_v63  ;;  %v640_v36 = vmul.f32 %v639_v24, %v1489_v44 }
 0x3e2   :  { %v652_v22 = vadd.f32 0.4994258, %v651_v16  ;;  %v1547_v26 = vmin.f32 %v712_v19, 16.0  ;;  %v677_v31 = vadd.f32 0.0036580483, %v676_v18 }
 0x3e3   :  { %v621_v27 = vpop.f32.mrf.mxu0  ;;  %v688_v20 = vadd.f32 0.014752088, %v687_v21  ;;  %v641_v46 = vadd.f32 0.18741608, %v640_v36 }
 0x3e4   :  { %v653_v28 = vmul.f32 %v652_v22, %v1489_v44  ;;  %v1551_v29 = vadd.f32 %v1464_v30, %v621_v27  ;;  %v714_v32 = vmul.f32 2.1237322e-06, %v1547_v26  ;;  %v725_v33 = vmul.f32 3.8918573e-05, %v1547_v26 }
 0x3e5   :  { %v689_v35 = vmul.f32 %v688_v20, %v1518_v63  ;;  %v678_v41 = vmul.f32 %v677_v31, %v1518_v63  ;;  %v642_v2 = vmul.f32 %v641_v46, %v1489_v44 }
 0x3e6   :  { %v654_v25 = vadd.f32 1.0, %v653_v28  ;;  %v1556_v34 = vmul.f32 0.70710677, %v1551_v29  ;;  %v715_v37 = vadd.f32 0.00028619796, %v714_v32 }
 0x3e7   :  { %v726_v39 = vadd.f32 0.001143296, %v725_v33  ;;  %v690_v45 = vadd.f32 0.112945676, %v689_v35  ;;  %v679_v53 = vadd.f32 0.05243302, %v678_v41 }
 0x3e8   :  { %1053 = vrcp.f32 %v654_v25  ;;  %v716_v30 = vmul.f32 %v715_v37, %v1547_v26  ;;  %v752_v43 = vmul.f32 %v1556_v34, %v1556_v34  ;;  %v666_v10 = vand.u32 2147483648, %v654_v25 }
 0x3e9   :  { %v727_v42 = vmul.f32 %v726_v39, %v1547_v26  ;;  %v691_v52 = vmul.f32 %v690_v45, %v1518_v63  ;;  %v680_v11 = vmul.f32 %v679_v53, %v1518_v63  ;;  %v643_v17 = vadd.f32 1.1283791, %v642_v2 }
 0x3ea   :  { %v717_v48 = vadd.f32 0.0036580483, %v716_v30  ;;  %v1565_v51 = vmin.f32 %v752_v43, 16.0  ;;  %v664_v44 = vand.u32 2147483647, %v654_v25  ;;  %vm660_vm14 = vweird.f32 %v654_v25 }
 0x3eb   :  { %v728_v49 = vadd.f32 0.014752088, %v727_v42  ;;  %v692_v59 = vadd.f32 0.4994258, %v691_v52  ;;  %v667_v23 = vor.u32 1.1754944e-38, %v666_v10  ;;  %v644_v31 = vmul.f32 %v643_v17, %v1479_v40 }
 0x3ec   :  { %v718_v55 = vmul.f32 %v717_v48, %v1547_v26  ;;  %v754_v58 = vmul.f32 2.1237322e-06, %v1565_v51  ;;  %v765_v61 = vmul.f32 3.8918573e-05, %v1565_v51  ;;  %v681_v24 = vadd.f32 0.18741608, %v680_v11 }
 0x3ed   :  { %v729_v57 = vmul.f32 %v728_v49, %v1547_v26  ;;  %v693_v7 = vmul.f32 %v692_v59, %v1518_v63  ;;  %vm665_vm1 = vcmp.eq.f32.partialorder %v664_v44, 8.507059e+37  ;;  %v624_v40 = vmul.f32 0.5, %v1473_v38 }
 0x3ee   :  { %v1054_v56 = vpop.eup %1053  ;;  %v755_v5 = vadd.f32 0.00028619796, %v754_v58  ;;  %v766_v8 = vadd.f32 0.001143296, %v765_v61  ;;  %v719_v12 = vadd.f32 0.05243302, %v718_v55 }
 0x3ef   :  { %v656_v62 = vmul.f32 %v1054_v56, %v654_v25  ;;  %v730_v3 = vadd.f32 0.112945676, %v729_v57  ;;  %v694_v0 = vadd.f32 1.0, %v693_v7  ;;  %vm661_vm13 = vweird.f32 %v1054_v56 }
 0x3f0   :  { %v767_v16 = vmul.f32 %v766_v8, %v1565_v51  ;;  %v756_v21 = vmul.f32 %v755_v5, %v1565_v51  ;;  %vm662_vm15 = vmor %vm660_vm14, %vm661_vm13  ;;  %v720_v27 = vmul.f32 %v719_v12, %v1547_v26  ;;  %v682_v25 = vmul.f32 %v681_v24, %v1518_v63 }
 0x3f1   :  { %v657_v9 = vsub.f32 1.0, %v656_v62  ;;  %v731_v14 = vmul.f32 %v730_v3, %v1547_v26  ;;  %1055 = vrcp.f32 %v694_v0  ;;  %v706_v55 = vand.u32 2147483648, %v694_v0 }
 0x3f2   :  { %v768_v28 = vadd.f32 0.014752088, %v767_v16  ;;  %v757_v36 = vadd.f32 0.0036580483, %v756_v21  ;;  %v721_v30 = vadd.f32 0.18741608, %v720_v27  ;;  %vm700_vm3 = vweird.f32 %v694_v0 }
 0x3f3   :  { %v658_v18 = vmul.f32 %v1054_v56, %v657_v9  ;;  %v732_v19 = vadd.f32 0.4994258, %v731_v14  ;;  %v683_v52 = vadd.f32 1.1283791, %v682_v25  ;;  %v704_v63 = vand.u32 2147483647, %v694_v0 }
 0x3f4   :  { %v769_v37 = vmul.f32 %v768_v28, %v1565_v51  ;;  %v758_v45 = vmul.f32 %v757_v36, %v1565_v51  ;;  %v722_v53 = vmul.f32 %v721_v30, %v1547_v26  ;;  %v707_v5 = vor.u32 1.1754944e-38, %v706_v55 }
 0x3f5   :  { %v659_v22 = vadd.f32 %v1054_v56, %v658_v18  ;;  %v733_v20 = vmul.f32 %v732_v19, %v1547_v26  ;;  %v684_v38 = vmul.f32 %v683_v52, %v1506_v4  ;;  %vm705_vm5 = vcmp.eq.f32.partialorder %v704_v63, 8.507059e+37 }
 0x3f6   :  { %v770_v46 = vadd.f32 0.112945676, %v769_v37  ;;  %v759_v61 = vadd.f32 0.05243302, %v758_v45  ;;  %v723_v7 = vadd.f32 1.1283791, %v722_v53 }
 0x3f7   :  { %v663_v32 = vsel %vm662_vm15, %v1054_v56, %v659_v22  ;;  %v734_v35 = vadd.f32 1.0, %v733_v20  ;;  %v1056_v41 = vpop.eup %1055  ;;  %v625_v44 = vmul.f32 0.5, %v1497_v50  ;;  %v626_v36 = vmul.f32 0.5, %v1522_v1  ;;  %v1040_v53 = vld [vmem:[%s1684_s18] ss:$0 sm:$0xff] }
 0x3f8   :  { %v668_v33 = vsel %vm665_vm1, %v667_v23, %v663_v32  ;;  %v696_v43 = vmul.f32 %v1056_v41, %v694_v0  ;;  %v771_v56 = vmul.f32 %v770_v46, %v1565_v51  ;;  %vm701_vm2 = vweird.f32 %v1056_v41 }
 0x3f9   :  { %v669_v39 = vmul.f32 %v668_v33, %v644_v31  ;;  %1057 = vrcp.f32 %v734_v35  ;;  %vm702_vm4 = vmor %vm700_vm3, %vm701_vm2  ;;  %v746_v10 = vand.u32 2147483648, %v734_v35  ;;  %v760_v11 = vmul.f32 %v759_v61, %v1565_v51 }
 0x3fa   :  { %v697_v49 = vsub.f32 1.0, %v696_v43  ;;  %v772_v2 = vadd.f32 0.4994258, %v771_v56  ;;  %v744_v17 = vand.u32 2147483647, %v734_v35  ;;  %vm740_vm7 = vweird.f32 %v734_v35 }
 0x3fb   :  { %v1009_v42 = vclamps-f32 %v669_v39, 1.0  ;;  %v747_v19 = vor.u32 1.1754944e-38, %v746_v10  ;;  %v761_v21 = vadd.f32 0.18741608, %v760_v11  ;;  %v724_v22 = vmul.f32 %v723_v7, %v1534_v15 }
 0x3fc   :  { %v698_v58 = vmul.f32 %v1056_v41, %v697_v49  ;;  %v773_v26 = vmul.f32 %v772_v2, %v1565_v51  ;;  %vm745_vm9 = vcmp.eq.f32.partialorder %v744_v17, 8.507059e+37 }
 0x3fd   :  { %v792_v48 = vadd.f32 1.0, %v1009_v42  ;;  %v762_v32 = vmul.f32 %v761_v21, %v1565_v51 }
 0x3fe   :  { %v699_v3 = vadd.f32 %v1056_v41, %v698_v58  ;;  %v774_v14 = vadd.f32 1.0, %v773_v26 }
 0x3ff   :  { %v796_v57 = vmul.f32 %v792_v48, %v624_v40  ;;  %v1058_v59 = vpop.eup %1057  ;;  %v763_v39 = vadd.f32 1.1283791, %v762_v32  ;;  %v627_v48 = vmul.f32 0.5, %v1551_v29 }
 0x400   :  { %v736_v62 = vmul.f32 %v1058_v59, %v734_v35  ;;  %v703_v9 = vsel %vm702_vm4, %v1056_v41, %v699_v3  ;;  %vm741_vm6 = vweird.f32 %v1058_v59  ;;  %1059 = vrcp.f32 %v774_v14 }
 0x401   :  { %836 = vmatmul.f32.vlgmr.msra.gmra.mxu1 %v796_v57  ;;  %v708_v12 = vsel %vm705_vm5, %v707_v5, %v703_v9  ;;  %vm742_vm8 = vmor %vm740_vm7, %vm741_vm6  ;;  %v786_v41 = vand.u32 2147483648, %v774_v14  ;;  %v784_v30 = vand.u32 2147483647, %v774_v14  ;;  %vm780_vm11 = vweird.f32 %v774_v14 }
 0x402   :  { %v737_v8 = vsub.f32 1.0, %v736_v62  ;;  %v709_v18 = vmul.f32 %v708_v12, %v684_v38  ;;  %v764_v51 = vmul.f32 %v763_v39, %v1556_v34 }
 0x403   :  { %v787_v43 = vor.u32 1.1754944e-38, %v786_v41  ;;  %vm785_vm13 = vcmp.eq.f32.partialorder %v784_v30, 8.507059e+37  ;;  %v1041_v41 = vld [vmem:[%s1687_s19] ss:$0 sm:$0xff] }
 0x404   :  { %v738_v16 = vmul.f32 %v1058_v59, %v737_v8  ;;  %v1010_v4 = vclamps-f32 %v709_v18, 1.0  ;;  %v1042_v30 = vld [vmem:[%s1688_s20] ss:$0 sm:$0xff] }
 0x406   :  { %v739_v0 = vadd.f32 %v1058_v59, %v738_v16  ;;  %v793_v24 = vadd.f32 1.0, %v1010_v4  ;;  %v1060_v31 = vpop.eup %1059 }
 0x407   :  { %v776_v35 = vmul.f32 %v1060_v31, %v774_v14  ;;  %vm781_vm10 = vweird.f32 %v1060_v31 }
 0x408   :  { %v743_v23 = vsel %vm742_vm8, %v1058_v59, %v739_v0  ;;  %v797_v28 = vmul.f32 %v793_v24, %v625_v44  ;;  %vm782_vm12 = vmor %vm780_vm11, %vm781_vm10 }
 0x409   :  { %v748_v27 = vsel %vm745_vm9, %v747_v19, %v743_v23  ;;  %v777_v37 = vsub.f32 1.0, %v776_v35 }
 0x40a   :  { %v749_v20 = vmul.f32 %v748_v27, %v724_v22  ;;  %839 = vmatmul.f32.gmra.mxu1 %v797_v28 }
 0x40b   :  { %v778_v15 = vmul.f32 %v1060_v31, %v777_v37 }
 0x40c   :  { %v1011_v33 = vclamps-f32 %v749_v20, 1.0 }
 0x40d   :  { %v779_v42 = vadd.f32 %v1060_v31, %v778_v15 }
 0x40e   :  { %v794_v50 = vadd.f32 1.0, %v1011_v33 }
 0x40f   :  { %v783_v45 = vsel %vm782_vm12, %v1060_v31, %v779_v42 }
 0x410   :  { %v798_v25 = vmul.f32 %v794_v50, %v626_v36  ;;  %v788_v46 = vsel %vm785_vm13, %v787_v43, %v783_v45 }
 0x411   :  { %v789_v40 = vmul.f32 %v788_v46, %v764_v51 }
 0x412   :  { %842 = vmatmul.f32.vlgmr.msra.gmra.mxu2 %v798_v25 }
 0x413   :  { %v1012_v1 = vclamps-f32 %v789_v40, 1.0 }
 0x415   :  { %v795_v49 = vadd.f32 1.0, %v1012_v1 }
 0x417   :  { %v799_v52 = vmul.f32 %v795_v49, %v627_v48 }
 0x41a   :  { %845 = vmatmul.f32.gmra.mxu2 %v799_v52 }
 0x47e   :  { %v837_v55 = vpop.f32.mrf.mxu1 }
 0x47f   :  { %v838_v56 = vadd.f32 %v1040_v53, %v837_v55 }
 0x481   :  { %v849_v57 = vadd.f32 %v838_v56, %v1372_v47 }
 0x483   :  { %853 = vst.msk [vmem:[%s1686_s21] sm:$0xff] %vm81_vm0, %v849_v57  ;;  %v859_v34 = vsel %vm81_vm0, %v849_v57, 0.0 }
 0x484   :  { %860 = vadd.xlane.f32.xlu2 %v859_v34 }
 0x487   :  { %v840_v29 = vpop.f32.mrf.mxu1 }
 0x488   :  { %v841_v58 = vadd.f32 %v1040_v53, %v840_v29 }
 0x48a   :  { %v850_v63 = vadd.f32 %v841_v58, %v1380_v54 }
 0x48c   :  { %854 = vst.msk [vmem:[%s1686_s21 + $0x8] sm:$0xff] %vm81_vm0, %v850_v63  ;;  %v862_v59 = vsel %vm81_vm0, %v850_v63, 0.0 }
 0x48d   :  { %863 = vadd.xlane.f32.xlu0 %v862_v59 }
 0x495   :  { %v843_v47 = vpop.f32.mrf.mxu2 }
 0x496   :  { %v844_v61 = vadd.f32 %v1040_v53, %v843_v47 }
 0x498   :  { %v851_v2 = vadd.f32 %v844_v61, %v1388_v60 }
 0x49a   :  { %855 = vst.msk [vmem:[%s1686_s21 + $0x10] sm:$0xff] %vm81_vm0, %v851_v2  ;;  %v865_v62 = vsel %vm81_vm0, %v851_v2, 0.0 }
 0x49b   :  { %866 = vadd.xlane.f32.xlu1 %v865_v62 }
 0x49d   :  { %v846_v54 = vpop.f32.mrf.mxu2 }
 0x49e   :  { %v847_v3 = vadd.f32 %v1040_v53, %v846_v54 }
 0x4a0   :  { %v852_v38 = vadd.f32 %v847_v3, %v1396_v6 }
 0x4a2   :  { %856 = vst.msk [vmem:[%s1686_s21 + $0x18] sm:$0xff] %vm81_vm0, %v852_v38  ;;  %v868_v5 = vsel %vm81_vm0, %v852_v38, 0.0 }
 0x4a3   :  { %869 = vadd.xlane.f32.xlu2 %v868_v5 }
 0x4f7   :  { %v861_v60 = vpop.xlane.xlu2 %860 }
 0x4f8   :  { %v871_v26 = vmul.f32 %v861_v60, %v1400_v13 }
 0x4fa   :  { %v875_v7 = vsub.f32 %v849_v57, %v871_v26 }
 0x4fc   :  { %v879_v8 = vmul.f32 %v875_v7, %v875_v7 }
 0x4fe   :  { %v883_v9 = vsel %vm81_vm0, %v879_v8, 0.0 }
 0x4ff   :  { %884 = vadd.xlane.f32.xlu0 %v883_v9 }
 0x500   :  { %v864_v10 = vpop.xlane.xlu0 %863 }
 0x501   :  { %v872_v11 = vmul.f32 %v864_v10, %v1400_v13 }
 0x503   :  { %v876_v6 = vsub.f32 %v850_v63, %v872_v11 }
 0x505   :  { %v880_v12 = vmul.f32 %v876_v6, %v876_v6 }
 0x507   :  { %v886_v14 = vsel %vm81_vm0, %v880_v12, 0.0 }
 0x508   :  { %887 = vadd.xlane.f32.xlu1 %v886_v14 }
 0x50e   :  { %v867_v16 = vpop.xlane.xlu1 %866 }
 0x50f   :  { %v873_v17 = vmul.f32 %v867_v16, %v1400_v13 }
 0x511   :  { %v1628_v18 = vsub.f32 %v851_v2, %v873_v17 }
 0x513   :  { %v881_v0 = vmul.f32 %v1628_v18, %v1628_v18 }
 0x515   :  { %v889_v4 = vsel %vm81_vm0, %v881_v0, 0.0 }
 0x516   :  { %890 = vadd.xlane.f32.xlu2 %v889_v4  ;;  %v870_v44 = vpop.xlane.xlu2 %869 }
 0x517   :  { %v874_v19 = vmul.f32 %v870_v44, %v1400_v13 }
 0x519   :  { %v1634_v21 = vsub.f32 %v852_v38, %v874_v19 }
 0x51b   :  { %v882_v22 = vmul.f32 %v1634_v21, %v1634_v21 }
 0x51d   :  { %v892_v23 = vsel %vm81_vm0, %v882_v22, 0.0 }
 0x51e   :  { %893 = vadd.xlane.f32.xlu0 %v892_v23 }
 0x572   :  { %v885_v24 = vpop.xlane.xlu0 %884 }
 0x573   :  { %v895_v27 = vmul.f32 %v885_v24, %v1400_v13 }
 0x575   :  { %v899_v20 = vadd.f32 1e-06, %v895_v27 }
 0x577   :  { %1061 = vrsqrt.f32 %v899_v20  ;;  %vm909_vm15 = vweird.f32 %v899_v20 }
 0x57b   :  { %v888_v32 = vpop.xlane.xlu1 %887 }
 0x57c   :  { %v896_v33 = vmul.f32 %v888_v32, %v1400_v13 }
 0x57d   :  { %v1062_v28 = vpop.eup %1061 }
 0x57e   :  { %v904_v31 = vmul.f32 %v1062_v28, %v899_v20  ;;  %v900_v36 = vadd.f32 1e-06, %v896_v33  ;;  %vm910_vm14 = vweird.f32 %v1062_v28 }
 0x57f   :  { %vm911_vm1 = vmor %vm909_vm15, %vm910_vm14 }
 0x580   :  { %v905_v35 = vmul.f32 %v1062_v28, %v904_v31  ;;  %1063 = vrsqrt.f32 %v900_v36  ;;  %vm919_vm3 = vweird.f32 %v900_v36 }
 0x582   :  { %v906_v50 = vmul.f32 0.5, %v905_v35 }
 0x584   :  { %v907_v37 = vsub.f32 1.5, %v906_v50 }
 0x586   :  { %v908_v39 = vmul.f32 %v1062_v28, %v907_v37  ;;  %v1064_v15 = vpop.eup %1063 }
 0x587   :  { %v914_v43 = vmul.f32 %v1064_v15, %v900_v36  ;;  %vm920_vm2 = vweird.f32 %v1064_v15 }
 0x588   :  { %v912_v25 = vsel %vm911_vm1, %v1062_v28, %v908_v39  ;;  %vm921_vm4 = vmor %vm919_vm3, %vm920_vm2 }
 0x589   :  { %v943_v42 = vmul.f32 %v912_v25, %v875_v7  ;;  %v891_v51 = vpop.xlane.xlu2 %890  ;;  %v915_v40 = vmul.f32 %v1064_v15, %v914_v43 }
 0x58a   :  { %v897_v46 = vmul.f32 %v891_v51, %v1400_v13 }
 0x58b   :  { %v950_v45 = vmul.f32 %v1041_v41, %v943_v42  ;;  %v916_v49 = vmul.f32 0.5, %v915_v40 }
 0x58c   :  { %v901_v48 = vadd.f32 1e-06, %v897_v46 }
 0x58d   :  { %v957_v1 = vadd.f32 %v1042_v30, %v950_v45  ;;  %v917_v52 = vsub.f32 1.5, %v916_v49 }
 0x58e   :  { %1065 = vrsqrt.f32 %v901_v48  ;;  %vm929_vm6 = vweird.f32 %v901_v48 }
 0x58f   :  { %961 = vst.msk [vmem:[%s1689_s22] sm:$0xff] %vm81_vm0, %v957_v1  ;;  %v918_v53 = vmul.f32 %v1064_v15, %v917_v52 }
 0x591   :  { %v922_v55 = vsel %vm921_vm4, %v1064_v15, %v918_v53  ;;  %v894_v29 = vpop.xlane.xlu0 %893 }
 0x592   :  { %v944_v57 = vmul.f32 %v922_v55, %v876_v6  ;;  %v898_v63 = vmul.f32 %v894_v29, %v1400_v13 }
 0x594   :  { %v1066_v56 = vpop.eup %1065  ;;  %v951_v58 = vmul.f32 %v1041_v41, %v944_v57  ;;  %v902_v61 = vadd.f32 1e-06, %v898_v63 }
 0x595   :  { %v924_v34 = vmul.f32 %v1066_v56, %v901_v48  ;;  %vm930_vm5 = vweird.f32 %v1066_v56 }
 0x596   :  { %v958_v47 = vadd.f32 %v1042_v30, %v951_v58  ;;  %1067 = vrsqrt.f32 %v902_v61  ;;  %vm931_vm7 = vmor %vm929_vm6, %vm930_vm5  ;;  %vm939_vm9 = vweird.f32 %v902_v61 }
 0x597   :  { %v925_v59 = vmul.f32 %v1066_v56, %v924_v34 }
 0x598   :  { %962 = vst.msk [vmem:[%s1689_s22 + $0x8] sm:$0xff] %vm81_vm0, %v958_v47 }
 0x599   :  { %v926_v2 = vmul.f32 0.5, %v925_v59 }
 0x59b   :  { %v927_v62 = vsub.f32 1.5, %v926_v2 }
 0x59c   :  { %v1068_v38 = vpop.eup %1067 }
 0x59d   :  { %v928_v54 = vmul.f32 %v1066_v56, %v927_v62  ;;  %v934_v13 = vmul.f32 %v1068_v38, %v902_v61  ;;  %vm940_vm8 = vweird.f32 %v1068_v38 }
 0x59e   :  { %vm941_vm10 = vmor %vm939_vm9, %vm940_vm8 }
 0x59f   :  { %v932_v3 = vsel %vm931_vm7, %v1066_v56, %v928_v54  ;;  %v935_v26 = vmul.f32 %v1068_v38, %v934_v13 }
 0x5a0   :  { %v945_v5 = vmul.f32 %v932_v3, %v1628_v18 }
 0x5a1   :  { %v936_v8 = vmul.f32 0.5, %v935_v26 }
 0x5a2   :  { %v952_v60 = vmul.f32 %v1041_v41, %v945_v5 }
 0x5a3   :  { %v937_v9 = vsub.f32 1.5, %v936_v8 }
 0x5a4   :  { %v959_v7 = vadd.f32 %v1042_v30, %v952_v60 }
 0x5a5   :  { %v938_v10 = vmul.f32 %v1068_v38, %v937_v9 }
 0x5a6   :  { %963 = vst.msk [vmem:[%s1689_s22 + $0x10] sm:$0xff] %vm81_vm0, %v959_v7 }
 0x5a7   :  { %v942_v11 = vsel %vm941_vm10, %v1068_v38, %v938_v10 }
 0x5a8   :  { %v946_v6 = vmul.f32 %v942_v11, %v1634_v21 }
 0x5aa   :  { %v953_v12 = vmul.f32 %v1041_v41, %v946_v6 }
 0x5ac   :  { %v960_v14 = vadd.f32 %v1042_v30, %v953_v12 }
 0x5ae   :  { %964 = vst.msk [vmem:[%s1689_s22 + $0x18] sm:$0xff] %vm81_vm0, %v960_v14 }

</bundles_post_ra>
